<compile_context>
chip_gen: v5e
topology: v5e:2x2
jax: 0.10.0
libtpu: 0.0.40
codegen_flags: <defaults>
</compile_context>

<pallas_src>
import numpy as np
import jax
import jax.numpy as jnp
from jax import lax
from jax.experimental import pallas as pl
from jax.experimental.pallas import tpu as pltpu

EPS = 1e-5
# Set to jnp.bfloat16 to halve the one-time weight DMA (dominant HBM traffic);
# kept f32 to preserve accuracy margin vs. the full-precision reference (see header).
WEIGHT_DTYPE = jnp.float32

ORDER = ("stem", "d0", "d1", "b0a", "b0b", "b1a", "b1b", "u0", "u1", "out")
# (activation, save residual before, add residual after) per layer in ORDER.
PLAN = (("relu", 0, 0), ("relu", 0, 0), ("relu", 0, 0),
        ("relu", 1, 0), ("none", 0, 1),
        ("relu", 1, 0), ("none", 0, 1),
        ("relu", 0, 0), ("relu", 0, 0), ("tanh", 0, 0))


# ---------------------------------------------------------------------------
# Host-side structure builders (numpy, run once at pack time).
# ---------------------------------------------------------------------------
def _col_map(w_in, k, stride, pad, mode):
    """S[jsrc, kw, jout]=1 where output col jout reads source col jsrc via kernel col kw."""
    w_out = (w_in + 2 * pad - k) // stride + 1
    S = np.zeros((w_in, k, w_out), np.float32)
    for j in range(w_out):
        for kw in range(k):
            jsrc = j * stride + kw - pad
            if jsrc < 0:
                if mode != "reflect":
                    continue
                jsrc = -jsrc
            elif jsrc >= w_in:
                if mode != "reflect":
                    continue
                jsrc = 2 * (w_in - 1) - jsrc
            S[jsrc, kw, j] += 1.0
    return S


def _up_col_map(w_in):
    """Column map for ConvTranspose2d(k=3, s=2, p=1, op=1) in the W direction."""
    w_out = 2 * w_in
    S = np.zeros((w_in, 3, w_out), np.float32)
    for ox in range(w_out):
        for kx in range(3):
            m = ox + kx - 1
            if m >= 0 and m % 2 == 0 and m // 2 < w_in:
                S[m // 2, kx, ox] += 1.0
    return S


def _row_map_conv(h_in, k, stride, pad, mode):
    """Per-tap row selection: Rs[kh, i, r]=1 iff output row i reads input row r via kernel
    row kh (H-direction padding/stride folded in; out-of-range zero rows are all-zero)."""
    h_out = (h_in + 2 * pad - k) // stride + 1
    Rs = np.zeros((k, h_out, h_in), np.float32)
    for i in range(h_out):
        for kh in range(k):
            r = i * stride + kh - pad
            if r < 0:
                if mode != "reflect":
                    continue
                r = -r
            elif r >= h_in:
                if mode != "reflect":
                    continue
                r = 2 * (h_in - 1) - r
            Rs[kh, i, r] += 1.0
    return Rs


def _row_map_up(h_in):
    """ConvTranspose (k=3,s=2,p=1,op=1) H-direction decomposition by output-row parity:
    tap0: even rows <- in[t] (ky=1); tap1: odd rows <- in[t] (ky=0); tap2: odd <- in[t+1]."""
    h_out = 2 * h_in
    Rs = np.zeros((3, h_out, h_in), np.float32)
    for t in range(h_in):
        Rs[0, 2 * t, t] = 1.0
        Rs[1, 2 * t + 1, t] = 1.0
        if t + 1 < h_in:
            Rs[2, 2 * t + 1, t + 1] = 1.0
    return Rs


def _block_diag(Rs, n):
    """(k, ho, hi) -> block-diagonal over the fused batch: (k, n*ho, n*hi)."""
    k, ho, hi = Rs.shape
    out = np.zeros((k, n * ho, n * hi), np.float32)
    for b in range(n):
        out[:, b * ho:(b + 1) * ho, b * hi:(b + 1) * hi] = Rs
    return out


# ---------------------------------------------------------------------------
# Weight packing (run once outside the jitted forward): fold BN + W structure + row maps.
# ---------------------------------------------------------------------------
def pack_params(params, N=2, H=16, W=16, cin_pad=8, out_pad=8):
    H1, H2 = H // 2, H // 4
    W1, W2 = W // 2, W // 4

    def fold_bn(p):
        s = p["gamma"] / jnp.sqrt(p["var"] + EPS)
        b = p["b"] * s + (p["beta"] - p["mean"] * s)
        return s, b

    def pack_conv(p, h_in, w_in, k, stride, pad, mode, with_bn=True,
                  cin_pad_to=None, cout_pad_to=None):
        w = p["w"]                                      # (Cout, Cin, k, k)
        cout, cin = int(w.shape[0]), int(w.shape[1])
        if with_bn:
            s, b = fold_bn(p)
        else:
            s, b = jnp.ones((cout,), jnp.float32), p["b"]
        if cin_pad_to is not None and cin_pad_to > cin:
            w = jnp.pad(w, ((0, 0), (0, cin_pad_to - cin), (0, 0), (0, 0)))
            cin = cin_pad_to
        if cout_pad_to is not None and cout_pad_to > cout:
            w = jnp.pad(w, ((0, cout_pad_to - cout), (0, 0), (0, 0), (0, 0)))
            s = jnp.pad(s, (0, cout_pad_to - cout))
            b = jnp.pad(b, (0, cout_pad_to - cout))
            cout = cout_pad_to
        S = jnp.asarray(_col_map(w_in, k, stride, pad, mode))
        w_out = int(S.shape[2])
        ws = w * s[:, None, None, None]
        taps = jnp.stack([
            jnp.einsum("awj,dcw->acjd", S, ws[:, :, kh, :],
                       precision=lax.Precision.HIGHEST).reshape(w_in * cin, w_out * cout)
            for kh in range(k)], 0)
        brow = jnp.tile(b, (w_out,)).reshape(1, w_out * cout)
        Rs = jnp.asarray(_block_diag(_row_map_conv(h_in, k, stride, pad, mode), N))
        return (Rs, taps.astype(WEIGHT_DTYPE), brow)

    def pack_up(p, h_in, w_in):
        wt = p["w"]                                     # (Cin, Cout, 3, 3)
        cin, cout = int(wt.shape[0]), int(wt.shape[1])
        s, b = fold_bn(p)
        w_eq = jnp.flip(wt, (2, 3)).transpose(1, 0, 2, 3) * s[:, None, None, None]
        S = jnp.asarray(_up_col_map(w_in))
        w_out = 2 * w_in

        def bw(ky):
            return jnp.einsum("awj,dcw->acjd", S, w_eq[:, :, ky, :],
                              precision=lax.Precision.HIGHEST).reshape(w_in * cin, w_out * cout)

        taps = jnp.stack([bw(1), bw(0), bw(2)], 0)      # order matches _row_map_up taps
        brow = jnp.tile(b, (w_out,)).reshape(1, w_out * cout)
        Rs = jnp.asarray(_block_diag(_row_map_up(h_in), N))
        return (Rs, taps.astype(WEIGHT_DTYPE), brow)

    packed = {
        "stem": pack_conv(params["stem"], H, W, 7, 1, 3, "reflect", cin_pad_to=cin_pad),
        "d0": pack_conv(params["down"][0], H, W, 3, 2, 1, "zero"),
        "d1": pack_conv(params["down"][1], H1, W1, 3, 2, 1, "zero"),
        "b0a": pack_conv(params["blocks"][0]["c1"], H2, W2, 3, 1, 1, "reflect"),
        "b0b": pack_conv(params["blocks"][0]["c2"], H2, W2, 3, 1, 1, "reflect"),
        "b1a": pack_conv(params["blocks"][1]["c1"], H2, W2, 3, 1, 1, "reflect"),
        "b1b": pack_conv(params["blocks"][1]["c2"], H2, W2, 3, 1, 1, "reflect"),
        "u0": pack_up(params["up"][0], H2, W2),
        "u1": pack_up(params["up"][1], H1, W1),
        "out": pack_conv(params["out"], H, W, 7, 1, 3, "reflect",
                         with_bn=False, cout_pad_to=out_pad),
    }
    # Fail loudly if a re-pack at another size breaks lane density assumptions.
    for name in ORDER:
        _, taps, _ = packed[name]
        assert taps.shape[1] % 128 == 0 and taps.shape[2] % 128 == 0, (
            f"layer {name}: packed tap matrices must be 128-lane dense, got {taps.shape}")
    return packed


# ---------------------------------------------------------------------------
# The fused whole-network Pallas kernel (single grid step, batch fused into rows).
# ---------------------------------------------------------------------------
def _make_kernel(plan):
    n_layers = len(plan)

    def kernel(x_ref, *refs):
        assert len(refs) == 3 * n_layers + 1
        o_ref = refs[-1]
        y = x_ref[...]                                  # (N*H, 128) lane-dense slab
        res = None
        for li, (act, save_res, add_res) in enumerate(plan):
            r_ref, w_ref, b_ref = refs[3 * li:3 * li + 3]
            if save_res:
                res = y
            acc = None
            for kh in range(r_ref.shape[0]):
                # Row staging (reflect pad / stride-2 decimation / convT interleave) is a
                # tiny 0/1 block-diagonal matmul -> runs on the MXU, no sublane shuffles.
                v = jnp.dot(r_ref[kh], y, preferred_element_type=jnp.float32)
                t = jnp.dot(v, w_ref[kh].astype(jnp.float32),
                            preferred_element_type=jnp.float32)
                acc = t if acc is None else acc + t
            z = acc + b_ref[...]
            if act == "relu":
                z = jnp.maximum(z, 0.0)
            elif act == "tanh":
                z = jnp.tanh(z)
            if add_res:
                z = z + res
            y = z
        o_ref[...] = y                                  # (N*H, 128) unmasked full-vreg store

    return kernel


def forward(packed, x_nchw, *, output_nc=3, cin_pad=8):
    N, cin, H, W = x_nchw.shape
    assert H % 4 == 0 and W % 4 == 0 and cin <= cin_pad
    # NCHW -> (N*H, W*cin_pad) lane-dense slab (lane = w*cin_pad + c, padded channels zero).
    x = jnp.transpose(x_nchw, (0, 2, 3, 1)).astype(jnp.float32)
    x = jnp.pad(x, ((0, 0), (0, 0), (0, 0), (0, cin_pad - cin)))
    x_flat = x.reshape(N * H, W * cin_pad)

    args = []
    for name in ORDER:
        args.extend(packed[name])

    M = N * H
    L_out = int(packed["out"][1].shape[2])
    assert (W * cin_pad) % 128 == 0 and L_out % 128 == 0
    out_nc_pad = L_out // W

    def full_spec(a):
        nd = a.ndim
        return pl.BlockSpec(a.shape, lambda i, _nd=nd: (0,) * _nd)

    y_flat = pl.pallas_call(
        _make_kernel(PLAN),
        out_shape=jax.ShapeDtypeStruct((M, L_out), jnp.float32),
        grid=(1,),
        in_specs=[full_spec(x_flat)] + [full_spec(a) for a in args],
        out_specs=pl.BlockSpec((M, L_out), lambda i: (0, 0)),
        compiler_params=pltpu.CompilerParams(dimension_semantics=("arbitrary",)),
    )(x_flat, *args)

    y = y_flat.reshape(N, H, W, out_nc_pad)[..., :output_nc]
    return jnp.transpose(y, (0, 3, 1, 2))               # -> NCHW


# ---------------------------------------------------------------------------
# Parameters (deterministic synthetic init) — PyTorch layouts.
# ---------------------------------------------------------------------------
def init_params(key, input_nc=4, output_nc=3, ngf=8, n_downsampling=2, n_blocks=2,
                max_features=1024):
    keys = iter(jax.random.split(key, 64))

    def conv_bn(cin, cout, k, transpose=False):
        shape = (cin, cout, k, k) if transpose else (cout, cin, k, k)
        return dict(
            w=0.1 * jax.random.normal(next(keys), shape, jnp.float32),
            b=0.05 * jax.random.normal(next(keys), (cout,), jnp.float32),
            gamma=1.0 + 0.1 * jax.random.normal(next(keys), (cout,), jnp.float32),
            beta=0.05 * jax.random.normal(next(keys), (cout,), jnp.float32),
            mean=0.05 * jax.random.normal(next(keys), (cout,), jnp.float32),
            var=1.0 + 0.1 * jax.random.uniform(next(keys), (cout,), jnp.float32),
        )

    params = {"stem": conv_bn(input_nc, ngf, 7)}
    params["down"] = [
        conv_bn(min(max_features, ngf * 2 ** i), min(max_features, ngf * 2 ** (i + 1)), 3)
        for i in range(n_downsampling)
    ]
    dim = min(max_features, ngf * 2 ** n_downsampling)
    params["blocks"] = [dict(c1=conv_bn(dim, dim, 3), c2=conv_bn(dim, dim, 3))
                        for _ in range(n_blocks)]
    params["up"] = [
        conv_bn(min(max_features, ngf * 2 ** (n_downsampling - i)),
                min(max_features, (ngf * 2 ** (n_downsampling - i)) // 2), 3, transpose=True)
        for i in range(n_downsampling)
    ]
    params["out"] = dict(
        w=0.1 * jax.random.normal(next(keys), (output_nc, ngf, 7, 7), jnp.float32),
        b=0.05 * jax.random.normal(next(keys), (output_nc,), jnp.float32),
    )
    return params


# ---------------------------------------------------------------------------
# Pure-JAX (lax) reference for correctness.
# ---------------------------------------------------------------------------
def ref_forward(params, x):
    def conv(x, w, b, stride=1, pad=0, mode="zero"):
        if pad > 0:
            m = "reflect" if mode == "reflect" else "constant"
            x = jnp.pad(x, ((0, 0), (0, 0), (pad, pad), (pad, pad)), mode=m)
        y = lax.conv_general_dilated(x, w, (stride, stride), "VALID",
                                     dimension_numbers=("NCHW", "OIHW", "NCHW"),
                                     precision=lax.Precision.HIGHEST)
        return y + b[None, :, None, None]

    def bn(x, p):
        s = p["gamma"] / jnp.sqrt(p["var"] + EPS)
        t = p["beta"] - p["mean"] * s
        return x * s[None, :, None, None] + t[None, :, None, None]

    def convT(x, wt, b):
        w_eq = jnp.flip(wt, (2, 3)).transpose(1, 0, 2, 3)
        y = lax.conv_general_dilated(x, w_eq, (1, 1), ((1, 2), (1, 2)),
                                     lhs_dilation=(2, 2),
                                     dimension_numbers=("NCHW", "OIHW", "NCHW"),
                                     precision=lax.Precision.HIGHEST)
        return y + b[None, :, None, None]

    relu = lambda v: jnp.maximum(v, 0.0)
    p = params["stem"]
    h = relu(bn(conv(x, p["w"], p["b"], 1, 3, "reflect"), p))
    for p in params["down"]:
        h = relu(bn(conv(h, p["w"], p["b"], 2, 1, "zero"), p))
    for blk in params["blocks"]:
        p1, p2 = blk["c1"], blk["c2"]
        u = relu(bn(conv(h, p1["w"], p1["b"], 1, 1, "reflect"), p1))
        h = h + bn(conv(u, p2["w"], p2["b"], 1, 1, "reflect"), p2)
    for p in params["up"]:
        h = relu(bn(convT(h, p["w"], p["b"]), p))
    p = params["out"]
    return jnp.tanh(conv(h, p["w"], p["b"], 1, 3, "reflect"))


if __name__ == "__main__":
    key = jax.random.PRNGKey(0)
    pkey, xkey = jax.random.split(key)
    params = init_params(pkey, input_nc=4, output_nc=3, ngf=8,
                         n_downsampling=2, n_blocks=2)
    x = jax.random.normal(xkey, (2, 4, 16, 16), jnp.float32)

    packed = pack_params(params, N=2, H=16, W=16)   # one-time prep (BN/W/H structure folded)
    fwd = jax.jit(forward)
    y = jax.block_until_ready(fwd(packed, x))
    assert y.shape == (2, 3, 16, 16), y.shape

    y_ref = jax.block_until_ready(ref_forward(params, x))
    err = float(jnp.max(jnp.abs(y - y_ref)))
    assert err < 2e-2, f"max abs err too large: {err}"

    print("KERNEL_OK")
</pallas_src>

<mosaic_0001>
module attributes {stable_mosaic.version = 11 : i64} {
  func.func @kernel(%arg0: i32, %arg1: memref<32x128xf32, #tpu.memory_space<vmem>>, %arg2: memref<7x32x32xf32, #tpu.memory_space<vmem>>, %arg3: memref<7x128x128xf32, #tpu.memory_space<vmem>>, %arg4: memref<1x128xf32, #tpu.memory_space<vmem>>, %arg5: memref<3x16x32xf32, #tpu.memory_space<vmem>>, %arg6: memref<3x128x128xf32, #tpu.memory_space<vmem>>, %arg7: memref<1x128xf32, #tpu.memory_space<vmem>>, %arg8: memref<3x8x16xf32, #tpu.memory_space<vmem>>, %arg9: memref<3x128x128xf32, #tpu.memory_space<vmem>>, %arg10: memref<1x128xf32, #tpu.memory_space<vmem>>, %arg11: memref<3x8x8xf32, #tpu.memory_space<vmem>>, %arg12: memref<3x128x128xf32, #tpu.memory_space<vmem>>, %arg13: memref<1x128xf32, #tpu.memory_space<vmem>>, %arg14: memref<3x8x8xf32, #tpu.memory_space<vmem>>, %arg15: memref<3x128x128xf32, #tpu.memory_space<vmem>>, %arg16: memref<1x128xf32, #tpu.memory_space<vmem>>, %arg17: memref<3x8x8xf32, #tpu.memory_space<vmem>>, %arg18: memref<3x128x128xf32, #tpu.memory_space<vmem>>, %arg19: memref<1x128xf32, #tpu.memory_space<vmem>>, %arg20: memref<3x8x8xf32, #tpu.memory_space<vmem>>, %arg21: memref<3x128x128xf32, #tpu.memory_space<vmem>>, %arg22: memref<1x128xf32, #tpu.memory_space<vmem>>, %arg23: memref<3x16x8xf32, #tpu.memory_space<vmem>>, %arg24: memref<3x128x128xf32, #tpu.memory_space<vmem>>, %arg25: memref<1x128xf32, #tpu.memory_space<vmem>>, %arg26: memref<3x32x16xf32, #tpu.memory_space<vmem>>, %arg27: memref<3x128x128xf32, #tpu.memory_space<vmem>>, %arg28: memref<1x128xf32, #tpu.memory_space<vmem>>, %arg29: memref<7x32x32xf32, #tpu.memory_space<vmem>>, %arg30: memref<7x128x128xf32, #tpu.memory_space<vmem>>, %arg31: memref<1x128xf32, #tpu.memory_space<vmem>>, %arg32: memref<32x128xf32, #tpu.memory_space<vmem>>) attributes {dimension_semantics = [#tpu.dimension_semantics<arbitrary>], iteration_bounds = array<i64: 1>, scalar_prefetch = 0 : i64, scratch_operands = 0 : i64, tpu.core_type = #tpu.core_type<tc>, window_params = [{pipeline_mode = #tpu.pipeline_mode<synchronous>, transform_indices = @transform_0, window_bounds = array<i64: 32, 128>}, {pipeline_mode = #tpu.pipeline_mode<synchronous>, transform_indices = @transform_1, window_bounds = array<i64: 7, 32, 32>}, {pipeline_mode = #tpu.pipeline_mode<synchronous>, transform_indices = @transform_2, window_bounds = array<i64: 7, 128, 128>}, {pipeline_mode = #tpu.pipeline_mode<synchronous>, transform_indices = @transform_3, window_bounds = array<i64: 1, 128>}, {pipeline_mode = #tpu.pipeline_mode<synchronous>, transform_indices = @transform_4, window_bounds = array<i64: 3, 16, 32>}, {pipeline_mode = #tpu.pipeline_mode<synchronous>, transform_indices = @transform_5, window_bounds = array<i64: 3, 128, 128>}, {pipeline_mode = #tpu.pipeline_mode<synchronous>, transform_indices = @transform_6, window_bounds = array<i64: 1, 128>}, {pipeline_mode = #tpu.pipeline_mode<synchronous>, transform_indices = @transform_7, window_bounds = array<i64: 3, 8, 16>}, {pipeline_mode = #tpu.pipeline_mode<synchronous>, transform_indices = @transform_8, window_bounds = array<i64: 3, 128, 128>}, {pipeline_mode = #tpu.pipeline_mode<synchronous>, transform_indices = @transform_9, window_bounds = array<i64: 1, 128>}, {pipeline_mode = #tpu.pipeline_mode<synchronous>, transform_indices = @transform_10, window_bounds = array<i64: 3, 8, 8>}, {pipeline_mode = #tpu.pipeline_mode<synchronous>, transform_indices = @transform_11, window_bounds = array<i64: 3, 128, 128>}, {pipeline_mode = #tpu.pipeline_mode<synchronous>, transform_indices = @transform_12, window_bounds = array<i64: 1, 128>}, {pipeline_mode = #tpu.pipeline_mode<synchronous>, transform_indices = @transform_13, window_bounds = array<i64: 3, 8, 8>}, {pipeline_mode = #tpu.pipeline_mode<synchronous>, transform_indices = @transform_14, window_bounds = array<i64: 3, 128, 128>}, {pipeline_mode = #tpu.pipeline_mode<synchronous>, transform_indices = @transform_15, window_bounds = array<i64: 1, 128>}, {pipeline_mode = #tpu.pipeline_mode<synchronous>, transform_indices = @transform_16, window_bounds = array<i64: 3, 8, 8>}, {pipeline_mode = #tpu.pipeline_mode<synchronous>, transform_indices = @transform_17, window_bounds = array<i64: 3, 128, 128>}, {pipeline_mode = #tpu.pipeline_mode<synchronous>, transform_indices = @transform_18, window_bounds = array<i64: 1, 128>}, {pipeline_mode = #tpu.pipeline_mode<synchronous>, transform_indices = @transform_19, window_bounds = array<i64: 3, 8, 8>}, {pipeline_mode = #tpu.pipeline_mode<synchronous>, transform_indices = @transform_20, window_bounds = array<i64: 3, 128, 128>}, {pipeline_mode = #tpu.pipeline_mode<synchronous>, transform_indices = @transform_21, window_bounds = array<i64: 1, 128>}, {pipeline_mode = #tpu.pipeline_mode<synchronous>, transform_indices = @transform_22, window_bounds = array<i64: 3, 16, 8>}, {pipeline_mode = #tpu.pipeline_mode<synchronous>, transform_indices = @transform_23, window_bounds = array<i64: 3, 128, 128>}, {pipeline_mode = #tpu.pipeline_mode<synchronous>, transform_indices = @transform_24, window_bounds = array<i64: 1, 128>}, {pipeline_mode = #tpu.pipeline_mode<synchronous>, transform_indices = @transform_25, window_bounds = array<i64: 3, 32, 16>}, {pipeline_mode = #tpu.pipeline_mode<synchronous>, transform_indices = @transform_26, window_bounds = array<i64: 3, 128, 128>}, {pipeline_mode = #tpu.pipeline_mode<synchronous>, transform_indices = @transform_27, window_bounds = array<i64: 1, 128>}, {pipeline_mode = #tpu.pipeline_mode<synchronous>, transform_indices = @transform_28, window_bounds = array<i64: 7, 32, 32>}, {pipeline_mode = #tpu.pipeline_mode<synchronous>, transform_indices = @transform_29, window_bounds = array<i64: 7, 128, 128>}, {pipeline_mode = #tpu.pipeline_mode<synchronous>, transform_indices = @transform_30, window_bounds = array<i64: 1, 128>}, {pipeline_mode = #tpu.pipeline_mode<synchronous>, transform_indices = @transform_31, window_bounds = array<i64: 32, 128>}]} {
    %c0 = arith.constant 0 : index
    %c0_0 = arith.constant 0 : index
    %0 = vector.load %arg1[%c0, %c0_0] : memref<32x128xf32, #tpu.memory_space<vmem>>, vector<32x128xf32>
    %c0_1 = arith.constant 0 : index
    %c0_2 = arith.constant 0 : index
    %c0_3 = arith.constant 0 : index
    %1 = vector.load %arg2[%c0_1, %c0_2, %c0_3] : memref<7x32x32xf32, #tpu.memory_space<vmem>>, vector<1x32x32xf32>
    %2 = vector.shape_cast %1 : vector<1x32x32xf32> to vector<32x32xf32>
    %cst = arith.constant dense<0.000000e+00> : vector<32x128xf32>
    %3 = tpu.matmul %2, %0, %cst {dimension_numbers = #tpu.dot_dimension_numbers<[1], [0], [0], [1], [0, 0, 1, 1], [], []>} : vector<32x32xf32>, vector<32x128xf32>, vector<32x128xf32> -> vector<32x128xf32>
    %c0_4 = arith.constant 0 : index
    %c0_5 = arith.constant 0 : index
    %c0_6 = arith.constant 0 : index
    %4 = vector.load %arg3[%c0_4, %c0_5, %c0_6] : memref<7x128x128xf32, #tpu.memory_space<vmem>>, vector<1x128x128xf32>
    %5 = vector.shape_cast %4 : vector<1x128x128xf32> to vector<128x128xf32>
    %cst_7 = arith.constant dense<0.000000e+00> : vector<32x128xf32>
    %6 = tpu.matmul %3, %5, %cst_7 {dimension_numbers = #tpu.dot_dimension_numbers<[1], [0], [0], [1], [0, 0, 1, 1], [], []>} : vector<32x128xf32>, vector<128x128xf32>, vector<32x128xf32> -> vector<32x128xf32>
    %c1 = arith.constant 1 : index
    %c0_8 = arith.constant 0 : index
    %c0_9 = arith.constant 0 : index
    %7 = vector.load %arg2[%c1, %c0_8, %c0_9] : memref<7x32x32xf32, #tpu.memory_space<vmem>>, vector<1x32x32xf32>
    %8 = vector.shape_cast %7 : vector<1x32x32xf32> to vector<32x32xf32>
    %cst_10 = arith.constant dense<0.000000e+00> : vector<32x128xf32>
    %9 = tpu.matmul %8, %0, %cst_10 {dimension_numbers = #tpu.dot_dimension_numbers<[1], [0], [0], [1], [0, 0, 1, 1], [], []>} : vector<32x32xf32>, vector<32x128xf32>, vector<32x128xf32> -> vector<32x128xf32>
    %c1_11 = arith.constant 1 : index
    %c0_12 = arith.constant 0 : index
    %c0_13 = arith.constant 0 : index
    %10 = vector.load %arg3[%c1_11, %c0_12, %c0_13] : memref<7x128x128xf32, #tpu.memory_space<vmem>>, vector<1x128x128xf32>
    %11 = vector.shape_cast %10 : vector<1x128x128xf32> to vector<128x128xf32>
    %cst_14 = arith.constant dense<0.000000e+00> : vector<32x128xf32>
    %12 = tpu.matmul %9, %11, %cst_14 {dimension_numbers = #tpu.dot_dimension_numbers<[1], [0], [0], [1], [0, 0, 1, 1], [], []>} : vector<32x128xf32>, vector<128x128xf32>, vector<32x128xf32> -> vector<32x128xf32>
    %13 = arith.addf %6, %12 : vector<32x128xf32>
    %c2 = arith.constant 2 : index
    %c0_15 = arith.constant 0 : index
    %c0_16 = arith.constant 0 : index
    %14 = vector.load %arg2[%c2, %c0_15, %c0_16] : memref<7x32x32xf32, #tpu.memory_space<vmem>>, vector<1x32x32xf32>
    %15 = vector.shape_cast %14 : vector<1x32x32xf32> to vector<32x32xf32>
    %cst_17 = arith.constant dense<0.000000e+00> : vector<32x128xf32>
    %16 = tpu.matmul %15, %0, %cst_17 {dimension_numbers = #tpu.dot_dimension_numbers<[1], [0], [0], [1], [0, 0, 1, 1], [], []>} : vector<32x32xf32>, vector<32x128xf32>, vector<32x128xf32> -> vector<32x128xf32>
    %c2_18 = arith.constant 2 : index
    %c0_19 = arith.constant 0 : index
    %c0_20 = arith.constant 0 : index
    %17 = vector.load %arg3[%c2_18, %c0_19, %c0_20] : memref<7x128x128xf32, #tpu.memory_space<vmem>>, vector<1x128x128xf32>
    %18 = vector.shape_cast %17 : vector<1x128x128xf32> to vector<128x128xf32>
    %cst_21 = arith.constant dense<0.000000e+00> : vector<32x128xf32>
    %19 = tpu.matmul %16, %18, %cst_21 {dimension_numbers = #tpu.dot_dimension_numbers<[1], [0], [0], [1], [0, 0, 1, 1], [], []>} : vector<32x128xf32>, vector<128x128xf32>, vector<32x128xf32> -> vector<32x128xf32>
    %20 = arith.addf %13, %19 : vector<32x128xf32>
    %c3 = arith.constant 3 : index
    %c0_22 = arith.constant 0 : index
    %c0_23 = arith.constant 0 : index
    %21 = vector.load %arg2[%c3, %c0_22, %c0_23] : memref<7x32x32xf32, #tpu.memory_space<vmem>>, vector<1x32x32xf32>
    %22 = vector.shape_cast %21 : vector<1x32x32xf32> to vector<32x32xf32>
    %cst_24 = arith.constant dense<0.000000e+00> : vector<32x128xf32>
    %23 = tpu.matmul %22, %0, %cst_24 {dimension_numbers = #tpu.dot_dimension_numbers<[1], [0], [0], [1], [0, 0, 1, 1], [], []>} : vector<32x32xf32>, vector<32x128xf32>, vector<32x128xf32> -> vector<32x128xf32>
    %c3_25 = arith.constant 3 : index
    %c0_26 = arith.constant 0 : index
    %c0_27 = arith.constant 0 : index
    %24 = vector.load %arg3[%c3_25, %c0_26, %c0_27] : memref<7x128x128xf32, #tpu.memory_space<vmem>>, vector<1x128x128xf32>
    %25 = vector.shape_cast %24 : vector<1x128x128xf32> to vector<128x128xf32>
    %cst_28 = arith.constant dense<0.000000e+00> : vector<32x128xf32>
    %26 = tpu.matmul %23, %25, %cst_28 {dimension_numbers = #tpu.dot_dimension_numbers<[1], [0], [0], [1], [0, 0, 1, 1], [], []>} : vector<32x128xf32>, vector<128x128xf32>, vector<32x128xf32> -> vector<32x128xf32>
    %27 = arith.addf %20, %26 : vector<32x128xf32>
    %c4 = arith.constant 4 : index
    %c0_29 = arith.constant 0 : index
    %c0_30 = arith.constant 0 : index
    %28 = vector.load %arg2[%c4, %c0_29, %c0_30] : memref<7x32x32xf32, #tpu.memory_space<vmem>>, vector<1x32x32xf32>
    %29 = vector.shape_cast %28 : vector<1x32x32xf32> to vector<32x32xf32>
    %cst_31 = arith.constant dense<0.000000e+00> : vector<32x128xf32>
    %30 = tpu.matmul %29, %0, %cst_31 {dimension_numbers = #tpu.dot_dimension_numbers<[1], [0], [0], [1], [0, 0, 1, 1], [], []>} : vector<32x32xf32>, vector<32x128xf32>, vector<32x128xf32> -> vector<32x128xf32>
    %c4_32 = arith.constant 4 : index
    %c0_33 = arith.constant 0 : index
    %c0_34 = arith.constant 0 : index
    %31 = vector.load %arg3[%c4_32, %c0_33, %c0_34] : memref<7x128x128xf32, #tpu.memory_space<vmem>>, vector<1x128x128xf32>
    %32 = vector.shape_cast %31 : vector<1x128x128xf32> to vector<128x128xf32>
    %cst_35 = arith.constant dense<0.000000e+00> : vector<32x128xf32>
    %33 = tpu.matmul %30, %32, %cst_35 {dimension_numbers = #tpu.dot_dimension_numbers<[1], [0], [0], [1], [0, 0, 1, 1], [], []>} : vector<32x128xf32>, vector<128x128xf32>, vector<32x128xf32> -> vector<32x128xf32>
    %34 = arith.addf %27, %33 : vector<32x128xf32>
    %c5 = arith.constant 5 : index
    %c0_36 = arith.constant 0 : index
    %c0_37 = arith.constant 0 : index
    %35 = vector.load %arg2[%c5, %c0_36, %c0_37] : memref<7x32x32xf32, #tpu.memory_space<vmem>>, vector<1x32x32xf32>
    %36 = vector.shape_cast %35 : vector<1x32x32xf32> to vector<32x32xf32>
    %cst_38 = arith.constant dense<0.000000e+00> : vector<32x128xf32>
    %37 = tpu.matmul %36, %0, %cst_38 {dimension_numbers = #tpu.dot_dimension_numbers<[1], [0], [0], [1], [0, 0, 1, 1], [], []>} : vector<32x32xf32>, vector<32x128xf32>, vector<32x128xf32> -> vector<32x128xf32>
    %c5_39 = arith.constant 5 : index
    %c0_40 = arith.constant 0 : index
    %c0_41 = arith.constant 0 : index
    %38 = vector.load %arg3[%c5_39, %c0_40, %c0_41] : memref<7x128x128xf32, #tpu.memory_space<vmem>>, vector<1x128x128xf32>
    %39 = vector.shape_cast %38 : vector<1x128x128xf32> to vector<128x128xf32>
    %cst_42 = arith.constant dense<0.000000e+00> : vector<32x128xf32>
    %40 = tpu.matmul %37, %39, %cst_42 {dimension_numbers = #tpu.dot_dimension_numbers<[1], [0], [0], [1], [0, 0, 1, 1], [], []>} : vector<32x128xf32>, vector<128x128xf32>, vector<32x128xf32> -> vector<32x128xf32>
    %41 = arith.addf %34, %40 : vector<32x128xf32>
    %c6 = arith.constant 6 : index
    %c0_43 = arith.constant 0 : index
    %c0_44 = arith.constant 0 : index
    %42 = vector.load %arg2[%c6, %c0_43, %c0_44] : memref<7x32x32xf32, #tpu.memory_space<vmem>>, vector<1x32x32xf32>
    %43 = vector.shape_cast %42 : vector<1x32x32xf32> to vector<32x32xf32>
    %cst_45 = arith.constant dense<0.000000e+00> : vector<32x128xf32>
    %44 = tpu.matmul %43, %0, %cst_45 {dimension_numbers = #tpu.dot_dimension_numbers<[1], [0], [0], [1], [0, 0, 1, 1], [], []>} : vector<32x32xf32>, vector<32x128xf32>, vector<32x128xf32> -> vector<32x128xf32>
    %c6_46 = arith.constant 6 : index
    %c0_47 = arith.constant 0 : index
    %c0_48 = arith.constant 0 : index
    %45 = vector.load %arg3[%c6_46, %c0_47, %c0_48] : memref<7x128x128xf32, #tpu.memory_space<vmem>>, vector<1x128x128xf32>
    %46 = vector.shape_cast %45 : vector<1x128x128xf32> to vector<128x128xf32>
    %cst_49 = arith.constant dense<0.000000e+00> : vector<32x128xf32>
    %47 = tpu.matmul %44, %46, %cst_49 {dimension_numbers = #tpu.dot_dimension_numbers<[1], [0], [0], [1], [0, 0, 1, 1], [], []>} : vector<32x128xf32>, vector<128x128xf32>, vector<32x128xf32> -> vector<32x128xf32>
    %48 = arith.addf %41, %47 : vector<32x128xf32>
    %c0_50 = arith.constant 0 : index
    %c0_51 = arith.constant 0 : index
    %49 = vector.load %arg4[%c0_50, %c0_51] : memref<1x128xf32, #tpu.memory_space<vmem>>, vector<1x128xf32>
    %50 = vector.broadcast %49 : vector<1x128xf32> to vector<32x128xf32>
    %51 = arith.addf %48, %50 : vector<32x128xf32>
    %cst_52 = arith.constant 0.000000e+00 : f32
    %52 = vector.broadcast %cst_52 : f32 to vector<32x128xf32>
    %53 = arith.maximumf %51, %52 : vector<32x128xf32>
    %c0_53 = arith.constant 0 : index
    %c0_54 = arith.constant 0 : index
    %c0_55 = arith.constant 0 : index
    %54 = vector.load %arg5[%c0_53, %c0_54, %c0_55] : memref<3x16x32xf32, #tpu.memory_space<vmem>>, vector<1x16x32xf32>
    %55 = vector.shape_cast %54 : vector<1x16x32xf32> to vector<16x32xf32>
    %cst_56 = arith.constant dense<0.000000e+00> : vector<16x128xf32>
    %56 = tpu.matmul %55, %53, %cst_56 {dimension_numbers = #tpu.dot_dimension_numbers<[1], [0], [0], [1], [0, 0, 1, 1], [], []>} : vector<16x32xf32>, vector<32x128xf32>, vector<16x128xf32> -> vector<16x128xf32>
    %c0_57 = arith.constant 0 : index
    %c0_58 = arith.constant 0 : index
    %c0_59 = arith.constant 0 : index
    %57 = vector.load %arg6[%c0_57, %c0_58, %c0_59] : memref<3x128x128xf32, #tpu.memory_space<vmem>>, vector<1x128x128xf32>
    %58 = vector.shape_cast %57 : vector<1x128x128xf32> to vector<128x128xf32>
    %cst_60 = arith.constant dense<0.000000e+00> : vector<16x128xf32>
    %59 = tpu.matmul %56, %58, %cst_60 {dimension_numbers = #tpu.dot_dimension_numbers<[1], [0], [0], [1], [0, 0, 1, 1], [], []>} : vector<16x128xf32>, vector<128x128xf32>, vector<16x128xf32> -> vector<16x128xf32>
    %c1_61 = arith.constant 1 : index
    %c0_62 = arith.constant 0 : index
    %c0_63 = arith.constant 0 : index
    %60 = vector.load %arg5[%c1_61, %c0_62, %c0_63] : memref<3x16x32xf32, #tpu.memory_space<vmem>>, vector<1x16x32xf32>
    %61 = vector.shape_cast %60 : vector<1x16x32xf32> to vector<16x32xf32>
    %cst_64 = arith.constant dense<0.000000e+00> : vector<16x128xf32>
    %62 = tpu.matmul %61, %53, %cst_64 {dimension_numbers = #tpu.dot_dimension_numbers<[1], [0], [0], [1], [0, 0, 1, 1], [], []>} : vector<16x32xf32>, vector<32x128xf32>, vector<16x128xf32> -> vector<16x128xf32>
    %c1_65 = arith.constant 1 : index
    %c0_66 = arith.constant 0 : index
    %c0_67 = arith.constant 0 : index
    %63 = vector.load %arg6[%c1_65, %c0_66, %c0_67] : memref<3x128x128xf32, #tpu.memory_space<vmem>>, vector<1x128x128xf32>
    %64 = vector.shape_cast %63 : vector<1x128x128xf32> to vector<128x128xf32>
    %cst_68 = arith.constant dense<0.000000e+00> : vector<16x128xf32>
    %65 = tpu.matmul %62, %64, %cst_68 {dimension_numbers = #tpu.dot_dimension_numbers<[1], [0], [0], [1], [0, 0, 1, 1], [], []>} : vector<16x128xf32>, vector<128x128xf32>, vector<16x128xf32> -> vector<16x128xf32>
    %66 = arith.addf %59, %65 : vector<16x128xf32>
    %c2_69 = arith.constant 2 : index
    %c0_70 = arith.constant 0 : index
    %c0_71 = arith.constant 0 : index
    %67 = vector.load %arg5[%c2_69, %c0_70, %c0_71] : memref<3x16x32xf32, #tpu.memory_space<vmem>>, vector<1x16x32xf32>
    %68 = vector.shape_cast %67 : vector<1x16x32xf32> to vector<16x32xf32>
    %cst_72 = arith.constant dense<0.000000e+00> : vector<16x128xf32>
    %69 = tpu.matmul %68, %53, %cst_72 {dimension_numbers = #tpu.dot_dimension_numbers<[1], [0], [0], [1], [0, 0, 1, 1], [], []>} : vector<16x32xf32>, vector<32x128xf32>, vector<16x128xf32> -> vector<16x128xf32>
    %c2_73 = arith.constant 2 : index
    %c0_74 = arith.constant 0 : index
    %c0_75 = arith.constant 0 : index
    %70 = vector.load %arg6[%c2_73, %c0_74, %c0_75] : memref<3x128x128xf32, #tpu.memory_space<vmem>>, vector<1x128x128xf32>
    %71 = vector.shape_cast %70 : vector<1x128x128xf32> to vector<128x128xf32>
    %cst_76 = arith.constant dense<0.000000e+00> : vector<16x128xf32>
    %72 = tpu.matmul %69, %71, %cst_76 {dimension_numbers = #tpu.dot_dimension_numbers<[1], [0], [0], [1], [0, 0, 1, 1], [], []>} : vector<16x128xf32>, vector<128x128xf32>, vector<16x128xf32> -> vector<16x128xf32>
    %73 = arith.addf %66, %72 : vector<16x128xf32>
    %c0_77 = arith.constant 0 : index
    %c0_78 = arith.constant 0 : index
    %74 = vector.load %arg7[%c0_77, %c0_78] : memref<1x128xf32, #tpu.memory_space<vmem>>, vector<1x128xf32>
    %75 = vector.broadcast %74 : vector<1x128xf32> to vector<16x128xf32>
    %76 = arith.addf %73, %75 : vector<16x128xf32>
    %cst_79 = arith.constant 0.000000e+00 : f32
    %77 = vector.broadcast %cst_79 : f32 to vector<16x128xf32>
    %78 = arith.maximumf %76, %77 : vector<16x128xf32>
    %c0_80 = arith.constant 0 : index
    %c0_81 = arith.constant 0 : index
    %c0_82 = arith.constant 0 : index
    %79 = vector.load %arg8[%c0_80, %c0_81, %c0_82] : memref<3x8x16xf32, #tpu.memory_space<vmem>>, vector<1x8x16xf32>
    %80 = vector.shape_cast %79 : vector<1x8x16xf32> to vector<8x16xf32>
    %cst_83 = arith.constant dense<0.000000e+00> : vector<8x128xf32>
    %81 = tpu.matmul %80, %78, %cst_83 {dimension_numbers = #tpu.dot_dimension_numbers<[1], [0], [0], [1], [0, 0, 1, 1], [], []>} : vector<8x16xf32>, vector<16x128xf32>, vector<8x128xf32> -> vector<8x128xf32>
    %c0_84 = arith.constant 0 : index
    %c0_85 = arith.constant 0 : index
    %c0_86 = arith.constant 0 : index
    %82 = vector.load %arg9[%c0_84, %c0_85, %c0_86] : memref<3x128x128xf32, #tpu.memory_space<vmem>>, vector<1x128x128xf32>
    %83 = vector.shape_cast %82 : vector<1x128x128xf32> to vector<128x128xf32>
    %cst_87 = arith.constant dense<0.000000e+00> : vector<8x128xf32>
    %84 = tpu.matmul %81, %83, %cst_87 {dimension_numbers = #tpu.dot_dimension_numbers<[1], [0], [0], [1], [0, 0, 1, 1], [], []>} : vector<8x128xf32>, vector<128x128xf32>, vector<8x128xf32> -> vector<8x128xf32>
    %c1_88 = arith.constant 1 : index
    %c0_89 = arith.constant 0 : index
    %c0_90 = arith.constant 0 : index
    %85 = vector.load %arg8[%c1_88, %c0_89, %c0_90] : memref<3x8x16xf32, #tpu.memory_space<vmem>>, vector<1x8x16xf32>
    %86 = vector.shape_cast %85 : vector<1x8x16xf32> to vector<8x16xf32>
    %cst_91 = arith.constant dense<0.000000e+00> : vector<8x128xf32>
    %87 = tpu.matmul %86, %78, %cst_91 {dimension_numbers = #tpu.dot_dimension_numbers<[1], [0], [0], [1], [0, 0, 1, 1], [], []>} : vector<8x16xf32>, vector<16x128xf32>, vector<8x128xf32> -> vector<8x128xf32>
    %c1_92 = arith.constant 1 : index
    %c0_93 = arith.constant 0 : index
    %c0_94 = arith.constant 0 : index
    %88 = vector.load %arg9[%c1_92, %c0_93, %c0_94] : memref<3x128x128xf32, #tpu.memory_space<vmem>>, vector<1x128x128xf32>
    %89 = vector.shape_cast %88 : vector<1x128x128xf32> to vector<128x128xf32>
    %cst_95 = arith.constant dense<0.000000e+00> : vector<8x128xf32>
    %90 = tpu.matmul %87, %89, %cst_95 {dimension_numbers = #tpu.dot_dimension_numbers<[1], [0], [0], [1], [0, 0, 1, 1], [], []>} : vector<8x128xf32>, vector<128x128xf32>, vector<8x128xf32> -> vector<8x128xf32>
    %91 = arith.addf %84, %90 : vector<8x128xf32>
    %c2_96 = arith.constant 2 : index
    %c0_97 = arith.constant 0 : index
    %c0_98 = arith.constant 0 : index
    %92 = vector.load %arg8[%c2_96, %c0_97, %c0_98] : memref<3x8x16xf32, #tpu.memory_space<vmem>>, vector<1x8x16xf32>
    %93 = vector.shape_cast %92 : vector<1x8x16xf32> to vector<8x16xf32>
    %cst_99 = arith.constant dense<0.000000e+00> : vector<8x128xf32>
    %94 = tpu.matmul %93, %78, %cst_99 {dimension_numbers = #tpu.dot_dimension_numbers<[1], [0], [0], [1], [0, 0, 1, 1], [], []>} : vector<8x16xf32>, vector<16x128xf32>, vector<8x128xf32> -> vector<8x128xf32>
    %c2_100 = arith.constant 2 : index
    %c0_101 = arith.constant 0 : index
    %c0_102 = arith.constant 0 : index
    %95 = vector.load %arg9[%c2_100, %c0_101, %c0_102] : memref<3x128x128xf32, #tpu.memory_space<vmem>>, vector<1x128x128xf32>
    %96 = vector.shape_cast %95 : vector<1x128x128xf32> to vector<128x128xf32>
    %cst_103 = arith.constant dense<0.000000e+00> : vector<8x128xf32>
    %97 = tpu.matmul %94, %96, %cst_103 {dimension_numbers = #tpu.dot_dimension_numbers<[1], [0], [0], [1], [0, 0, 1, 1], [], []>} : vector<8x128xf32>, vector<128x128xf32>, vector<8x128xf32> -> vector<8x128xf32>
    %98 = arith.addf %91, %97 : vector<8x128xf32>
    %c0_104 = arith.constant 0 : index
    %c0_105 = arith.constant 0 : index
    %99 = vector.load %arg10[%c0_104, %c0_105] : memref<1x128xf32, #tpu.memory_space<vmem>>, vector<1x128xf32>
    %100 = vector.broadcast %99 : vector<1x128xf32> to vector<8x128xf32>
    %101 = arith.addf %98, %100 : vector<8x128xf32>
    %cst_106 = arith.constant 0.000000e+00 : f32
    %102 = vector.broadcast %cst_106 : f32 to vector<8x128xf32>
    %103 = arith.maximumf %101, %102 : vector<8x128xf32>
    %c0_107 = arith.constant 0 : index
    %c0_108 = arith.constant 0 : index
    %c0_109 = arith.constant 0 : index
    %104 = vector.load %arg11[%c0_107, %c0_108, %c0_109] : memref<3x8x8xf32, #tpu.memory_space<vmem>>, vector<1x8x8xf32>
    %105 = vector.shape_cast %104 : vector<1x8x8xf32> to vector<8x8xf32>
    %cst_110 = arith.constant dense<0.000000e+00> : vector<8x128xf32>
    %106 = tpu.matmul %105, %103, %cst_110 {dimension_numbers = #tpu.dot_dimension_numbers<[1], [0], [0], [1], [0, 0, 1, 1], [], []>} : vector<8x8xf32>, vector<8x128xf32>, vector<8x128xf32> -> vector<8x128xf32>
    %c0_111 = arith.constant 0 : index
    %c0_112 = arith.constant 0 : index
    %c0_113 = arith.constant 0 : index
    %107 = vector.load %arg12[%c0_111, %c0_112, %c0_113] : memref<3x128x128xf32, #tpu.memory_space<vmem>>, vector<1x128x128xf32>
    %108 = vector.shape_cast %107 : vector<1x128x128xf32> to vector<128x128xf32>
    %cst_114 = arith.constant dense<0.000000e+00> : vector<8x128xf32>
    %109 = tpu.matmul %106, %108, %cst_114 {dimension_numbers = #tpu.dot_dimension_numbers<[1], [0], [0], [1], [0, 0, 1, 1], [], []>} : vector<8x128xf32>, vector<128x128xf32>, vector<8x128xf32> -> vector<8x128xf32>
    %c1_115 = arith.constant 1 : index
    %c0_116 = arith.constant 0 : index
    %c0_117 = arith.constant 0 : index
    %110 = vector.load %arg11[%c1_115, %c0_116, %c0_117] : memref<3x8x8xf32, #tpu.memory_space<vmem>>, vector<1x8x8xf32>
    %111 = vector.shape_cast %110 : vector<1x8x8xf32> to vector<8x8xf32>
    %cst_118 = arith.constant dense<0.000000e+00> : vector<8x128xf32>
    %112 = tpu.matmul %111, %103, %cst_118 {dimension_numbers = #tpu.dot_dimension_numbers<[1], [0], [0], [1], [0, 0, 1, 1], [], []>} : vector<8x8xf32>, vector<8x128xf32>, vector<8x128xf32> -> vector<8x128xf32>
    %c1_119 = arith.constant 1 : index
    %c0_120 = arith.constant 0 : index
    %c0_121 = arith.constant 0 : index
    %113 = vector.load %arg12[%c1_119, %c0_120, %c0_121] : memref<3x128x128xf32, #tpu.memory_space<vmem>>, vector<1x128x128xf32>
    %114 = vector.shape_cast %113 : vector<1x128x128xf32> to vector<128x128xf32>
    %cst_122 = arith.constant dense<0.000000e+00> : vector<8x128xf32>
    %115 = tpu.matmul %112, %114, %cst_122 {dimension_numbers = #tpu.dot_dimension_numbers<[1], [0], [0], [1], [0, 0, 1, 1], [], []>} : vector<8x128xf32>, vector<128x128xf32>, vector<8x128xf32> -> vector<8x128xf32>
    %116 = arith.addf %109, %115 : vector<8x128xf32>
    %c2_123 = arith.constant 2 : index
    %c0_124 = arith.constant 0 : index
    %c0_125 = arith.constant 0 : index
    %117 = vector.load %arg11[%c2_123, %c0_124, %c0_125] : memref<3x8x8xf32, #tpu.memory_space<vmem>>, vector<1x8x8xf32>
    %118 = vector.shape_cast %117 : vector<1x8x8xf32> to vector<8x8xf32>
    %cst_126 = arith.constant dense<0.000000e+00> : vector<8x128xf32>
    %119 = tpu.matmul %118, %103, %cst_126 {dimension_numbers = #tpu.dot_dimension_numbers<[1], [0], [0], [1], [0, 0, 1, 1], [], []>} : vector<8x8xf32>, vector<8x128xf32>, vector<8x128xf32> -> vector<8x128xf32>
    %c2_127 = arith.constant 2 : index
    %c0_128 = arith.constant 0 : index
    %c0_129 = arith.constant 0 : index
    %120 = vector.load %arg12[%c2_127, %c0_128, %c0_129] : memref<3x128x128xf32, #tpu.memory_space<vmem>>, vector<1x128x128xf32>
    %121 = vector.shape_cast %120 : vector<1x128x128xf32> to vector<128x128xf32>
    %cst_130 = arith.constant dense<0.000000e+00> : vector<8x128xf32>
    %122 = tpu.matmul %119, %121, %cst_130 {dimension_numbers = #tpu.dot_dimension_numbers<[1], [0], [0], [1], [0, 0, 1, 1], [], []>} : vector<8x128xf32>, vector<128x128xf32>, vector<8x128xf32> -> vector<8x128xf32>
    %123 = arith.addf %116, %122 : vector<8x128xf32>
    %c0_131 = arith.constant 0 : index
    %c0_132 = arith.constant 0 : index
    %124 = vector.load %arg13[%c0_131, %c0_132] : memref<1x128xf32, #tpu.memory_space<vmem>>, vector<1x128xf32>
    %125 = vector.broadcast %124 : vector<1x128xf32> to vector<8x128xf32>
    %126 = arith.addf %123, %125 : vector<8x128xf32>
    %cst_133 = arith.constant 0.000000e+00 : f32
    %127 = vector.broadcast %cst_133 : f32 to vector<8x128xf32>
    %128 = arith.maximumf %126, %127 : vector<8x128xf32>
    %c0_134 = arith.constant 0 : index
    %c0_135 = arith.constant 0 : index
    %c0_136 = arith.constant 0 : index
    %129 = vector.load %arg14[%c0_134, %c0_135, %c0_136] : memref<3x8x8xf32, #tpu.memory_space<vmem>>, vector<1x8x8xf32>
    %130 = vector.shape_cast %129 : vector<1x8x8xf32> to vector<8x8xf32>
    %cst_137 = arith.constant dense<0.000000e+00> : vector<8x128xf32>
    %131 = tpu.matmul %130, %128, %cst_137 {dimension_numbers = #tpu.dot_dimension_numbers<[1], [0], [0], [1], [0, 0, 1, 1], [], []>} : vector<8x8xf32>, vector<8x128xf32>, vector<8x128xf32> -> vector<8x128xf32>
    %c0_138 = arith.constant 0 : index
    %c0_139 = arith.constant 0 : index
    %c0_140 = arith.constant 0 : index
    %132 = vector.load %arg15[%c0_138, %c0_139, %c0_140] : memref<3x128x128xf32, #tpu.memory_space<vmem>>, vector<1x128x128xf32>
    %133 = vector.shape_cast %132 : vector<1x128x128xf32> to vector<128x128xf32>
    %cst_141 = arith.constant dense<0.000000e+00> : vector<8x128xf32>
    %134 = tpu.matmul %131, %133, %cst_141 {dimension_numbers = #tpu.dot_dimension_numbers<[1], [0], [0], [1], [0, 0, 1, 1], [], []>} : vector<8x128xf32>, vector<128x128xf32>, vector<8x128xf32> -> vector<8x128xf32>
    %c1_142 = arith.constant 1 : index
    %c0_143 = arith.constant 0 : index
    %c0_144 = arith.constant 0 : index
    %135 = vector.load %arg14[%c1_142, %c0_143, %c0_144] : memref<3x8x8xf32, #tpu.memory_space<vmem>>, vector<1x8x8xf32>
    %136 = vector.shape_cast %135 : vector<1x8x8xf32> to vector<8x8xf32>
    %cst_145 = arith.constant dense<0.000000e+00> : vector<8x128xf32>
    %137 = tpu.matmul %136, %128, %cst_145 {dimension_numbers = #tpu.dot_dimension_numbers<[1], [0], [0], [1], [0, 0, 1, 1], [], []>} : vector<8x8xf32>, vector<8x128xf32>, vector<8x128xf32> -> vector<8x128xf32>
    %c1_146 = arith.constant 1 : index
    %c0_147 = arith.constant 0 : index
    %c0_148 = arith.constant 0 : index
    %138 = vector.load %arg15[%c1_146, %c0_147, %c0_148] : memref<3x128x128xf32, #tpu.memory_space<vmem>>, vector<1x128x128xf32>
    %139 = vector.shape_cast %138 : vector<1x128x128xf32> to vector<128x128xf32>
    %cst_149 = arith.constant dense<0.000000e+00> : vector<8x128xf32>
    %140 = tpu.matmul %137, %139, %cst_149 {dimension_numbers = #tpu.dot_dimension_numbers<[1], [0], [0], [1], [0, 0, 1, 1], [], []>} : vector<8x128xf32>, vector<128x128xf32>, vector<8x128xf32> -> vector<8x128xf32>
    %141 = arith.addf %134, %140 : vector<8x128xf32>
    %c2_150 = arith.constant 2 : index
    %c0_151 = arith.constant 0 : index
    %c0_152 = arith.constant 0 : index
    %142 = vector.load %arg14[%c2_150, %c0_151, %c0_152] : memref<3x8x8xf32, #tpu.memory_space<vmem>>, vector<1x8x8xf32>
    %143 = vector.shape_cast %142 : vector<1x8x8xf32> to vector<8x8xf32>
    %cst_153 = arith.constant dense<0.000000e+00> : vector<8x128xf32>
    %144 = tpu.matmul %143, %128, %cst_153 {dimension_numbers = #tpu.dot_dimension_numbers<[1], [0], [0], [1], [0, 0, 1, 1], [], []>} : vector<8x8xf32>, vector<8x128xf32>, vector<8x128xf32> -> vector<8x128xf32>
    %c2_154 = arith.constant 2 : index
    %c0_155 = arith.constant 0 : index
    %c0_156 = arith.constant 0 : index
    %145 = vector.load %arg15[%c2_154, %c0_155, %c0_156] : memref<3x128x128xf32, #tpu.memory_space<vmem>>, vector<1x128x128xf32>
    %146 = vector.shape_cast %145 : vector<1x128x128xf32> to vector<128x128xf32>
    %cst_157 = arith.constant dense<0.000000e+00> : vector<8x128xf32>
    %147 = tpu.matmul %144, %146, %cst_157 {dimension_numbers = #tpu.dot_dimension_numbers<[1], [0], [0], [1], [0, 0, 1, 1], [], []>} : vector<8x128xf32>, vector<128x128xf32>, vector<8x128xf32> -> vector<8x128xf32>
    %148 = arith.addf %141, %147 : vector<8x128xf32>
    %c0_158 = arith.constant 0 : index
    %c0_159 = arith.constant 0 : index
    %149 = vector.load %arg16[%c0_158, %c0_159] : memref<1x128xf32, #tpu.memory_space<vmem>>, vector<1x128xf32>
    %150 = vector.broadcast %149 : vector<1x128xf32> to vector<8x128xf32>
    %151 = arith.addf %148, %150 : vector<8x128xf32>
    %152 = arith.addf %151, %103 : vector<8x128xf32>
    %c0_160 = arith.constant 0 : index
    %c0_161 = arith.constant 0 : index
    %c0_162 = arith.constant 0 : index
    %153 = vector.load %arg17[%c0_160, %c0_161, %c0_162] : memref<3x8x8xf32, #tpu.memory_space<vmem>>, vector<1x8x8xf32>
    %154 = vector.shape_cast %153 : vector<1x8x8xf32> to vector<8x8xf32>
    %cst_163 = arith.constant dense<0.000000e+00> : vector<8x128xf32>
    %155 = tpu.matmul %154, %152, %cst_163 {dimension_numbers = #tpu.dot_dimension_numbers<[1], [0], [0], [1], [0, 0, 1, 1], [], []>} : vector<8x8xf32>, vector<8x128xf32>, vector<8x128xf32> -> vector<8x128xf32>
    %c0_164 = arith.constant 0 : index
    %c0_165 = arith.constant 0 : index
    %c0_166 = arith.constant 0 : index
    %156 = vector.load %arg18[%c0_164, %c0_165, %c0_166] : memref<3x128x128xf32, #tpu.memory_space<vmem>>, vector<1x128x128xf32>
    %157 = vector.shape_cast %156 : vector<1x128x128xf32> to vector<128x128xf32>
    %cst_167 = arith.constant dense<0.000000e+00> : vector<8x128xf32>
    %158 = tpu.matmul %155, %157, %cst_167 {dimension_numbers = #tpu.dot_dimension_numbers<[1], [0], [0], [1], [0, 0, 1, 1], [], []>} : vector<8x128xf32>, vector<128x128xf32>, vector<8x128xf32> -> vector<8x128xf32>
    %c1_168 = arith.constant 1 : index
    %c0_169 = arith.constant 0 : index
    %c0_170 = arith.constant 0 : index
    %159 = vector.load %arg17[%c1_168, %c0_169, %c0_170] : memref<3x8x8xf32, #tpu.memory_space<vmem>>, vector<1x8x8xf32>
    %160 = vector.shape_cast %159 : vector<1x8x8xf32> to vector<8x8xf32>
    %cst_171 = arith.constant dense<0.000000e+00> : vector<8x128xf32>
    %161 = tpu.matmul %160, %152, %cst_171 {dimension_numbers = #tpu.dot_dimension_numbers<[1], [0], [0], [1], [0, 0, 1, 1], [], []>} : vector<8x8xf32>, vector<8x128xf32>, vector<8x128xf32> -> vector<8x128xf32>
    %c1_172 = arith.constant 1 : index
    %c0_173 = arith.constant 0 : index
    %c0_174 = arith.constant 0 : index
    %162 = vector.load %arg18[%c1_172, %c0_173, %c0_174] : memref<3x128x128xf32, #tpu.memory_space<vmem>>, vector<1x128x128xf32>
    %163 = vector.shape_cast %162 : vector<1x128x128xf32> to vector<128x128xf32>
    %cst_175 = arith.constant dense<0.000000e+00> : vector<8x128xf32>
    %164 = tpu.matmul %161, %163, %cst_175 {dimension_numbers = #tpu.dot_dimension_numbers<[1], [0], [0], [1], [0, 0, 1, 1], [], []>} : vector<8x128xf32>, vector<128x128xf32>, vector<8x128xf32> -> vector<8x128xf32>
    %165 = arith.addf %158, %164 : vector<8x128xf32>
    %c2_176 = arith.constant 2 : index
    %c0_177 = arith.constant 0 : index
    %c0_178 = arith.constant 0 : index
    %166 = vector.load %arg17[%c2_176, %c0_177, %c0_178] : memref<3x8x8xf32, #tpu.memory_space<vmem>>, vector<1x8x8xf32>
    %167 = vector.shape_cast %166 : vector<1x8x8xf32> to vector<8x8xf32>
    %cst_179 = arith.constant dense<0.000000e+00> : vector<8x128xf32>
    %168 = tpu.matmul %167, %152, %cst_179 {dimension_numbers = #tpu.dot_dimension_numbers<[1], [0], [0], [1], [0, 0, 1, 1], [], []>} : vector<8x8xf32>, vector<8x128xf32>, vector<8x128xf32> -> vector<8x128xf32>
    %c2_180 = arith.constant 2 : index
    %c0_181 = arith.constant 0 : index
    %c0_182 = arith.constant 0 : index
    %169 = vector.load %arg18[%c2_180, %c0_181, %c0_182] : memref<3x128x128xf32, #tpu.memory_space<vmem>>, vector<1x128x128xf32>
    %170 = vector.shape_cast %169 : vector<1x128x128xf32> to vector<128x128xf32>
    %cst_183 = arith.constant dense<0.000000e+00> : vector<8x128xf32>
    %171 = tpu.matmul %168, %170, %cst_183 {dimension_numbers = #tpu.dot_dimension_numbers<[1], [0], [0], [1], [0, 0, 1, 1], [], []>} : vector<8x128xf32>, vector<128x128xf32>, vector<8x128xf32> -> vector<8x128xf32>
    %172 = arith.addf %165, %171 : vector<8x128xf32>
    %c0_184 = arith.constant 0 : index
    %c0_185 = arith.constant 0 : index
    %173 = vector.load %arg19[%c0_184, %c0_185] : memref<1x128xf32, #tpu.memory_space<vmem>>, vector<1x128xf32>
    %174 = vector.broadcast %173 : vector<1x128xf32> to vector<8x128xf32>
    %175 = arith.addf %172, %174 : vector<8x128xf32>
    %cst_186 = arith.constant 0.000000e+00 : f32
    %176 = vector.broadcast %cst_186 : f32 to vector<8x128xf32>
    %177 = arith.maximumf %175, %176 : vector<8x128xf32>
    %c0_187 = arith.constant 0 : index
    %c0_188 = arith.constant 0 : index
    %c0_189 = arith.constant 0 : index
    %178 = vector.load %arg20[%c0_187, %c0_188, %c0_189] : memref<3x8x8xf32, #tpu.memory_space<vmem>>, vector<1x8x8xf32>
    %179 = vector.shape_cast %178 : vector<1x8x8xf32> to vector<8x8xf32>
    %cst_190 = arith.constant dense<0.000000e+00> : vector<8x128xf32>
    %180 = tpu.matmul %179, %177, %cst_190 {dimension_numbers = #tpu.dot_dimension_numbers<[1], [0], [0], [1], [0, 0, 1, 1], [], []>} : vector<8x8xf32>, vector<8x128xf32>, vector<8x128xf32> -> vector<8x128xf32>
    %c0_191 = arith.constant 0 : index
    %c0_192 = arith.constant 0 : index
    %c0_193 = arith.constant 0 : index
    %181 = vector.load %arg21[%c0_191, %c0_192, %c0_193] : memref<3x128x128xf32, #tpu.memory_space<vmem>>, vector<1x128x128xf32>
    %182 = vector.shape_cast %181 : vector<1x128x128xf32> to vector<128x128xf32>
    %cst_194 = arith.constant dense<0.000000e+00> : vector<8x128xf32>
    %183 = tpu.matmul %180, %182, %cst_194 {dimension_numbers = #tpu.dot_dimension_numbers<[1], [0], [0], [1], [0, 0, 1, 1], [], []>} : vector<8x128xf32>, vector<128x128xf32>, vector<8x128xf32> -> vector<8x128xf32>
    %c1_195 = arith.constant 1 : index
    %c0_196 = arith.constant 0 : index
    %c0_197 = arith.constant 0 : index
    %184 = vector.load %arg20[%c1_195, %c0_196, %c0_197] : memref<3x8x8xf32, #tpu.memory_space<vmem>>, vector<1x8x8xf32>
    %185 = vector.shape_cast %184 : vector<1x8x8xf32> to vector<8x8xf32>
    %cst_198 = arith.constant dense<0.000000e+00> : vector<8x128xf32>
    %186 = tpu.matmul %185, %177, %cst_198 {dimension_numbers = #tpu.dot_dimension_numbers<[1], [0], [0], [1], [0, 0, 1, 1], [], []>} : vector<8x8xf32>, vector<8x128xf32>, vector<8x128xf32> -> vector<8x128xf32>
    %c1_199 = arith.constant 1 : index
    %c0_200 = arith.constant 0 : index
    %c0_201 = arith.constant 0 : index
    %187 = vector.load %arg21[%c1_199, %c0_200, %c0_201] : memref<3x128x128xf32, #tpu.memory_space<vmem>>, vector<1x128x128xf32>
    %188 = vector.shape_cast %187 : vector<1x128x128xf32> to vector<128x128xf32>
    %cst_202 = arith.constant dense<0.000000e+00> : vector<8x128xf32>
    %189 = tpu.matmul %186, %188, %cst_202 {dimension_numbers = #tpu.dot_dimension_numbers<[1], [0], [0], [1], [0, 0, 1, 1], [], []>} : vector<8x128xf32>, vector<128x128xf32>, vector<8x128xf32> -> vector<8x128xf32>
    %190 = arith.addf %183, %189 : vector<8x128xf32>
    %c2_203 = arith.constant 2 : index
    %c0_204 = arith.constant 0 : index
    %c0_205 = arith.constant 0 : index
    %191 = vector.load %arg20[%c2_203, %c0_204, %c0_205] : memref<3x8x8xf32, #tpu.memory_space<vmem>>, vector<1x8x8xf32>
    %192 = vector.shape_cast %191 : vector<1x8x8xf32> to vector<8x8xf32>
    %cst_206 = arith.constant dense<0.000000e+00> : vector<8x128xf32>
    %193 = tpu.matmul %192, %177, %cst_206 {dimension_numbers = #tpu.dot_dimension_numbers<[1], [0], [0], [1], [0, 0, 1, 1], [], []>} : vector<8x8xf32>, vector<8x128xf32>, vector<8x128xf32> -> vector<8x128xf32>
    %c2_207 = arith.constant 2 : index
    %c0_208 = arith.constant 0 : index
    %c0_209 = arith.constant 0 : index
    %194 = vector.load %arg21[%c2_207, %c0_208, %c0_209] : memref<3x128x128xf32, #tpu.memory_space<vmem>>, vector<1x128x128xf32>
    %195 = vector.shape_cast %194 : vector<1x128x128xf32> to vector<128x128xf32>
    %cst_210 = arith.constant dense<0.000000e+00> : vector<8x128xf32>
    %196 = tpu.matmul %193, %195, %cst_210 {dimension_numbers = #tpu.dot_dimension_numbers<[1], [0], [0], [1], [0, 0, 1, 1], [], []>} : vector<8x128xf32>, vector<128x128xf32>, vector<8x128xf32> -> vector<8x128xf32>
    %197 = arith.addf %190, %196 : vector<8x128xf32>
    %c0_211 = arith.constant 0 : index
    %c0_212 = arith.constant 0 : index
    %198 = vector.load %arg22[%c0_211, %c0_212] : memref<1x128xf32, #tpu.memory_space<vmem>>, vector<1x128xf32>
    %199 = vector.broadcast %198 : vector<1x128xf32> to vector<8x128xf32>
    %200 = arith.addf %197, %199 : vector<8x128xf32>
    %201 = arith.addf %200, %152 : vector<8x128xf32>
    %c0_213 = arith.constant 0 : index
    %c0_214 = arith.constant 0 : index
    %c0_215 = arith.constant 0 : index
    %202 = vector.load %arg23[%c0_213, %c0_214, %c0_215] : memref<3x16x8xf32, #tpu.memory_space<vmem>>, vector<1x16x8xf32>
    %203 = vector.shape_cast %202 : vector<1x16x8xf32> to vector<16x8xf32>
    %cst_216 = arith.constant dense<0.000000e+00> : vector<16x128xf32>
    %204 = tpu.matmul %203, %201, %cst_216 {dimension_numbers = #tpu.dot_dimension_numbers<[1], [0], [0], [1], [0, 0, 1, 1], [], []>} : vector<16x8xf32>, vector<8x128xf32>, vector<16x128xf32> -> vector<16x128xf32>
    %c0_217 = arith.constant 0 : index
    %c0_218 = arith.constant 0 : index
    %c0_219 = arith.constant 0 : index
    %205 = vector.load %arg24[%c0_217, %c0_218, %c0_219] : memref<3x128x128xf32, #tpu.memory_space<vmem>>, vector<1x128x128xf32>
    %206 = vector.shape_cast %205 : vector<1x128x128xf32> to vector<128x128xf32>
    %cst_220 = arith.constant dense<0.000000e+00> : vector<16x128xf32>
    %207 = tpu.matmul %204, %206, %cst_220 {dimension_numbers = #tpu.dot_dimension_numbers<[1], [0], [0], [1], [0, 0, 1, 1], [], []>} : vector<16x128xf32>, vector<128x128xf32>, vector<16x128xf32> -> vector<16x128xf32>
    %c1_221 = arith.constant 1 : index
    %c0_222 = arith.constant 0 : index
    %c0_223 = arith.constant 0 : index
    %208 = vector.load %arg23[%c1_221, %c0_222, %c0_223] : memref<3x16x8xf32, #tpu.memory_space<vmem>>, vector<1x16x8xf32>
    %209 = vector.shape_cast %208 : vector<1x16x8xf32> to vector<16x8xf32>
    %cst_224 = arith.constant dense<0.000000e+00> : vector<16x128xf32>
    %210 = tpu.matmul %209, %201, %cst_224 {dimension_numbers = #tpu.dot_dimension_numbers<[1], [0], [0], [1], [0, 0, 1, 1], [], []>} : vector<16x8xf32>, vector<8x128xf32>, vector<16x128xf32> -> vector<16x128xf32>
    %c1_225 = arith.constant 1 : index
    %c0_226 = arith.constant 0 : index
    %c0_227 = arith.constant 0 : index
    %211 = vector.load %arg24[%c1_225, %c0_226, %c0_227] : memref<3x128x128xf32, #tpu.memory_space<vmem>>, vector<1x128x128xf32>
    %212 = vector.shape_cast %211 : vector<1x128x128xf32> to vector<128x128xf32>
    %cst_228 = arith.constant dense<0.000000e+00> : vector<16x128xf32>
    %213 = tpu.matmul %210, %212, %cst_228 {dimension_numbers = #tpu.dot_dimension_numbers<[1], [0], [0], [1], [0, 0, 1, 1], [], []>} : vector<16x128xf32>, vector<128x128xf32>, vector<16x128xf32> -> vector<16x128xf32>
    %214 = arith.addf %207, %213 : vector<16x128xf32>
    %c2_229 = arith.constant 2 : index
    %c0_230 = arith.constant 0 : index
    %c0_231 = arith.constant 0 : index
    %215 = vector.load %arg23[%c2_229, %c0_230, %c0_231] : memref<3x16x8xf32, #tpu.memory_space<vmem>>, vector<1x16x8xf32>
    %216 = vector.shape_cast %215 : vector<1x16x8xf32> to vector<16x8xf32>
    %cst_232 = arith.constant dense<0.000000e+00> : vector<16x128xf32>
    %217 = tpu.matmul %216, %201, %cst_232 {dimension_numbers = #tpu.dot_dimension_numbers<[1], [0], [0], [1], [0, 0, 1, 1], [], []>} : vector<16x8xf32>, vector<8x128xf32>, vector<16x128xf32> -> vector<16x128xf32>
    %c2_233 = arith.constant 2 : index
    %c0_234 = arith.constant 0 : index
    %c0_235 = arith.constant 0 : index
    %218 = vector.load %arg24[%c2_233, %c0_234, %c0_235] : memref<3x128x128xf32, #tpu.memory_space<vmem>>, vector<1x128x128xf32>
    %219 = vector.shape_cast %218 : vector<1x128x128xf32> to vector<128x128xf32>
    %cst_236 = arith.constant dense<0.000000e+00> : vector<16x128xf32>
    %220 = tpu.matmul %217, %219, %cst_236 {dimension_numbers = #tpu.dot_dimension_numbers<[1], [0], [0], [1], [0, 0, 1, 1], [], []>} : vector<16x128xf32>, vector<128x128xf32>, vector<16x128xf32> -> vector<16x128xf32>
    %221 = arith.addf %214, %220 : vector<16x128xf32>
    %c0_237 = arith.constant 0 : index
    %c0_238 = arith.constant 0 : index
    %222 = vector.load %arg25[%c0_237, %c0_238] : memref<1x128xf32, #tpu.memory_space<vmem>>, vector<1x128xf32>
    %223 = vector.broadcast %222 : vector<1x128xf32> to vector<16x128xf32>
    %224 = arith.addf %221, %223 : vector<16x128xf32>
    %cst_239 = arith.constant 0.000000e+00 : f32
    %225 = vector.broadcast %cst_239 : f32 to vector<16x128xf32>
    %226 = arith.maximumf %224, %225 : vector<16x128xf32>
    %c0_240 = arith.constant 0 : index
    %c0_241 = arith.constant 0 : index
    %c0_242 = arith.constant 0 : index
    %227 = vector.load %arg26[%c0_240, %c0_241, %c0_242] : memref<3x32x16xf32, #tpu.memory_space<vmem>>, vector<1x32x16xf32>
    %228 = vector.shape_cast %227 : vector<1x32x16xf32> to vector<32x16xf32>
    %cst_243 = arith.constant dense<0.000000e+00> : vector<32x128xf32>
    %229 = tpu.matmul %228, %226, %cst_243 {dimension_numbers = #tpu.dot_dimension_numbers<[1], [0], [0], [1], [0, 0, 1, 1], [], []>} : vector<32x16xf32>, vector<16x128xf32>, vector<32x128xf32> -> vector<32x128xf32>
    %c0_244 = arith.constant 0 : index
    %c0_245 = arith.constant 0 : index
    %c0_246 = arith.constant 0 : index
    %230 = vector.load %arg27[%c0_244, %c0_245, %c0_246] : memref<3x128x128xf32, #tpu.memory_space<vmem>>, vector<1x128x128xf32>
    %231 = vector.shape_cast %230 : vector<1x128x128xf32> to vector<128x128xf32>
    %cst_247 = arith.constant dense<0.000000e+00> : vector<32x128xf32>
    %232 = tpu.matmul %229, %231, %cst_247 {dimension_numbers = #tpu.dot_dimension_numbers<[1], [0], [0], [1], [0, 0, 1, 1], [], []>} : vector<32x128xf32>, vector<128x128xf32>, vector<32x128xf32> -> vector<32x128xf32>
    %c1_248 = arith.constant 1 : index
    %c0_249 = arith.constant 0 : index
    %c0_250 = arith.constant 0 : index
    %233 = vector.load %arg26[%c1_248, %c0_249, %c0_250] : memref<3x32x16xf32, #tpu.memory_space<vmem>>, vector<1x32x16xf32>
    %234 = vector.shape_cast %233 : vector<1x32x16xf32> to vector<32x16xf32>
    %cst_251 = arith.constant dense<0.000000e+00> : vector<32x128xf32>
    %235 = tpu.matmul %234, %226, %cst_251 {dimension_numbers = #tpu.dot_dimension_numbers<[1], [0], [0], [1], [0, 0, 1, 1], [], []>} : vector<32x16xf32>, vector<16x128xf32>, vector<32x128xf32> -> vector<32x128xf32>
    %c1_252 = arith.constant 1 : index
    %c0_253 = arith.constant 0 : index
    %c0_254 = arith.constant 0 : index
    %236 = vector.load %arg27[%c1_252, %c0_253, %c0_254] : memref<3x128x128xf32, #tpu.memory_space<vmem>>, vector<1x128x128xf32>
    %237 = vector.shape_cast %236 : vector<1x128x128xf32> to vector<128x128xf32>
    %cst_255 = arith.constant dense<0.000000e+00> : vector<32x128xf32>
    %238 = tpu.matmul %235, %237, %cst_255 {dimension_numbers = #tpu.dot_dimension_numbers<[1], [0], [0], [1], [0, 0, 1, 1], [], []>} : vector<32x128xf32>, vector<128x128xf32>, vector<32x128xf32> -> vector<32x128xf32>
    %239 = arith.addf %232, %238 : vector<32x128xf32>
    %c2_256 = arith.constant 2 : index
    %c0_257 = arith.constant 0 : index
    %c0_258 = arith.constant 0 : index
    %240 = vector.load %arg26[%c2_256, %c0_257, %c0_258] : memref<3x32x16xf32, #tpu.memory_space<vmem>>, vector<1x32x16xf32>
    %241 = vector.shape_cast %240 : vector<1x32x16xf32> to vector<32x16xf32>
    %cst_259 = arith.constant dense<0.000000e+00> : vector<32x128xf32>
    %242 = tpu.matmul %241, %226, %cst_259 {dimension_numbers = #tpu.dot_dimension_numbers<[1], [0], [0], [1], [0, 0, 1, 1], [], []>} : vector<32x16xf32>, vector<16x128xf32>, vector<32x128xf32> -> vector<32x128xf32>
    %c2_260 = arith.constant 2 : index
    %c0_261 = arith.constant 0 : index
    %c0_262 = arith.constant 0 : index
    %243 = vector.load %arg27[%c2_260, %c0_261, %c0_262] : memref<3x128x128xf32, #tpu.memory_space<vmem>>, vector<1x128x128xf32>
    %244 = vector.shape_cast %243 : vector<1x128x128xf32> to vector<128x128xf32>
    %cst_263 = arith.constant dense<0.000000e+00> : vector<32x128xf32>
    %245 = tpu.matmul %242, %244, %cst_263 {dimension_numbers = #tpu.dot_dimension_numbers<[1], [0], [0], [1], [0, 0, 1, 1], [], []>} : vector<32x128xf32>, vector<128x128xf32>, vector<32x128xf32> -> vector<32x128xf32>
    %246 = arith.addf %239, %245 : vector<32x128xf32>
    %c0_264 = arith.constant 0 : index
    %c0_265 = arith.constant 0 : index
    %247 = vector.load %arg28[%c0_264, %c0_265] : memref<1x128xf32, #tpu.memory_space<vmem>>, vector<1x128xf32>
    %248 = vector.broadcast %247 : vector<1x128xf32> to vector<32x128xf32>
    %249 = arith.addf %246, %248 : vector<32x128xf32>
    %cst_266 = arith.constant 0.000000e+00 : f32
    %250 = vector.broadcast %cst_266 : f32 to vector<32x128xf32>
    %251 = arith.maximumf %249, %250 : vector<32x128xf32>
    %c0_267 = arith.constant 0 : index
    %c0_268 = arith.constant 0 : index
    %c0_269 = arith.constant 0 : index
    %252 = vector.load %arg29[%c0_267, %c0_268, %c0_269] : memref<7x32x32xf32, #tpu.memory_space<vmem>>, vector<1x32x32xf32>
    %253 = vector.shape_cast %252 : vector<1x32x32xf32> to vector<32x32xf32>
    %cst_270 = arith.constant dense<0.000000e+00> : vector<32x128xf32>
    %254 = tpu.matmul %253, %251, %cst_270 {dimension_numbers = #tpu.dot_dimension_numbers<[1], [0], [0], [1], [0, 0, 1, 1], [], []>} : vector<32x32xf32>, vector<32x128xf32>, vector<32x128xf32> -> vector<32x128xf32>
    %c0_271 = arith.constant 0 : index
    %c0_272 = arith.constant 0 : index
    %c0_273 = arith.constant 0 : index
    %255 = vector.load %arg30[%c0_271, %c0_272, %c0_273] : memref<7x128x128xf32, #tpu.memory_space<vmem>>, vector<1x128x128xf32>
    %256 = vector.shape_cast %255 : vector<1x128x128xf32> to vector<128x128xf32>
    %cst_274 = arith.constant dense<0.000000e+00> : vector<32x128xf32>
    %257 = tpu.matmul %254, %256, %cst_274 {dimension_numbers = #tpu.dot_dimension_numbers<[1], [0], [0], [1], [0, 0, 1, 1], [], []>} : vector<32x128xf32>, vector<128x128xf32>, vector<32x128xf32> -> vector<32x128xf32>
    %c1_275 = arith.constant 1 : index
    %c0_276 = arith.constant 0 : index
    %c0_277 = arith.constant 0 : index
    %258 = vector.load %arg29[%c1_275, %c0_276, %c0_277] : memref<7x32x32xf32, #tpu.memory_space<vmem>>, vector<1x32x32xf32>
    %259 = vector.shape_cast %258 : vector<1x32x32xf32> to vector<32x32xf32>
    %cst_278 = arith.constant dense<0.000000e+00> : vector<32x128xf32>
    %260 = tpu.matmul %259, %251, %cst_278 {dimension_numbers = #tpu.dot_dimension_numbers<[1], [0], [0], [1], [0, 0, 1, 1], [], []>} : vector<32x32xf32>, vector<32x128xf32>, vector<32x128xf32> -> vector<32x128xf32>
    %c1_279 = arith.constant 1 : index
    %c0_280 = arith.constant 0 : index
    %c0_281 = arith.constant 0 : index
    %261 = vector.load %arg30[%c1_279, %c0_280, %c0_281] : memref<7x128x128xf32, #tpu.memory_space<vmem>>, vector<1x128x128xf32>
    %262 = vector.shape_cast %261 : vector<1x128x128xf32> to vector<128x128xf32>
    %cst_282 = arith.constant dense<0.000000e+00> : vector<32x128xf32>
    %263 = tpu.matmul %260, %262, %cst_282 {dimension_numbers = #tpu.dot_dimension_numbers<[1], [0], [0], [1], [0, 0, 1, 1], [], []>} : vector<32x128xf32>, vector<128x128xf32>, vector<32x128xf32> -> vector<32x128xf32>
    %264 = arith.addf %257, %263 : vector<32x128xf32>
    %c2_283 = arith.constant 2 : index
    %c0_284 = arith.constant 0 : index
    %c0_285 = arith.constant 0 : index
    %265 = vector.load %arg29[%c2_283, %c0_284, %c0_285] : memref<7x32x32xf32, #tpu.memory_space<vmem>>, vector<1x32x32xf32>
    %266 = vector.shape_cast %265 : vector<1x32x32xf32> to vector<32x32xf32>
    %cst_286 = arith.constant dense<0.000000e+00> : vector<32x128xf32>
    %267 = tpu.matmul %266, %251, %cst_286 {dimension_numbers = #tpu.dot_dimension_numbers<[1], [0], [0], [1], [0, 0, 1, 1], [], []>} : vector<32x32xf32>, vector<32x128xf32>, vector<32x128xf32> -> vector<32x128xf32>
    %c2_287 = arith.constant 2 : index
    %c0_288 = arith.constant 0 : index
    %c0_289 = arith.constant 0 : index
    %268 = vector.load %arg30[%c2_287, %c0_288, %c0_289] : memref<7x128x128xf32, #tpu.memory_space<vmem>>, vector<1x128x128xf32>
    %269 = vector.shape_cast %268 : vector<1x128x128xf32> to vector<128x128xf32>
    %cst_290 = arith.constant dense<0.000000e+00> : vector<32x128xf32>
    %270 = tpu.matmul %267, %269, %cst_290 {dimension_numbers = #tpu.dot_dimension_numbers<[1], [0], [0], [1], [0, 0, 1, 1], [], []>} : vector<32x128xf32>, vector<128x128xf32>, vector<32x128xf32> -> vector<32x128xf32>
    %271 = arith.addf %264, %270 : vector<32x128xf32>
    %c3_291 = arith.constant 3 : index
    %c0_292 = arith.constant 0 : index
    %c0_293 = arith.constant 0 : index
    %272 = vector.load %arg29[%c3_291, %c0_292, %c0_293] : memref<7x32x32xf32, #tpu.memory_space<vmem>>, vector<1x32x32xf32>
    %273 = vector.shape_cast %272 : vector<1x32x32xf32> to vector<32x32xf32>
    %cst_294 = arith.constant dense<0.000000e+00> : vector<32x128xf32>
    %274 = tpu.matmul %273, %251, %cst_294 {dimension_numbers = #tpu.dot_dimension_numbers<[1], [0], [0], [1], [0, 0, 1, 1], [], []>} : vector<32x32xf32>, vector<32x128xf32>, vector<32x128xf32> -> vector<32x128xf32>
    %c3_295 = arith.constant 3 : index
    %c0_296 = arith.constant 0 : index
    %c0_297 = arith.constant 0 : index
    %275 = vector.load %arg30[%c3_295, %c0_296, %c0_297] : memref<7x128x128xf32, #tpu.memory_space<vmem>>, vector<1x128x128xf32>
    %276 = vector.shape_cast %275 : vector<1x128x128xf32> to vector<128x128xf32>
    %cst_298 = arith.constant dense<0.000000e+00> : vector<32x128xf32>
    %277 = tpu.matmul %274, %276, %cst_298 {dimension_numbers = #tpu.dot_dimension_numbers<[1], [0], [0], [1], [0, 0, 1, 1], [], []>} : vector<32x128xf32>, vector<128x128xf32>, vector<32x128xf32> -> vector<32x128xf32>
    %278 = arith.addf %271, %277 : vector<32x128xf32>
    %c4_299 = arith.constant 4 : index
    %c0_300 = arith.constant 0 : index
    %c0_301 = arith.constant 0 : index
    %279 = vector.load %arg29[%c4_299, %c0_300, %c0_301] : memref<7x32x32xf32, #tpu.memory_space<vmem>>, vector<1x32x32xf32>
    %280 = vector.shape_cast %279 : vector<1x32x32xf32> to vector<32x32xf32>
    %cst_302 = arith.constant dense<0.000000e+00> : vector<32x128xf32>
    %281 = tpu.matmul %280, %251, %cst_302 {dimension_numbers = #tpu.dot_dimension_numbers<[1], [0], [0], [1], [0, 0, 1, 1], [], []>} : vector<32x32xf32>, vector<32x128xf32>, vector<32x128xf32> -> vector<32x128xf32>
    %c4_303 = arith.constant 4 : index
    %c0_304 = arith.constant 0 : index
    %c0_305 = arith.constant 0 : index
    %282 = vector.load %arg30[%c4_303, %c0_304, %c0_305] : memref<7x128x128xf32, #tpu.memory_space<vmem>>, vector<1x128x128xf32>
    %283 = vector.shape_cast %282 : vector<1x128x128xf32> to vector<128x128xf32>
    %cst_306 = arith.constant dense<0.000000e+00> : vector<32x128xf32>
    %284 = tpu.matmul %281, %283, %cst_306 {dimension_numbers = #tpu.dot_dimension_numbers<[1], [0], [0], [1], [0, 0, 1, 1], [], []>} : vector<32x128xf32>, vector<128x128xf32>, vector<32x128xf32> -> vector<32x128xf32>
    %285 = arith.addf %278, %284 : vector<32x128xf32>
    %c5_307 = arith.constant 5 : index
    %c0_308 = arith.constant 0 : index
    %c0_309 = arith.constant 0 : index
    %286 = vector.load %arg29[%c5_307, %c0_308, %c0_309] : memref<7x32x32xf32, #tpu.memory_space<vmem>>, vector<1x32x32xf32>
    %287 = vector.shape_cast %286 : vector<1x32x32xf32> to vector<32x32xf32>
    %cst_310 = arith.constant dense<0.000000e+00> : vector<32x128xf32>
    %288 = tpu.matmul %287, %251, %cst_310 {dimension_numbers = #tpu.dot_dimension_numbers<[1], [0], [0], [1], [0, 0, 1, 1], [], []>} : vector<32x32xf32>, vector<32x128xf32>, vector<32x128xf32> -> vector<32x128xf32>
    %c5_311 = arith.constant 5 : index
    %c0_312 = arith.constant 0 : index
    %c0_313 = arith.constant 0 : index
    %289 = vector.load %arg30[%c5_311, %c0_312, %c0_313] : memref<7x128x128xf32, #tpu.memory_space<vmem>>, vector<1x128x128xf32>
    %290 = vector.shape_cast %289 : vector<1x128x128xf32> to vector<128x128xf32>
    %cst_314 = arith.constant dense<0.000000e+00> : vector<32x128xf32>
    %291 = tpu.matmul %288, %290, %cst_314 {dimension_numbers = #tpu.dot_dimension_numbers<[1], [0], [0], [1], [0, 0, 1, 1], [], []>} : vector<32x128xf32>, vector<128x128xf32>, vector<32x128xf32> -> vector<32x128xf32>
    %292 = arith.addf %285, %291 : vector<32x128xf32>
    %c6_315 = arith.constant 6 : index
    %c0_316 = arith.constant 0 : index
    %c0_317 = arith.constant 0 : index
    %293 = vector.load %arg29[%c6_315, %c0_316, %c0_317] : memref<7x32x32xf32, #tpu.memory_space<vmem>>, vector<1x32x32xf32>
    %294 = vector.shape_cast %293 : vector<1x32x32xf32> to vector<32x32xf32>
    %cst_318 = arith.constant dense<0.000000e+00> : vector<32x128xf32>
    %295 = tpu.matmul %294, %251, %cst_318 {dimension_numbers = #tpu.dot_dimension_numbers<[1], [0], [0], [1], [0, 0, 1, 1], [], []>} : vector<32x32xf32>, vector<32x128xf32>, vector<32x128xf32> -> vector<32x128xf32>
    %c6_319 = arith.constant 6 : index
    %c0_320 = arith.constant 0 : index
    %c0_321 = arith.constant 0 : index
    %296 = vector.load %arg30[%c6_319, %c0_320, %c0_321] : memref<7x128x128xf32, #tpu.memory_space<vmem>>, vector<1x128x128xf32>
    %297 = vector.shape_cast %296 : vector<1x128x128xf32> to vector<128x128xf32>
    %cst_322 = arith.constant dense<0.000000e+00> : vector<32x128xf32>
    %298 = tpu.matmul %295, %297, %cst_322 {dimension_numbers = #tpu.dot_dimension_numbers<[1], [0], [0], [1], [0, 0, 1, 1], [], []>} : vector<32x128xf32>, vector<128x128xf32>, vector<32x128xf32> -> vector<32x128xf32>
    %299 = arith.addf %292, %298 : vector<32x128xf32>
    %c0_323 = arith.constant 0 : index
    %c0_324 = arith.constant 0 : index
    %300 = vector.load %arg31[%c0_323, %c0_324] : memref<1x128xf32, #tpu.memory_space<vmem>>, vector<1x128xf32>
    %301 = vector.broadcast %300 : vector<1x128xf32> to vector<32x128xf32>
    %302 = arith.addf %299, %301 : vector<32x128xf32>
    %303 = math.tanh %302 : vector<32x128xf32>
    %c0_325 = arith.constant 0 : index
    %c0_326 = arith.constant 0 : index
    %304 = vector.load %arg32[%c0_325, %c0_326] : memref<32x128xf32, #tpu.memory_space<vmem>>, vector<32x128xf32>
    tpu.vector_store %arg32[%c0_325, %c0_326], %303 {strides = array<i32>} : memref<32x128xf32, #tpu.memory_space<vmem>>, vector<32x128xf32>,
    return
  }
  func.func @transform_0(%arg0: i32) -> (i32, i32) {
    %c0_i32 = arith.constant 0 : i32
    %c0_i32_0 = arith.constant 0 : i32
    %c0_i32_1 = arith.constant 0 : i32
    return %c0_i32, %c0_i32_0 : i32, i32
  }
  func.func @transform_1(%arg0: i32) -> (i32, i32, i32) {
    %c0_i32 = arith.constant 0 : i32
    %c0_i32_0 = arith.constant 0 : i32
    %c0_i32_1 = arith.constant 0 : i32
    %c0_i32_2 = arith.constant 0 : i32
    return %c0_i32, %c0_i32_0, %c0_i32_1 : i32, i32, i32
  }
  func.func @transform_2(%arg0: i32) -> (i32, i32, i32) {
    %c0_i32 = arith.constant 0 : i32
    %c0_i32_0 = arith.constant 0 : i32
    %c0_i32_1 = arith.constant 0 : i32
    %c0_i32_2 = arith.constant 0 : i32
    return %c0_i32, %c0_i32_0, %c0_i32_1 : i32, i32, i32
  }
  func.func @transform_3(%arg0: i32) -> (i32, i32) {
    %c0_i32 = arith.constant 0 : i32
    %c0_i32_0 = arith.constant 0 : i32
    %c0_i32_1 = arith.constant 0 : i32
    return %c0_i32, %c0_i32_0 : i32, i32
  }
  func.func @transform_4(%arg0: i32) -> (i32, i32, i32) {
    %c0_i32 = arith.constant 0 : i32
    %c0_i32_0 = arith.constant 0 : i32
    %c0_i32_1 = arith.constant 0 : i32
    %c0_i32_2 = arith.constant 0 : i32
    return %c0_i32, %c0_i32_0, %c0_i32_1 : i32, i32, i32
  }
  func.func @transform_5(%arg0: i32) -> (i32, i32, i32) {
    %c0_i32 = arith.constant 0 : i32
    %c0_i32_0 = arith.constant 0 : i32
    %c0_i32_1 = arith.constant 0 : i32
    %c0_i32_2 = arith.constant 0 : i32
    return %c0_i32, %c0_i32_0, %c0_i32_1 : i32, i32, i32
  }
  func.func @transform_6(%arg0: i32) -> (i32, i32) {
    %c0_i32 = arith.constant 0 : i32
    %c0_i32_0 = arith.constant 0 : i32
    %c0_i32_1 = arith.constant 0 : i32
    return %c0_i32, %c0_i32_0 : i32, i32
  }
  func.func @transform_7(%arg0: i32) -> (i32, i32, i32) {
    %c0_i32 = arith.constant 0 : i32
    %c0_i32_0 = arith.constant 0 : i32
    %c0_i32_1 = arith.constant 0 : i32
    %c0_i32_2 = arith.constant 0 : i32
    return %c0_i32, %c0_i32_0, %c0_i32_1 : i32, i32, i32
  }
  func.func @transform_8(%arg0: i32) -> (i32, i32, i32) {
    %c0_i32 = arith.constant 0 : i32
    %c0_i32_0 = arith.constant 0 : i32
    %c0_i32_1 = arith.constant 0 : i32
    %c0_i32_2 = arith.constant 0 : i32
    return %c0_i32, %c0_i32_0, %c0_i32_1 : i32, i32, i32
  }
  func.func @transform_9(%arg0: i32) -> (i32, i32) {
    %c0_i32 = arith.constant 0 : i32
    %c0_i32_0 = arith.constant 0 : i32
    %c0_i32_1 = arith.constant 0 : i32
    return %c0_i32, %c0_i32_0 : i32, i32
  }
  func.func @transform_10(%arg0: i32) -> (i32, i32, i32) {
    %c0_i32 = arith.constant 0 : i32
    %c0_i32_0 = arith.constant 0 : i32
    %c0_i32_1 = arith.constant 0 : i32
    %c0_i32_2 = arith.constant 0 : i32
    return %c0_i32, %c0_i32_0, %c0_i32_1 : i32, i32, i32
  }
  func.func @transform_11(%arg0: i32) -> (i32, i32, i32) {
    %c0_i32 = arith.constant 0 : i32
    %c0_i32_0 = arith.constant 0 : i32
    %c0_i32_1 = arith.constant 0 : i32
    %c0_i32_2 = arith.constant 0 : i32
    return %c0_i32, %c0_i32_0, %c0_i32_1 : i32, i32, i32
  }
  func.func @transform_12(%arg0: i32) -> (i32, i32) {
    %c0_i32 = arith.constant 0 : i32
    %c0_i32_0 = arith.constant 0 : i32
    %c0_i32_1 = arith.constant 0 : i32
    return %c0_i32, %c0_i32_0 : i32, i32
  }
  func.func @transform_13(%arg0: i32) -> (i32, i32, i32) {
    %c0_i32 = arith.constant 0 : i32
    %c0_i32_0 = arith.constant 0 : i32
    %c0_i32_1 = arith.constant 0 : i32
    %c0_i32_2 = arith.constant 0 : i32
    return %c0_i32, %c0_i32_0, %c0_i32_1 : i32, i32, i32
  }
  func.func @transform_14(%arg0: i32) -> (i32, i32, i32) {
    %c0_i32 = arith.constant 0 : i32
    %c0_i32_0 = arith.constant 0 : i32
    %c0_i32_1 = arith.constant 0 : i32
    %c0_i32_2 = arith.constant 0 : i32
    return %c0_i32, %c0_i32_0, %c0_i32_1 : i32, i32, i32
  }
  func.func @transform_15(%arg0: i32) -> (i32, i32) {
    %c0_i32 = arith.constant 0 : i32
    %c0_i32_0 = arith.constant 0 : i32
    %c0_i32_1 = arith.constant 0 : i32
    return %c0_i32, %c0_i32_0 : i32, i32
  }
  func.func @transform_16(%arg0: i32) -> (i32, i32, i32) {
    %c0_i32 = arith.constant 0 : i32
    %c0_i32_0 = arith.constant 0 : i32
    %c0_i32_1 = arith.constant 0 : i32
    %c0_i32_2 = arith.constant 0 : i32
    return %c0_i32, %c0_i32_0, %c0_i32_1 : i32, i32, i32
  }
  func.func @transform_17(%arg0: i32) -> (i32, i32, i32) {
    %c0_i32 = arith.constant 0 : i32
    %c0_i32_0 = arith.constant 0 : i32
    %c0_i32_1 = arith.constant 0 : i32
    %c0_i32_2 = arith.constant 0 : i32
    return %c0_i32, %c0_i32_0, %c0_i32_1 : i32, i32, i32
  }
  func.func @transform_18(%arg0: i32) -> (i32, i32) {
    %c0_i32 = arith.constant 0 : i32
    %c0_i32_0 = arith.constant 0 : i32
    %c0_i32_1 = arith.constant 0 : i32
    return %c0_i32, %c0_i32_0 : i32, i32
  }
  func.func @transform_19(%arg0: i32) -> (i32, i32, i32) {
    %c0_i32 = arith.constant 0 : i32
    %c0_i32_0 = arith.constant 0 : i32
    %c0_i32_1 = arith.constant 0 : i32
    %c0_i32_2 = arith.constant 0 : i32
    return %c0_i32, %c0_i32_0, %c0_i32_1 : i32, i32, i32
  }
  func.func @transform_20(%arg0: i32) -> (i32, i32, i32) {
    %c0_i32 = arith.constant 0 : i32
    %c0_i32_0 = arith.constant 0 : i32
    %c0_i32_1 = arith.constant 0 : i32
    %c0_i32_2 = arith.constant 0 : i32
    return %c0_i32, %c0_i32_0, %c0_i32_1 : i32, i32, i32
  }
  func.func @transform_21(%arg0: i32) -> (i32, i32) {
    %c0_i32 = arith.constant 0 : i32
    %c0_i32_0 = arith.constant 0 : i32
    %c0_i32_1 = arith.constant 0 : i32
    return %c0_i32, %c0_i32_0 : i32, i32
  }
  func.func @transform_22(%arg0: i32) -> (i32, i32, i32) {
    %c0_i32 = arith.constant 0 : i32
    %c0_i32_0 = arith.constant 0 : i32
    %c0_i32_1 = arith.constant 0 : i32
    %c0_i32_2 = arith.constant 0 : i32
    return %c0_i32, %c0_i32_0, %c0_i32_1 : i32, i32, i32
  }
  func.func @transform_23(%arg0: i32) -> (i32, i32, i32) {
    %c0_i32 = arith.constant 0 : i32
    %c0_i32_0 = arith.constant 0 : i32
    %c0_i32_1 = arith.constant 0 : i32
    %c0_i32_2 = arith.constant 0 : i32
    return %c0_i32, %c0_i32_0, %c0_i32_1 : i32, i32, i32
  }
  func.func @transform_24(%arg0: i32) -> (i32, i32) {
    %c0_i32 = arith.constant 0 : i32
    %c0_i32_0 = arith.constant 0 : i32
    %c0_i32_1 = arith.constant 0 : i32
    return %c0_i32, %c0_i32_0 : i32, i32
  }
  func.func @transform_25(%arg0: i32) -> (i32, i32, i32) {
    %c0_i32 = arith.constant 0 : i32
    %c0_i32_0 = arith.constant 0 : i32
    %c0_i32_1 = arith.constant 0 : i32
    %c0_i32_2 = arith.constant 0 : i32
    return %c0_i32, %c0_i32_0, %c0_i32_1 : i32, i32, i32
  }
  func.func @transform_26(%arg0: i32) -> (i32, i32, i32) {
    %c0_i32 = arith.constant 0 : i32
    %c0_i32_0 = arith.constant 0 : i32
    %c0_i32_1 = arith.constant 0 : i32
    %c0_i32_2 = arith.constant 0 : i32
    return %c0_i32, %c0_i32_0, %c0_i32_1 : i32, i32, i32
  }
  func.func @transform_27(%arg0: i32) -> (i32, i32) {
    %c0_i32 = arith.constant 0 : i32
    %c0_i32_0 = arith.constant 0 : i32
    %c0_i32_1 = arith.constant 0 : i32
    return %c0_i32, %c0_i32_0 : i32, i32
  }
  func.func @transform_28(%arg0: i32) -> (i32, i32, i32) {
    %c0_i32 = arith.constant 0 : i32
    %c0_i32_0 = arith.constant 0 : i32
    %c0_i32_1 = arith.constant 0 : i32
    %c0_i32_2 = arith.constant 0 : i32
    return %c0_i32, %c0_i32_0, %c0_i32_1 : i32, i32, i32
  }
  func.func @transform_29(%arg0: i32) -> (i32, i32, i32) {
    %c0_i32 = arith.constant 0 : i32
    %c0_i32_0 = arith.constant 0 : i32
    %c0_i32_1 = arith.constant 0 : i32
    %c0_i32_2 = arith.constant 0 : i32
    return %c0_i32, %c0_i32_0, %c0_i32_1 : i32, i32, i32
  }
  func.func @transform_30(%arg0: i32) -> (i32, i32) {
    %c0_i32 = arith.constant 0 : i32
    %c0_i32_0 = arith.constant 0 : i32
    %c0_i32_1 = arith.constant 0 : i32
    return %c0_i32, %c0_i32_0 : i32, i32
  }
  func.func @transform_31(%arg0: i32) -> (i32, i32) {
    %c0_i32 = arith.constant 0 : i32
    %c0_i32_0 = arith.constant 0 : i32
    %c0_i32_1 = arith.constant 0 : i32
    return %c0_i32, %c0_i32_0 : i32, i32
  }
}

</mosaic_0001>

<bundles_post_ra>
// kernel: forward.1
= control target key start
LH: loop header
LB: loop body
LE: loop exit
PB: predicated region body
PF: predicated region fallthrough
CT: control target
= control target key end

     0   :  { %s3949_s6 = smov 1   ;;  %s3950_s10 = smov 2   ;;  %s4649_s0 = inlined_call_operand.smem [shape: u32[32], index: -1, kind: input, shape index: {}] }
   0x1   :  { %s4000_s5 = sld [smem:[%s4649_s0]]   ;;  %s3951_s14 = smov 3  }
   0x2   :  { %s4005_s9 = sld [smem:[%s4649_s0 + %s3949_s6]]   ;;  %s3952_s18 = smov 4  }
   0x3   :  { %s4010_s13 = sld [smem:[%s4649_s0 + %s3950_s10]]   ;;  %s3953_s22 = smov 5  }
   0x4   :  { %s4015_s17 = sld [smem:[%s4649_s0 + %s3951_s14]]   ;;  %s3954_s26 = smov 6  }
   0x5   :  { %s4020_s21 = sld [smem:[%s4649_s0 + %s3952_s18]]   ;;  %s3955_s30 = smov 7  }
   0x6   :  { %s4025_s25 = sld [smem:[%s4649_s0 + %s3953_s22]]   ;;  %s3956_s4 = smov 8  }
   0x7   :  { %s4030_s29 = sld [smem:[%s4649_s0 + %s3954_s26]]   ;;  %s3957_s10 = smov 9  }
   0x8   :  { %s4035_s3 = sld [smem:[%s4649_s0 + %s3955_s30]]   ;;  %s3958_s15 = smov 10  }
   0x9   :  { %s4040_s8 = sld [smem:[%s4649_s0 + %s3956_s4]]   ;;  %s3959_s20 = smov 11  }
   0xa   :  { %s4045_s14 = sld [smem:[%s4649_s0 + %s3957_s10]]   ;;  %s3960_s26 = smov 12  }
   0xb   :  { %s4050_s19 = sld [smem:[%s4649_s0 + %s3958_s15]]   ;;  %s3961_s1 = smov 13  }
   0xc   :  { %s4055_s24 = sld [smem:[%s4649_s0 + %s3959_s20]]   ;;  %s3962_s7 = smov 14  }
   0xd   :  { %s4060_s30 = sld [smem:[%s4649_s0 + %s3960_s26]]   ;;  %s3963_s15 = smov 15  }
   0xe   :  { %4657 = sst [smem:[#allocation24_spill]] %s4035_s3  ;;  %s3964_s22 = smov 16  }
   0xf   :  { %s4065_s6 = sld [smem:[%s4649_s0 + %s3961_s1]]   ;;  %s3965_s28 = smov 17  }
  0x10   :  { %4658 = sst [smem:[#allocation25_spill]] %s4045_s14 }
  0x11   :  { %4659 = sst [smem:[#allocation26_spill]] %s4050_s19 }
  0x12   :  { %s4070_s12 = sld [smem:[%s4649_s0 + %s3962_s7]]   ;;  %s3966_s7 = smov 18  }
  0x13   :  { %4660 = sst [smem:[#allocation27_spill]] %s4060_s30 }
  0x14   :  { %s4075_s20 = sld [smem:[%s4649_s0 + %s3963_s15]]   ;;  %s3967_s15 = smov 19  }
  0x15   :  { %4661 = sst [smem:[#allocation28_spill]] %s4065_s6 }
  0x16   :  { %s4080_s27 = sld [smem:[%s4649_s0 + %s3964_s22]]   ;;  %s3968_s22 = smov 20  }
  0x17   :  { %s4085_s4 = sld [smem:[%s4649_s0 + %s3965_s28]]   ;;  %s3969_s28 = smov 21  }
  0x18   :  { %s4090_s6 = sld [smem:[%s4649_s0 + %s3966_s7]]   ;;  %s3970_s7 = smov 22  }
  0x19   :  { %s4105_s30 = sld [smem:[%s4649_s0 + %s3969_s28]]   ;;  %s3973_s28 = smov 25  }
  0x1a   :  { %4662 = sst [smem:[#allocation29_spill]] %s4075_s20 }
  0x1b   :  { %s4095_s20 = sld [smem:[%s4649_s0 + %s3967_s15]]   ;;  %s3971_s15 = smov 23  }
  0x1c   :  { %4663 = sst [smem:[#allocation30_spill]] %s4080_s27 }
  0x1d   :  { %s4100_s27 = sld [smem:[%s4649_s0 + %s3968_s22]]   ;;  %s3972_s22 = smov 24  }
  0x1e   :  { %4664 = sst [smem:[#allocation31_spill]] %s4090_s6 }
  0x1f   :  { %4666 = sst [smem:[#allocation33_spill]] %s4105_s30 }
  0x20   :  { %s4110_s6 = sld [smem:[%s4649_s0 + %s3970_s7]]   ;;  %s3974_s7 = smov 26  }
  0x21   :  { %4665 = sst [smem:[#allocation32_spill]] %s4095_s20 }
  0x22   :  { %s4115_s20 = sld [smem:[%s4649_s0 + %s3971_s15]]   ;;  %s3975_s15 = smov 27  }
  0x23   :  { %s4120_s19 = sld [smem:[%s4649_s0 + %s3972_s22]]   ;;  %s3976_s22 = smov 28  }
  0x24   :  { %s4125_s30 = sld [smem:[%s4649_s0 + %s3973_s28]]   ;;  %s3977_s28 = smov 29  }
  0x25   :  { %s4135_s14 = sld [smem:[%s4649_s0 + %s3975_s15]]   ;;  %s3979_s15 = smov 31  }
  0x26   :  { %4667 = sst [smem:[#allocation34_spill]] %s4110_s6 }
  0x27   :  { %s4130_s6 = sld [smem:[%s4649_s0 + %s3974_s7]]   ;;  %s3978_s7 = smov 30  }
  0x28   :  { %s4150_s3 = sld [smem:[%s4649_s0 + %s3978_s7]]  }
  0x29   :  { %4668 = sst [smem:[#allocation35_spill]] %s4120_s19 }
  0x2a   :  { %4669 = sst [smem:[#allocation36_spill]] %s4125_s30 }
  0x2b   :  { %4670 = sst [smem:[#allocation37_spill]] %s4135_s14 }
  0x2c   :  { %s4140_s19 = sld [smem:[%s4649_s0 + %s3976_s22]]  }
  0x2d   :  { %s4145_s30 = sld [smem:[%s4649_s0 + %s3977_s28]]  }
  0x2e   :  { %s4155_s14 = sld [smem:[%s4649_s0 + %s3979_s15]]  }
  0x2f   :  { %68 = vsyncpa [#allocation3], 0 }
  0x30   :  { %69 = vsyncpa [#allocation5], 0 }
  0x31   :  { %70 = vsyncpa [#allocation8], 0 }
  0x32   :  { %71 = vsyncpa [#allocation11], 0 }
  0x33   :  { %72 = vsyncpa [#allocation14], 0 }
  0x34   :  { %73 = vsyncpa [#allocation17], 0  ;;  %s105_s22 = sshll.u32 %s4040_s8, 4  ;;  %s3980_s23 = smov [#allocation4]   ;;  %s106_s22 = int_to_ptr.hbm [resolvable:$true] %s105_s22 }
  0x35   :  { %s107_s26 = sshll.u32 %s3980_s23, 4  ;;  %s139_s28 = sshll.u32 %s4070_s12, 4  ;;  %s108_s26 = int_to_ptr.vmem [resolvable:$true] %s107_s26  ;;  %s140_s28 = int_to_ptr.hbm [resolvable:$true] %s139_s28 }
  0x36   :  { %s3697_s1 = sshra.s32 %s106_s22, 4  ;;  %s3701_s2 = scalar_lea.hbm %s4040_s8, 384  ;;  %s3698_s1 = int_to_ptr.hbm [resolvable:$true] %s3697_s1 }
  0x37   :  { %s3699_s0 = scalar_lea.hbm %s3698_s1, 384  ;;  %p3702_p1 = scmp.lt.s32.totalorder %s3698_s1, %s4040_s8 }
  0x38   :  { %p3700_p0 = scmp.ne.s32.totalorder %s3698_s1, %s3699_s0  ;;  %p3703_p2 = scmp.lt.s32.totalorder %s3701_s2, %s3699_s0 }
  0x3a   :  { %p3704_p3 = por %p3703_p2, %p3702_p1 }
  0x3c   :  { %p3705_p4 = pnand %p3704_p3, %p3700_p0 }
  0x3e   :  { %3708 = shalt.err (!%p3705_p4)
}
  0x3f   :  { %s3981_s7 = smov 128   ;;  %s3982_s10 = smov 8  }
  0x40   :  { %113 = dma.hbm_to_vmem [thread:$0]  %s106_s22, 6144, %s108_s26, [#allocation5], %s3981_s7, %s3981_s7, %s3982_s10  }
  0x41   :  { %s3983_s11 = smov [#allocation7]   ;;  %s173_s16 = sshll.u32 %s4100_s27, 4  ;;  %s4165_s16 = int_to_ptr.hbm [resolvable:$true] %s173_s16 }
  0x42   :  { %s141_s15 = sshll.u32 %s3983_s11, 4  ;;  %s3721_s8 = sshra.s32 %s140_s28, 4  ;;  %s142_s15 = int_to_ptr.vmem [resolvable:$true] %s141_s15  ;;  %s3722_s8 = int_to_ptr.hbm [resolvable:$true] %s3721_s8 }
  0x43   :  { %s3723_s18 = scalar_lea.hbm %s3722_s8, 384  ;;  %s3725_s23 = scalar_lea.hbm %s4070_s12, 384 }
  0x44   :  { %p3724_p5 = scmp.ne.s32.totalorder %s3722_s8, %s3723_s18  ;;  %p3726_p6 = scmp.lt.s32.totalorder %s3722_s8, %s4070_s12 }
  0x45   :  { %p3727_p7 = scmp.lt.s32.totalorder %s3725_s23, %s3723_s18 }
  0x47   :  { %p3728_p8 = por %p3727_p7, %p3726_p6 }
  0x49   :  { %p3729_p9 = pnand %p3728_p8, %p3724_p5 }
  0x4b   :  { %3732 = shalt.err (!%p3729_p9)
}
  0x4c   :  { %147 = dma.hbm_to_vmem [thread:$0]  %s140_s28, 6144, %s142_s15, [#allocation8], %s3981_s7, %s3981_s7, %s3982_s10  }
  0x4d   :  { %s207_s22 = sshll.u32 %s4130_s6, 4  ;;  %s3984_s26 = smov [#allocation10]   ;;  %s4173_s22 = int_to_ptr.hbm [resolvable:$true] %s207_s22 }
  0x4e   :  { %s175_s1 = sshll.u32 %s3984_s26, 4  ;;  %s3745_s0 = sshra.s32 %s4165_s16, 4  ;;  %s176_s1 = int_to_ptr.vmem [resolvable:$true] %s175_s1  ;;  %s3746_s0 = int_to_ptr.hbm [resolvable:$true] %s3745_s0 }
  0x4f   :  { %s3747_s12 = scalar_lea.hbm %s3746_s0, 384  ;;  %s3749_s2 = scalar_lea.hbm %s4100_s27, 384 }
  0x50   :  { %p3748_p10 = scmp.ne.s32.totalorder %s3746_s0, %s3747_s12  ;;  %p3750_p11 = scmp.lt.s32.totalorder %s3746_s0, %s4100_s27 }
  0x51   :  { %p3751_p12 = scmp.lt.s32.totalorder %s3749_s2, %s3747_s12 }
  0x53   :  { %p3752_p13 = por %p3751_p12, %p3750_p11 }
  0x55   :  { %p3753_p0 = pnand %p3752_p13, %p3748_p10 }
  0x57   :  { %3756 = shalt.err (!%p3753_p0)
}
  0x58   :  { %181 = dma.hbm_to_vmem [thread:$0]  %s4165_s16, 6144, %s176_s1, [#allocation11], %s3981_s7, %s3981_s7, %s3982_s10  }
  0x59   :  { %s3985_s28 = smov [#allocation13]   ;;  %s88_s15 = sshll.u32 %s4025_s25, 4  ;;  %s4183_s15 = int_to_ptr.hbm [resolvable:$true] %s88_s15 }
  0x5a   :  { %s209_s11 = sshll.u32 %s3985_s28, 4  ;;  %s3769_s27 = sshra.s32 %s4173_s22, 4  ;;  %s210_s11 = int_to_ptr.vmem [resolvable:$true] %s209_s11  ;;  %s3770_s27 = int_to_ptr.hbm [resolvable:$true] %s3769_s27 }
  0x5b   :  { %s3771_s8 = scalar_lea.hbm %s3770_s27, 384  ;;  %s3773_s18 = scalar_lea.hbm %s4130_s6, 384 }
  0x5c   :  { %p3772_p1 = scmp.ne.s32.totalorder %s3770_s27, %s3771_s8  ;;  %p3774_p2 = scmp.lt.s32.totalorder %s3770_s27, %s4130_s6 }
  0x5d   :  { %p3775_p3 = scmp.lt.s32.totalorder %s3773_s18, %s3771_s8 }
  0x5f   :  { %p3776_p4 = por %p3775_p3, %p3774_p2 }
  0x61   :  { %p3777_p5 = pnand %p3776_p4, %p3772_p1 }
  0x63   :  { %3780 = shalt.err (!%p3777_p5)
}
  0x64   :  { %215 = dma.hbm_to_vmem [thread:$0]  %s4173_s22, 6144, %s210_s11, [#allocation14], %s3981_s7, %s3981_s7, %s3982_s10  }
  0x65   :  { %s122_s16 = sshll.u32 %s4055_s24, 4  ;;  %s3986_s23 = smov [#allocation2]   ;;  %s4193_s16 = int_to_ptr.hbm [resolvable:$true] %s122_s16 }
  0x66   :  { %s90_s26 = sshll.u32 %s3986_s23, 4  ;;  %s3793_s6 = sshra.s32 %s4183_s15, 4  ;;  %s91_s26 = int_to_ptr.vmem [resolvable:$true] %s90_s26  ;;  %s3794_s6 = int_to_ptr.hbm [resolvable:$true] %s3793_s6 }
  0x67   :  { %s3795_s1 = scalar_lea.hbm %s3794_s6, 384  ;;  %s3797_s0 = scalar_lea.hbm %s4025_s25, 384 }
  0x68   :  { %p3796_p6 = scmp.ne.s32.totalorder %s3794_s6, %s3795_s1  ;;  %p3798_p7 = scmp.lt.s32.totalorder %s3794_s6, %s4025_s25 }
  0x69   :  { %p3799_p8 = scmp.lt.s32.totalorder %s3797_s0, %s3795_s1 }
  0x6b   :  { %p3800_p9 = por %p3799_p8, %p3798_p7 }
  0x6d   :  { %p3801_p10 = pnand %p3800_p9, %p3796_p6 }
  0x6f   :  { %3804 = shalt.err (!%p3801_p10)
}
  0x70   :  { %96 = dma.hbm_to_vmem [thread:$0]  %s4183_s15, 6144, %s91_s26, [#allocation3], %s3981_s7, %s3981_s7, %s3982_s10  }
  0x71   :  { %s3987_s22 = smov [#allocation6]   ;;  %s156_s2 = sshll.u32 %s4085_s4, 4  ;;  %s4203_s2 = int_to_ptr.hbm [resolvable:$true] %s156_s2 }
  0x72   :  { %s124_s12 = sshll.u32 %s3987_s22, 4  ;;  %s3817_s25 = sshra.s32 %s4193_s16, 4  ;;  %s125_s12 = int_to_ptr.vmem [resolvable:$true] %s124_s12  ;;  %s3818_s25 = int_to_ptr.hbm [resolvable:$true] %s3817_s25 }
  0x73   :  { %s3819_s28 = scalar_lea.hbm %s3818_s25, 384  ;;  %s3821_s11 = scalar_lea.hbm %s4055_s24, 384 }
  0x74   :  { %p3820_p11 = scmp.ne.s32.totalorder %s3818_s25, %s3819_s28  ;;  %p3822_p12 = scmp.lt.s32.totalorder %s3818_s25, %s4055_s24 }
  0x75   :  { %p3823_p13 = scmp.lt.s32.totalorder %s3821_s11, %s3819_s28 }
  0x77   :  { %p3824_p0 = por %p3823_p13, %p3822_p12 }
  0x79   :  { %p3825_p1 = pnand %p3824_p0, %p3820_p11 }
  0x7b   :  { %3828 = shalt.err (!%p3825_p1)
}
  0x7c   :  { %130 = dma.hbm_to_vmem [thread:$0]  %s4193_s16, 6144, %s125_s12, [#allocation5], %s3981_s7, %s3981_s7, %s3982_s10  }
  0x7d   :  { %s190_s15 = sshll.u32 %s4115_s20, 4  ;;  %s3988_s27 = smov [#allocation9]   ;;  %s4213_s15 = int_to_ptr.hbm [resolvable:$true] %s190_s15 }
  0x7e   :  { %s158_s8 = sshll.u32 %s3988_s27, 4  ;;  %s3841_s24 = sshra.s32 %s4203_s2, 4  ;;  %s159_s8 = int_to_ptr.vmem [resolvable:$true] %s158_s8  ;;  %s3842_s24 = int_to_ptr.hbm [resolvable:$true] %s3841_s24 }
  0x7f   :  { %s3843_s18 = scalar_lea.hbm %s3842_s24, 384  ;;  %s3845_s23 = scalar_lea.hbm %s4085_s4, 384 }
  0x80   :  { %p3844_p2 = scmp.ne.s32.totalorder %s3842_s24, %s3843_s18  ;;  %p3846_p3 = scmp.lt.s32.totalorder %s3842_s24, %s4085_s4 }
  0x81   :  { %p3847_p4 = scmp.lt.s32.totalorder %s3845_s23, %s3843_s18 }
  0x83   :  { %p3848_p5 = por %p3847_p4, %p3846_p3 }
  0x85   :  { %p3849_p6 = pnand %p3848_p5, %p3844_p2 }
  0x87   :  { %3852 = shalt.err (!%p3849_p6)
}
  0x88   :  { %164 = dma.hbm_to_vmem [thread:$0]  %s4203_s2, 6144, %s159_s8, [#allocation8], %s3981_s7, %s3981_s7, %s3982_s10  }
  0x89   :  { %s3989_s16 = smov [#allocation12]   ;;  %s222_s6 = sshll.u32 %s4140_s19, 4  ;;  %s4223_s6 = int_to_ptr.hbm [resolvable:$true] %s222_s6 }
  0x8a   :  { %s192_s26 = sshll.u32 %s3989_s16, 4  ;;  %s3865_s4 = sshra.s32 %s4213_s15, 4  ;;  %s193_s26 = int_to_ptr.vmem [resolvable:$true] %s192_s26  ;;  %s3866_s4 = int_to_ptr.hbm [resolvable:$true] %s3865_s4 }
  0x8b   :  { %s3867_s1 = scalar_lea.hbm %s3866_s4, 384  ;;  %s3869_s0 = scalar_lea.hbm %s4115_s20, 384 }
  0x8c   :  { %p3868_p7 = scmp.ne.s32.totalorder %s3866_s4, %s3867_s1  ;;  %p3870_p8 = scmp.lt.s32.totalorder %s3866_s4, %s4115_s20 }
  0x8d   :  { %p3871_p9 = scmp.lt.s32.totalorder %s3869_s0, %s3867_s1 }
  0x8f   :  { %p3872_p10 = por %p3871_p9, %p3870_p8 }
  0x91   :  { %p3873_p11 = pnand %p3872_p10, %p3868_p7 }
  0x93   :  { %3876 = shalt.err (!%p3873_p11)
}
  0x94   :  { %198 = dma.hbm_to_vmem [thread:$0]  %s4213_s15, 6144, %s193_s26, [#allocation11], %s3981_s7, %s3981_s7, %s3982_s10  }
  0x95   :  { %s235_s22 = sshll.u32 %s4145_s30, 4  ;;  %s3990_s12 = smov [#allocation15]   ;;  %s4233_s22 = int_to_ptr.hbm [resolvable:$true] %s235_s22 }
  0x96   :  { %s224_s2 = sshll.u32 %s3990_s12, 4  ;;  %s3889_s20 = sshra.s32 %s4223_s6, 4  ;;  %s225_s2 = int_to_ptr.vmem [resolvable:$true] %s224_s2  ;;  %s3890_s20 = int_to_ptr.hbm [resolvable:$true] %s3889_s20 }
  0x97   :  { %s3891_s25 = scalar_lea.hbm %s3890_s20, 224  ;;  %s3893_s28 = scalar_lea.hbm %s4140_s19, 224 }
  0x98   :  { %p3892_p12 = scmp.ne.s32.totalorder %s3890_s20, %s3891_s25  ;;  %p3894_p13 = scmp.lt.s32.totalorder %s3890_s20, %s4140_s19 }
  0x99   :  { %p3895_p0 = scmp.lt.s32.totalorder %s3893_s28, %s3891_s25 }
  0x9b   :  { %p3896_p1 = por %p3895_p0, %p3894_p13 }
  0x9d   :  { %p3897_p2 = pnand %p3896_p1, %p3892_p12 }
  0x9f   :  { %3900 = shalt.err (!%p3897_p2)
}
  0xa0   :  { %230 = dma.hbm_to_vmem [thread:$0]  %s4223_s6, 3584, %s225_s2, [#allocation14], %s3981_s7, %s3981_s7, %s3982_s10  }
  0xa1   :  { %s3991_s11 = smov [#allocation16]   ;;  %s3913_s27 = sshra.s32 %s4233_s22, 4  ;;  %s3914_s27 = int_to_ptr.hbm [resolvable:$true] %s3913_s27 }
  0xa2   :  { %s237_s15 = sshll.u32 %s3991_s11, 4  ;;  %s3915_s8 = scalar_lea.hbm %s3914_s27, 896  ;;  %s238_s15 = int_to_ptr.vmem [resolvable:$true] %s237_s15 }
  0xa3   :  { %p3916_p3 = scmp.ne.s32.totalorder %s3914_s27, %s3915_s8  ;;  %s3917_s19 = scalar_lea.hbm %s4145_s30, 896 }
  0xa4   :  { %p3918_p4 = scmp.lt.s32.totalorder %s3914_s27, %s4145_s30  ;;  %p3919_p5 = scmp.lt.s32.totalorder %s3917_s19, %s3915_s8 }
  0xa6   :  { %p3920_p6 = por %p3919_p5, %p3918_p4 }
  0xa8   :  { %p3921_p7 = pnand %p3920_p6, %p3916_p3 }
  0xaa   :  { %3924 = shalt.err (!%p3921_p7)
}
  0xab   :  { %243 = dma.hbm_to_vmem [thread:$0]  %s4233_s22, 14336, %s238_s15, [#allocation17], %s3981_s7, %s3981_s7, %s3982_s10  }
  0xac   :  { %3937 = dma.done.wait [#allocation3], 6144  }
  0xad   :  { %3938 = vsyncadd [#allocation3], 4294961152 }
  0xae   :  { %3939 = dma.done.wait [#allocation5], 12288  }
  0xaf   :  { %3940 = vsyncadd [#allocation5], 4294955008 }
  0xb0   :  { %3941 = dma.done.wait [#allocation8], 12288  }
  0xb1   :  { %3942 = vsyncadd [#allocation8], 4294955008 }
  0xb2   :  { %3943 = dma.done.wait [#allocation11], 12288  }
  0xb3   :  { %3944 = vsyncadd [#allocation11], 4294955008 }
  0xb4   :  { %3945 = dma.done.wait [#allocation14], 9728  }
  0xb5   :  { %3946 = vsyncadd [#allocation14], 4294957568 }
  0xb6   :  { %3947 = dma.done.wait [#allocation17], 14336  }
  0xb7   :  { %3948 = vsyncadd [#allocation17], 4294952960  ;;  %v4250_v0 = vld [vmem:[%s4000_s5 + $0x18] sm:$0xff]  ;;  %v4253_v1 = vld [vmem:[%s4000_s5 + $0x10] sm:$0xff]  ;;  %vm294_vm0 = vcmask 261120   ;;  %vm1190_vm1 = vcmask 130048  }
  0xb8   :  { %319 = vmatpush.msra.mxu0 %v4250_v0  ;;  %381 = vmatpush.msra.mxu1 %v4250_v0  ;;  %v4258_v2 = vld [vmem:[%s4000_s5 + $0x8] sm:$0xff]  ;;  %v4263_v3 = vld [vmem:[%s4000_s5] sm:$0xff]  ;;  %v292_v8 = vld [vmem:[%s4005_s9 + $0x10] sm:$0xff]  ;;  %s4671_s5 = sld [smem:[#allocation24_spill]]  ;;  %vm1382_vm2 = vcmask 64512  }
  0xb9   :  { %v290_v4 = vld [vmem:[%s4005_s9] sm:$0xff]  ;;  %v291_v6 = vld [vmem:[%s4005_s9 + $0x8] sm:$0xff]  ;;  %v3385_v9 = vld [vmem:[%s4005_s9 + $0x30] sm:$0xff]  ;;  %s4677_s30 = sld [smem:[#allocation30_spill]] }
  0xba   :  { %320 = vmatpush.msra.mxu0 %v4253_v1  ;;  %382 = vmatpush.msra.mxu1 %v4253_v1  ;;  %v3383_v5 = vld [vmem:[%s4005_s9 + $0x20] sm:$0xff]  ;;  %v3384_v7 = vld [vmem:[%s4005_s9 + $0x28] sm:$0xff]  ;;  %v293_v10 = vld [vmem:[%s4005_s9 + $0x18] sm:$0xff]  ;;  %s4678_s7 = sld [smem:[#allocation31_spill]] }
  0xbb   :  { %v3386_v11 = vld [vmem:[%s4005_s9 + $0x38] sm:$0xff]  ;;  %v3405_v14 = vld [vmem:[%s4010_s13 + $0xf0] sm:$0xff]  ;;  %v3404_v16 = vld [vmem:[%s4010_s13 + $0xe8] sm:$0xff]  ;;  %s4679_s10 = sld [smem:[#allocation32_spill]] }
  0xbc   :  { %321 = vmatpush.msra.mxu0 %v4258_v2  ;;  %383 = vmatpush.msra.mxu1 %v4258_v2  ;;  %v3406_v12 = vld [vmem:[%s4010_s13 + $0xf8] sm:$0xff]  ;;  %v350_v15 = vld [vmem:[%s4010_s13 + $0x70] sm:$0xff]  ;;  %v349_v17 = vld [vmem:[%s4010_s13 + $0x68] sm:$0xff]  ;;  %s4680_s24 = sld [smem:[#allocation33_spill]] }
  0xbd   :  { %v351_v13 = vld [vmem:[%s4010_s13 + $0x78] sm:$0xff]  ;;  %415 = vmatpush.msra.mxu2 %v3406_v12  ;;  %v3403_v18 = vld [vmem:[%s4010_s13 + $0xe0] sm:$0xff]  ;;  %v3401_v23 = vld [vmem:[%s4010_s13 + $0xd0] sm:$0xff]  ;;  %s4681_s18 = sld [smem:[#allocation34_spill]] }
  0xbe   :  { %322 = vmatpush.msra.mxu0 %v4263_v3  ;;  %384 = vmatpush.msra.mxu1 %v4263_v3  ;;  %v348_v19 = vld [vmem:[%s4010_s13 + $0x60] sm:$0xff]  ;;  %v3402_v21 = vld [vmem:[%s4010_s13 + $0xd8] sm:$0xff]  ;;  %v346_v24 = vld [vmem:[%s4010_s13 + $0x50] sm:$0xff]  ;;  %s4682_s23 = sld [smem:[#allocation35_spill]] }
  0xbf   :  { %3379 = vmatmul.msk.f32.vlgmr.msra.gmra.mxu0 %vm294_vm0, %v290_v4  ;;  %3387 = vmatmul.msk.f32.vlgmr.msra.gmra.mxu1 %vm294_vm0, %v3383_v5  ;;  %v3407_v20 = vld [vmem:[%s4005_s9 + $0x40] sm:$0xff]  ;;  %v347_v22 = vld [vmem:[%s4010_s13 + $0x58] sm:$0xff]  ;;  %v3400_v25 = vld [vmem:[%s4010_s13 + $0xc8] sm:$0xff]  ;;  %s4683_s16 = sld [smem:[#allocation36_spill]] }
  0xc0   :  { %502 = vmatpush.msrb.mxu0 %v4250_v0  ;;  %444 = vmatpush.msra.mxu3 %v351_v13  ;;  %v345_v26 = vld [vmem:[%s4010_s13 + $0x48] sm:$0xff]  ;;  %v3399_v27 = vld [vmem:[%s4010_s13 + $0xc0] sm:$0xff]  ;;  %v3398_v30 = vld [vmem:[%s4010_s13 + $0xb8] sm:$0xff]  ;;  %s4684_s26 = sld [smem:[#allocation37_spill]] }
  0xc1   :  { %416 = vmatpush.msra.mxu2 %v3405_v14  ;;  %v344_v28 = vld [vmem:[%s4010_s13 + $0x40] sm:$0xff]  ;;  %v3408_v29 = vld [vmem:[%s4005_s9 + $0x48] sm:$0xff]  ;;  %v343_v31 = vld [vmem:[%s4010_s13 + $0x38] sm:$0xff] }
  0xc2   :  { %503 = vmatpush.msrb.mxu0 %v4253_v1  ;;  %445 = vmatpush.msra.mxu3 %v350_v15  ;;  %v3397_v32 = vld [vmem:[%s4010_s13 + $0xb0] sm:$0xff]  ;;  %v3396_v34 = vld [vmem:[%s4010_s13 + $0xa8] sm:$0xff]  ;;  %v3395_v36 = vld [vmem:[%s4010_s13 + $0xa0] sm:$0xff] }
  0xc3   :  { %417 = vmatpush.msra.mxu2 %v3404_v16  ;;  %v342_v33 = vld [vmem:[%s4010_s13 + $0x30] sm:$0xff]  ;;  %v341_v35 = vld [vmem:[%s4010_s13 + $0x28] sm:$0xff]  ;;  %v340_v37 = vld [vmem:[%s4010_s13 + $0x20] sm:$0xff] }
  0xc4   :  { %504 = vmatpush.msrb.mxu0 %v4258_v2  ;;  %446 = vmatpush.msra.mxu3 %v349_v17  ;;  %v3409_v38 = vld [vmem:[%s4005_s9 + $0x50] sm:$0xff]  ;;  %v3394_v39 = vld [vmem:[%s4010_s13 + $0x98] sm:$0xff]  ;;  %v3392_v43 = vld [vmem:[%s4010_s13 + $0x88] sm:$0xff] }
  0xc5   :  { %418 = vmatpush.msra.mxu2 %v3403_v18  ;;  %v339_v40 = vld [vmem:[%s4010_s13 + $0x18] sm:$0xff]  ;;  %v3393_v41 = vld [vmem:[%s4010_s13 + $0x90] sm:$0xff]  ;;  %v337_v44 = vld [vmem:[%s4010_s13 + $0x8] sm:$0xff] }
  0xc6   :  { %505 = vmatpush.msrb.mxu0 %v4263_v3  ;;  %447 = vmatpush.msra.mxu3 %v348_v19  ;;  %v338_v42 = vld [vmem:[%s4010_s13 + $0x10] sm:$0xff]  ;;  %v3410_v45 = vld [vmem:[%s4005_s9 + $0x58] sm:$0xff]  ;;  %v3391_v46 = vld [vmem:[%s4010_s13 + $0x80] sm:$0xff] }
  0xc7   :  { %3380 = vmatmul.msk.f32.gmra.mxu0 %vm294_vm0, %v291_v6  ;;  %3388 = vmatmul.msk.f32.gmra.mxu1 %vm294_vm0, %v3384_v7  ;;  %v336_v47 = vld [vmem:[%s4010_s13] sm:$0xff]  ;;  %v3430_v48 = vld [vmem:[%s4010_s13 + $0x178] sm:$0xff]  ;;  %v3429_v49 = vld [vmem:[%s4010_s13 + $0x170] sm:$0xff] }
  0xc8   :  { %694 = vmatpush.msra.mxu0 %v4250_v0  ;;  %419 = vmatpush.msra.mxu2 %v3402_v21  ;;  %v3428_v50 = vld [vmem:[%s4010_s13 + $0x168] sm:$0xff]  ;;  %v3427_v51 = vld [vmem:[%s4010_s13 + $0x160] sm:$0xff]  ;;  %v3426_v52 = vld [vmem:[%s4010_s13 + $0x158] sm:$0xff] }
  0xc9   :  { %448 = vmatpush.msra.mxu3 %v347_v22  ;;  %536 = vmatpush.msrb.mxu1 %v3430_v48  ;;  %v3425_v53 = vld [vmem:[%s4010_s13 + $0x150] sm:$0xff]  ;;  %v3424_v54 = vld [vmem:[%s4010_s13 + $0x148] sm:$0xff]  ;;  %v3423_v55 = vld [vmem:[%s4010_s13 + $0x140] sm:$0xff] }
  0xca   :  { %695 = vmatpush.msra.mxu0 %v4253_v1  ;;  %420 = vmatpush.msra.mxu2 %v3401_v23  ;;  %v3422_v56 = vld [vmem:[%s4010_s13 + $0x138] sm:$0xff]  ;;  %v3421_v57 = vld [vmem:[%s4010_s13 + $0x130] sm:$0xff]  ;;  %v3420_v58 = vld [vmem:[%s4010_s13 + $0x128] sm:$0xff] }
  0xcb   :  { %449 = vmatpush.msra.mxu3 %v346_v24  ;;  %537 = vmatpush.msrb.mxu1 %v3429_v49  ;;  %v3419_v59 = vld [vmem:[%s4010_s13 + $0x120] sm:$0xff]  ;;  %v3418_v60 = vld [vmem:[%s4010_s13 + $0x118] sm:$0xff]  ;;  %v3417_v61 = vld [vmem:[%s4010_s13 + $0x110] sm:$0xff] }
  0xcc   :  { %696 = vmatpush.msra.mxu0 %v4258_v2  ;;  %421 = vmatpush.msra.mxu2 %v3400_v25  ;;  %v3416_v62 = vld [vmem:[%s4010_s13 + $0x108] sm:$0xff]  ;;  %v3415_v63 = vld [vmem:[%s4010_s13 + $0x100] sm:$0xff]  ;;  %v3458_v13 = vld [vmem:[%s4005_s9 + $0x98] sm:$0xff] }
  0xcd   :  { %450 = vmatpush.msra.mxu3 %v345_v26  ;;  %538 = vmatpush.msrb.mxu1 %v3428_v50  ;;  %v3432_v14 = vld [vmem:[%s4005_s9 + $0x68] sm:$0xff]  ;;  %v3503_v16 = vld [vmem:[%s4005_s9 + $0xc0] sm:$0xff]  ;;  %v3433_v17 = vld [vmem:[%s4005_s9 + $0x70] sm:$0xff] }
  0xce   :  { %697 = vmatpush.msra.mxu0 %v4263_v3  ;;  %422 = vmatpush.msra.mxu2 %v3399_v27  ;;  %v3504_v19 = vld [vmem:[%s4005_s9 + $0xc8] sm:$0xff]  ;;  %v3505_v22 = vld [vmem:[%s4005_s9 + $0xd0] sm:$0xff]  ;;  %v3479_v23 = vld [vmem:[%s4005_s9 + $0xa0] sm:$0xff] }
  0xcf   :  { %3381 = vmatmul.msk.f32.gmra.mxu0 %vm294_vm0, %v292_v8  ;;  %3389 = vmatmul.msk.f32.gmra.mxu1 %vm294_vm0, %v3385_v9  ;;  %v3455_v8 = vld [vmem:[%s4005_s9 + $0x80] sm:$0xff]  ;;  %v3506_v24 = vld [vmem:[%s4005_s9 + $0xd8] sm:$0xff]  ;;  %v3480_v25 = vld [vmem:[%s4005_s9 + $0xa8] sm:$0xff] }
  0xd0   :  { %451 = vmatpush.msra.mxu3 %v344_v28  ;;  %423 = vmatpush.msra.mxu2 %v3398_v30  ;;  %v3481_v26 = vld [vmem:[%s4005_s9 + $0xb0] sm:$0xff]  ;;  %v3482_v27 = vld [vmem:[%s4005_s9 + $0xb8] sm:$0xff]  ;;  %v3452_v30 = vld [vmem:[%s4010_s13 + $0x1e8] sm:$0xff] }
  0xd1   :  { %539 = vmatpush.msrb.mxu1 %v3427_v51  ;;  %v3454_v28 = vld [vmem:[%s4010_s13 + $0x1f8] sm:$0xff]  ;;  %v3441_v50 = vld [vmem:[%s4010_s13 + $0x190] sm:$0xff] }
  0xd2   :  { %452 = vmatpush.msra.mxu3 %v343_v31  ;;  %424 = vmatpush.msra.mxu2 %v3397_v32  ;;  %v3451_v31 = vld [vmem:[%s4010_s13 + $0x1e0] sm:$0xff]  ;;  %v3450_v32 = vld [vmem:[%s4010_s13 + $0x1d8] sm:$0xff]  ;;  %v3469_v51 = vld [vmem:[%s4010_s13 + $0x230] sm:$0xff] }
  0xd3   :  { %540 = vmatpush.msrb.mxu1 %v3426_v52  ;;  %v3442_v48 = vld [vmem:[%s4010_s13 + $0x198] sm:$0xff]  ;;  %v3440_v52 = vld [vmem:[%s4010_s13 + $0x188] sm:$0xff] }
  0xd4   :  { %453 = vmatpush.msra.mxu3 %v342_v33  ;;  %425 = vmatpush.msra.mxu2 %v3396_v34  ;;  %v3478_v33 = vld [vmem:[%s4010_s13 + $0x278] sm:$0xff]  ;;  %v3449_v34 = vld [vmem:[%s4010_s13 + $0x1d0] sm:$0xff] }
  0xd5   :  { %541 = vmatpush.msrb.mxu1 %v3425_v53  ;;  %v3470_v49 = vld [vmem:[%s4010_s13 + $0x238] sm:$0xff]  ;;  %v3468_v53 = vld [vmem:[%s4010_s13 + $0x228] sm:$0xff] }
  0xd6   :  { %454 = vmatpush.msra.mxu3 %v341_v35  ;;  %426 = vmatpush.msra.mxu2 %v3395_v36  ;;  %v3477_v35 = vld [vmem:[%s4010_s13 + $0x270] sm:$0xff]  ;;  %v3448_v36 = vld [vmem:[%s4010_s13 + $0x1c8] sm:$0xff] }
  0xd7   :  { %3382 = vmatmul.msk.f32.gmra.mxu0 %vm294_vm0, %v293_v10  ;;  %3390 = vmatmul.msk.f32.gmra.mxu1 %vm294_vm0, %v3386_v11  ;;  %v3431_v11 = vld [vmem:[%s4005_s9 + $0x60] sm:$0xff] }
  0xd8   :  { %455 = vmatpush.msra.mxu3 %v340_v37  ;;  %427 = vmatpush.msra.mxu2 %v3394_v39  ;;  %v3476_v37 = vld [vmem:[%s4010_s13 + $0x268] sm:$0xff]  ;;  %v3475_v39 = vld [vmem:[%s4010_s13 + $0x260] sm:$0xff] }
  0xd9   :  { %542 = vmatpush.msrb.mxu1 %v3424_v54  ;;  %v3439_v54 = vld [vmem:[%s4010_s13 + $0x180] sm:$0xff] }
  0xda   :  { %456 = vmatpush.msra.mxu3 %v339_v40  ;;  %428 = vmatpush.msra.mxu2 %v3393_v41  ;;  %v3446_v40 = vld [vmem:[%s4010_s13 + $0x1b8] sm:$0xff] }
  0xdb   :  { %543 = vmatpush.msrb.mxu1 %v3423_v55  ;;  %v3474_v41 = vld [vmem:[%s4010_s13 + $0x258] sm:$0xff]  ;;  %v3467_v55 = vld [vmem:[%s4010_s13 + $0x220] sm:$0xff] }
  0xdc   :  { %457 = vmatpush.msra.mxu3 %v338_v42  ;;  %429 = vmatpush.msra.mxu2 %v3392_v43  ;;  %v3445_v42 = vld [vmem:[%s4010_s13 + $0x1b0] sm:$0xff] }
  0xdd   :  { %544 = vmatpush.msrb.mxu1 %v3422_v56  ;;  %v3473_v43 = vld [vmem:[%s4010_s13 + $0x250] sm:$0xff] }
  0xde   :  { %458 = vmatpush.msra.mxu3 %v337_v44  ;;  %430 = vmatpush.msra.mxu2 %v3391_v46  ;;  %v3444_v44 = vld [vmem:[%s4010_s13 + $0x1a8] sm:$0xff]  ;;  %v3443_v46 = vld [vmem:[%s4010_s13 + $0x1a0] sm:$0xff] }
  0xdf   :  { %3411 = vmatmul.msk.f32.vlgmr.msrb.gmra.mxu0 %vm294_vm0, %v3407_v20  ;;  %545 = vmatpush.msrb.mxu1 %v3421_v57  ;;  %v3434_v20 = vld [vmem:[%s4005_s9 + $0x78] sm:$0xff] }
  0xe0   :  { %886 = vmatpush.msrb.mxu0 %v4250_v0  ;;  %459 = vmatpush.msra.mxu3 %v336_v47  ;;  %v3471_v47 = vld [vmem:[%s4010_s13 + $0x240] sm:$0xff]  ;;  %v3466_v57 = vld [vmem:[%s4010_s13 + $0x218] sm:$0xff] }
  0xe1   :  { %598 = vmatpush.msrb.mxu2 %v4250_v0  ;;  %546 = vmatpush.msrb.mxu1 %v3420_v58  ;;  %v3502_v58 = vld [vmem:[%s4010_s13 + $0x2f8] sm:$0xff] }
  0xe2   :  { %887 = vmatpush.msrb.mxu0 %v4253_v1  ;;  %632 = vmatpush.msrb.mxu3 %v3454_v28  ;;  %v3516_v28 = vld [vmem:[%s4010_s13 + $0x328] sm:$0xff] }
  0xe3   :  { %599 = vmatpush.msrb.mxu2 %v4253_v1  ;;  %547 = vmatpush.msrb.mxu1 %v3419_v59  ;;  %v3465_v59 = vld [vmem:[%s4010_s13 + $0x210] sm:$0xff] }
  0xe4   :  { %888 = vmatpush.msrb.mxu0 %v4258_v2 }
  0xe5   :  { %600 = vmatpush.msrb.mxu2 %v4258_v2  ;;  %548 = vmatpush.msrb.mxu1 %v3418_v60  ;;  %v3501_v60 = vld [vmem:[%s4010_s13 + $0x2f0] sm:$0xff] }
  0xe6   :  { %889 = vmatpush.msrb.mxu0 %v4263_v3 }
  0xe7   :  { %3412 = vmatmul.msk.f32.gmra.mxu0 %vm294_vm0, %v3408_v29  ;;  %601 = vmatpush.msrb.mxu2 %v4263_v3  ;;  %v3453_v29 = vld [vmem:[%s4010_s13 + $0x1f0] sm:$0xff] }
  0xe8   :  { %549 = vmatpush.msrb.mxu1 %v3417_v61  ;;  %633 = vmatpush.msrb.mxu3 %v3453_v29  ;;  %v3464_v61 = vld [vmem:[%s4010_s13 + $0x208] sm:$0xff]  ;;  %v3487_v29 = vld [vmem:[%s4010_s13 + $0x280] sm:$0xff] }
  0xea   :  { %550 = vmatpush.msrb.mxu1 %v3416_v62  ;;  %634 = vmatpush.msrb.mxu3 %v3452_v30  ;;  %v3500_v62 = vld [vmem:[%s4010_s13 + $0x2e8] sm:$0xff]  ;;  %v3515_v30 = vld [vmem:[%s4010_s13 + $0x320] sm:$0xff] }
  0xec   :  { %551 = vmatpush.msrb.mxu1 %v3415_v63  ;;  %635 = vmatpush.msrb.mxu3 %v3451_v31  ;;  %v3463_v63 = vld [vmem:[%s4010_s13 + $0x200] sm:$0xff] }
  0xee   :  { %636 = vmatpush.msrb.mxu3 %v3450_v32  ;;  %728 = vmatpush.msra.mxu1 %v3478_v33  ;;  %v3514_v33 = vld [vmem:[%s4010_s13 + $0x318] sm:$0xff] }
  0xef   :  { %3413 = vmatmul.msk.f32.gmra.mxu0 %vm294_vm0, %v3409_v38  ;;  %v3447_v38 = vld [vmem:[%s4010_s13 + $0x1c0] sm:$0xff] }
  0xf0   :  { %637 = vmatpush.msrb.mxu3 %v3449_v34  ;;  %729 = vmatpush.msra.mxu1 %v3477_v35  ;;  %v3513_v34 = vld [vmem:[%s4010_s13 + $0x310] sm:$0xff]  ;;  %v3512_v35 = vld [vmem:[%s4010_s13 + $0x308] sm:$0xff] }
  0xf2   :  { %638 = vmatpush.msrb.mxu3 %v3448_v36  ;;  %730 = vmatpush.msra.mxu1 %v3476_v37  ;;  %v3511_v36 = vld [vmem:[%s4010_s13 + $0x300] sm:$0xff] }
  0xf4   :  { %639 = vmatpush.msrb.mxu3 %v3447_v38  ;;  %731 = vmatpush.msra.mxu1 %v3475_v39 }
  0xf6   :  { %640 = vmatpush.msrb.mxu3 %v3446_v40  ;;  %732 = vmatpush.msra.mxu1 %v3474_v41 }
  0xf7   :  { %3414 = vmatmul.msk.f32.gmra.mxu0 %vm294_vm0, %v3410_v45  ;;  %v3472_v45 = vld [vmem:[%s4010_s13 + $0x248] sm:$0xff] }
  0xf8   :  { %641 = vmatpush.msrb.mxu3 %v3445_v42  ;;  %733 = vmatpush.msra.mxu1 %v3473_v43 }
  0xfa   :  { %642 = vmatpush.msrb.mxu3 %v3444_v44  ;;  %734 = vmatpush.msra.mxu1 %v3472_v45 }
  0xfc   :  { %643 = vmatpush.msrb.mxu3 %v3443_v46  ;;  %735 = vmatpush.msra.mxu1 %v3471_v47 }
  0xfe   :  { %644 = vmatpush.msrb.mxu3 %v3442_v48  ;;  %736 = vmatpush.msra.mxu1 %v3470_v49 }
  0xff   :  { %3459 = vmatmul.msk.f32.vlgmr.msra.gmra.mxu0 %vm294_vm0, %v3455_v8  ;;  %v3526_v8 = vld [vmem:[%s4010_s13 + $0x378] sm:$0xff] }
 0x100   :  { %645 = vmatpush.msrb.mxu3 %v3441_v50  ;;  %737 = vmatpush.msra.mxu1 %v3469_v51 }
 0x102   :  { %646 = vmatpush.msrb.mxu3 %v3440_v52  ;;  %738 = vmatpush.msra.mxu1 %v3468_v53 }
 0x104   :  { %647 = vmatpush.msrb.mxu3 %v3439_v54  ;;  %739 = vmatpush.msra.mxu1 %v3467_v55 }
 0x106   :  { %740 = vmatpush.msra.mxu1 %v3466_v57 }
 0x108   :  { %741 = vmatpush.msra.mxu1 %v3465_v59 }
 0x10a   :  { %742 = vmatpush.msra.mxu1 %v3464_v61 }
 0x10c   :  { %743 = vmatpush.msra.mxu1 %v3463_v63 }
 0x13c   :  { %v324_v4 = vpop.f32.mrf.mxu0  ;;  %v386_v5 = vpop.f32.mrf.mxu1 }
 0x13d   :  { %431 = vmatmul.f32.vlgmr.msra.gmra.mxu2 %v386_v5  ;;  %460 = vmatmul.f32.vlgmr.msra.gmra.mxu3 %v324_v4  ;;  %v3499_v4 = vld [vmem:[%s4010_s13 + $0x2e0] sm:$0xff] }
 0x13e   :  { %790 = vmatpush.msra.mxu2 %v4250_v0  ;;  %v3456_v0 = vld [vmem:[%s4005_s9 + $0x88] sm:$0xff]  ;;  %824 = vmatpush.msra.mxu3 %v3502_v58 }
 0x13f   :  { %3460 = vmatmul.msk.f32.gmra.mxu0 %vm294_vm0, %v3456_v0  ;;  %v3496_v0 = vld [vmem:[%s4010_s13 + $0x2c8] sm:$0xff] }
 0x140   :  { %791 = vmatpush.msra.mxu2 %v4253_v1  ;;  %825 = vmatpush.msra.mxu3 %v3501_v60 }
 0x142   :  { %792 = vmatpush.msra.mxu2 %v4258_v2  ;;  %826 = vmatpush.msra.mxu3 %v3500_v62 }
 0x144   :  { %v327_v6 = vpop.f32.mrf.mxu0  ;;  %v389_v7 = vpop.f32.mrf.mxu1  ;;  %793 = vmatpush.msra.mxu2 %v4263_v3  ;;  %v3457_v3 = vld [vmem:[%s4005_s9 + $0x90] sm:$0xff]  ;;  %827 = vmatpush.msra.mxu3 %v3499_v4  ;;  %s4672_s9 = sld [smem:[#allocation25_spill]] }
 0x145   :  { %434 = vmatmul.f32.gmra.mxu2 %v389_v7  ;;  %463 = vmatmul.f32.gmra.mxu3 %v327_v6  ;;  %v3498_v7 = vld [vmem:[%s4010_s13 + $0x2d8] sm:$0xff] }
 0x146   :  { %828 = vmatpush.msra.mxu3 %v3498_v7 }
 0x147   :  { %3461 = vmatmul.msk.f32.gmra.mxu0 %vm294_vm0, %v3457_v3  ;;  %v3523_v3 = vld [vmem:[%s4010_s13 + $0x360] sm:$0xff] }
 0x14c   :  { %v330_v9 = vpop.f32.mrf.mxu0  ;;  %v392_v10 = vpop.f32.mrf.mxu1 }
 0x14d   :  { %437 = vmatmul.f32.gmra.mxu2 %v392_v10  ;;  %466 = vmatmul.f32.gmra.mxu3 %v330_v9  ;;  %v3497_v9 = vld [vmem:[%s4010_s13 + $0x2d0] sm:$0xff] }
 0x14e   :  { %v3525_v10 = vld [vmem:[%s4010_s13 + $0x370] sm:$0xff]  ;;  %829 = vmatpush.msra.mxu3 %v3497_v9 }
 0x14f   :  { %3462 = vmatmul.msk.f32.gmra.mxu0 %vm294_vm0, %v3458_v13  ;;  %v3494_v13 = vld [vmem:[%s4010_s13 + $0x2b8] sm:$0xff] }
 0x150   :  { %830 = vmatpush.msra.mxu3 %v3496_v0 }
 0x154   :  { %v333_v1 = vpop.f32.mrf.mxu0  ;;  %v395_v2 = vpop.f32.mrf.mxu1 }
 0x155   :  { %440 = vmatmul.f32.gmra.mxu2 %v395_v2  ;;  %469 = vmatmul.f32.gmra.mxu3 %v333_v1  ;;  %v3524_v1 = vld [vmem:[%s4010_s13 + $0x368] sm:$0xff]  ;;  %v3495_v2 = vld [vmem:[%s4010_s13 + $0x2c0] sm:$0xff] }
 0x156   :  { %831 = vmatpush.msra.mxu3 %v3495_v2 }
 0x157   :  { %3507 = vmatmul.msk.f32.vlgmr.msrb.gmra.mxu0 %vm294_vm0, %v3503_v16  ;;  %v3521_v16 = vld [vmem:[%s4010_s13 + $0x350] sm:$0xff] }
 0x158   :  { %832 = vmatpush.msra.mxu3 %v3494_v13 }
 0x15c   :  { %v507_v12 = vpop.f32.mrf.mxu0 }
 0x15d   :  { %552 = vmatmul.f32.vlgmr.msrb.gmra.mxu1 %v507_v12  ;;  %3435 = vmatmul.msk.f32.vlgmr.msrb.gmra.mxu2 %vm294_vm0, %v3431_v11 }
 0x15e   :  { %920 = vmatpush.msrb.mxu1 %v3526_v8 }
 0x15f   :  { %3508 = vmatmul.msk.f32.gmra.mxu0 %vm294_vm0, %v3504_v19  ;;  %v3491_v19 = vld [vmem:[%s4010_s13 + $0x2a0] sm:$0xff] }
 0x160   :  { %921 = vmatpush.msrb.mxu1 %v3525_v10 }
 0x162   :  { %922 = vmatpush.msrb.mxu1 %v3524_v1 }
 0x164   :  { %v510_v15 = vpop.f32.mrf.mxu0  ;;  %923 = vmatpush.msrb.mxu1 %v3523_v3 }
 0x165   :  { %555 = vmatmul.f32.gmra.mxu1 %v510_v15  ;;  %3436 = vmatmul.msk.f32.gmra.mxu2 %vm294_vm0, %v3432_v14  ;;  %v3522_v14 = vld [vmem:[%s4010_s13 + $0x358] sm:$0xff]  ;;  %v3493_v15 = vld [vmem:[%s4010_s13 + $0x2b0] sm:$0xff] }
 0x166   :  { %924 = vmatpush.msrb.mxu1 %v3522_v14  ;;  %833 = vmatpush.msra.mxu3 %v3493_v15 }
 0x167   :  { %3509 = vmatmul.msk.f32.gmra.mxu0 %vm294_vm0, %v3505_v22 }
 0x168   :  { %925 = vmatpush.msrb.mxu1 %v3521_v16 }
 0x16c   :  { %v513_v18 = vpop.f32.mrf.mxu0 }
 0x16d   :  { %558 = vmatmul.f32.gmra.mxu1 %v513_v18  ;;  %3437 = vmatmul.msk.f32.gmra.mxu2 %vm294_vm0, %v3433_v17  ;;  %v3492_v17 = vld [vmem:[%s4010_s13 + $0x2a8] sm:$0xff] }
 0x16e   :  { %v3520_v18 = vld [vmem:[%s4010_s13 + $0x348] sm:$0xff]  ;;  %834 = vmatpush.msra.mxu3 %v3492_v17 }
 0x16f   :  { %3510 = vmatmul.msk.f32.gmra.mxu0 %vm294_vm0, %v3506_v24  ;;  %926 = vmatpush.msrb.mxu1 %v3520_v18  ;;  %v3518_v24 = vld [vmem:[%s4010_s13 + $0x338] sm:$0xff] }
 0x170   :  { %835 = vmatpush.msra.mxu3 %v3491_v19 }
 0x174   :  { %v516_v21 = vpop.f32.mrf.mxu0 }
 0x175   :  { %561 = vmatmul.f32.gmra.mxu1 %v516_v21  ;;  %3438 = vmatmul.msk.f32.gmra.mxu2 %vm294_vm0, %v3434_v20  ;;  %v3519_v20 = vld [vmem:[%s4010_s13 + $0x340] sm:$0xff] }
 0x176   :  { %927 = vmatpush.msrb.mxu1 %v3519_v20 }
 0x178   :  { %928 = vmatpush.msrb.mxu1 %v3518_v24 }
 0x17c   :  { %v699_v6 = vpop.f32.mrf.mxu0 }
 0x17d   :  { %3483 = vmatmul.msk.f32.vlgmr.msra.gmra.mxu2 %vm294_vm0, %v3479_v23  ;;  %744 = vmatmul.f32.vlgmr.msra.gmra.mxu1 %v699_v6  ;;  %v3490_v23 = vld [vmem:[%s4010_s13 + $0x298] sm:$0xff] }
 0x17e   :  { %836 = vmatpush.msra.mxu3 %v3490_v23 }
 0x185   :  { %3484 = vmatmul.msk.f32.gmra.mxu2 %vm294_vm0, %v3480_v25  ;;  %v3489_v25 = vld [vmem:[%s4010_s13 + $0x290] sm:$0xff] }
 0x186   :  { %837 = vmatpush.msra.mxu3 %v3489_v25 }
 0x18d   :  { %3485 = vmatmul.msk.f32.gmra.mxu2 %vm294_vm0, %v3481_v26  ;;  %v3517_v26 = vld [vmem:[%s4010_s13 + $0x330] sm:$0xff] }
 0x18e   :  { %929 = vmatpush.msrb.mxu1 %v3517_v26 }
 0x190   :  { %930 = vmatpush.msrb.mxu1 %v3516_v28 }
 0x192   :  { %931 = vmatpush.msrb.mxu1 %v3515_v30 }
 0x194   :  { %932 = vmatpush.msrb.mxu1 %v3514_v33 }
 0x195   :  { %3486 = vmatmul.msk.f32.gmra.mxu2 %vm294_vm0, %v3482_v27  ;;  %v3488_v27 = vld [vmem:[%s4010_s13 + $0x288] sm:$0xff]  ;;  %s4673_s13 = sld [smem:[#allocation26_spill]] }
 0x196   :  { %838 = vmatpush.msra.mxu3 %v3488_v27  ;;  %933 = vmatpush.msrb.mxu1 %v3513_v34 }
 0x198   :  { %839 = vmatpush.msra.mxu3 %v3487_v29  ;;  %934 = vmatpush.msrb.mxu1 %v3512_v35  ;;  %v3679_v29 = vld [vmem:[%s4015_s17] ss:$0 sm:$0xff]  ;;  %s4674_s17 = sld [smem:[#allocation27_spill]] }
 0x19a   :  { %935 = vmatpush.msrb.mxu1 %v3511_v36 }
 0x1bc   :  { %v702_v12 = vpop.f32.mrf.mxu0 }
 0x1bd   :  { %747 = vmatmul.f32.gmra.mxu1 %v702_v12 }
 0x1c0   :  { %v4421_v56 = vpop.f32.mrf.mxu2  ;;  %v461_v50 = vpop.f32.mrf.mxu3 }
 0x1c1   :  { %v462_v3 = vadd.f32 %v461_v50, %v4421_v56  ;;  %v1008_v50 = vld [vmem:[#allocation2 + $0x60] sm:$0xff] }
 0x1c4   :  { %v705_v22 = vpop.f32.mrf.mxu0 }
 0x1c5   :  { %750 = vmatmul.f32.gmra.mxu1 %v705_v22 }
 0x1c8   :  { %v4431_v5 = vpop.f32.mrf.mxu2  ;;  %v464_v52 = vpop.f32.mrf.mxu3 }
 0x1c9   :  { %v465_v0 = vadd.f32 %v464_v52, %v4431_v5  ;;  %v1056_v52 = vld [vmem:[#allocation2 + $0xd8] sm:$0xff] }
 0x1cc   :  { %v708_v32 = vpop.f32.mrf.mxu0 }
 0x1cd   :  { %753 = vmatmul.f32.gmra.mxu1 %v708_v32 }
 0x1d0   :  { %v4441_v11 = vpop.f32.mrf.mxu2  ;;  %v467_v54 = vpop.f32.mrf.mxu3 }
 0x1d1   :  { %v468_v10 = vadd.f32 %v467_v54, %v4441_v11  ;;  %v1154_v54 = vld [vmem:[#allocation2 + $0x170] sm:$0xff] }
 0x1d4   :  { %v891_v38 = vpop.f32.mrf.mxu0 }
 0x1d5   :  { %936 = vmatmul.f32.vlgmr.msrb.gmra.mxu1 %v891_v38  ;;  %v1011_v38 = vld [vmem:[#allocation2 + $0x78] sm:$0xff] }
 0x1d6   :  { %1084 = vmatpush.msra.mxu1 %v1011_v38 }
 0x1d8   :  { %v4451_v21 = vpop.f32.mrf.mxu2  ;;  %v470_v57 = vpop.f32.mrf.mxu3 }
 0x1d9   :  { %v471_v12 = vadd.f32 %v470_v57, %v4451_v21  ;;  %v1006_v57 = vld [vmem:[#allocation2 + $0x50] sm:$0xff] }
 0x1da   :  { %v553_v48 = vpop.f32.mrf.mxu1 }
 0x1db   :  { %v565_v16 = vadd.f32 %v553_v48, %v462_v3  ;;  %v3529_v48 = vld [vmem:[%s4020_s21 + $0x10] sm:$0xff]  ;;  %v3533_v3 = vld [vmem:[%s4020_s21 + $0x20] sm:$0xff] }
 0x1dc   :  { %v894_v40 = vpop.f32.mrf.mxu0 }
 0x1dd   :  { %939 = vmatmul.f32.gmra.mxu1 %v894_v40 }
 0x1e0   :  { %v603_v31 = vpop.f32.mrf.mxu2 }
 0x1e1   :  { %648 = vmatmul.f32.vlgmr.msrb.gmra.mxu3 %v603_v31 }
 0x1e2   :  { %v556_v49 = vpop.f32.mrf.mxu1 }
 0x1e3   :  { %v566_v13 = vadd.f32 %v556_v49, %v465_v0  ;;  %v1057_v49 = vld [vmem:[#allocation2 + $0xe0] sm:$0xff]  ;;  %v1150_v0 = vld [vmem:[#allocation2 + $0x150] sm:$0xff] }
 0x1e4   :  { %v897_v42 = vpop.f32.mrf.mxu0 }
 0x1e5   :  { %942 = vmatmul.f32.gmra.mxu1 %v897_v42  ;;  %v1010_v42 = vld [vmem:[#allocation2 + $0x70] sm:$0xff] }
 0x1e6   :  { %1085 = vmatpush.msra.mxu1 %v1010_v42  ;;  %v1268_v42 = vld [vmem:[#allocation4 + $0xe0] sm:$0xff] }
 0x1e8   :  { %v606_v37 = vpop.f32.mrf.mxu2 }
 0x1e9   :  { %651 = vmatmul.f32.gmra.mxu3 %v606_v37  ;;  %v1060_v37 = vld [vmem:[#allocation2 + $0xf8] sm:$0xff] }
 0x1ea   :  { %v559_v51 = vpop.f32.mrf.mxu1  ;;  %1061 = vmatpush.msra.mxu0 %v1060_v37 }
 0x1eb   :  { %v567_v1 = vadd.f32 %v559_v51, %v468_v10  ;;  %v1155_v51 = vld [vmem:[#allocation2 + $0x178] sm:$0xff]  ;;  %v1051_v10 = vld [vmem:[#allocation2 + $0xb0] sm:$0xff] }
 0x1ec   :  { %v900_v44 = vpop.f32.mrf.mxu0 }
 0x1ed   :  { %945 = vmatmul.f32.gmra.mxu1 %v900_v44  ;;  %v1058_v44 = vld [vmem:[#allocation2 + $0xe8] sm:$0xff] }
 0x1f0   :  { %v609_v39 = vpop.f32.mrf.mxu2 }
 0x1f1   :  { %654 = vmatmul.f32.gmra.mxu3 %v609_v39 }
 0x1f2   :  { %v562_v53 = vpop.f32.mrf.mxu1 }
 0x1f3   :  { %v568_v17 = vadd.f32 %v562_v53, %v471_v12  ;;  %v1007_v53 = vld [vmem:[#allocation2 + $0x58] sm:$0xff]  ;;  %v1149_v12 = vld [vmem:[#allocation2 + $0x148] sm:$0xff] }
 0x1f8   :  { %v612_v41 = vpop.f32.mrf.mxu2 }
 0x1f9   :  { %657 = vmatmul.f32.gmra.mxu3 %v612_v41  ;;  %v1059_v41 = vld [vmem:[#allocation2 + $0xf0] sm:$0xff] }
 0x1fa   :  { %v745_v55 = vpop.f32.mrf.mxu1  ;;  %1062 = vmatpush.msra.mxu0 %v1059_v41  ;;  %v1269_v41 = vld [vmem:[#allocation4 + $0xe8] sm:$0xff] }
 0x1fc   :  { %1063 = vmatpush.msra.mxu0 %v1058_v44  ;;  %v1267_v44 = vld [vmem:[#allocation4 + $0xd8] sm:$0xff] }
 0x1fe   :  { %1064 = vmatpush.msra.mxu0 %v1057_v49 }
 0x200   :  { %v795_v43 = vpop.f32.mrf.mxu2  ;;  %1065 = vmatpush.msra.mxu0 %v1056_v52 }
 0x201   :  { %840 = vmatmul.f32.vlgmr.msra.gmra.mxu3 %v795_v43 }
 0x208   :  { %v798_v45 = vpop.f32.mrf.mxu2 }
 0x209   :  { %843 = vmatmul.f32.gmra.mxu3 %v798_v45  ;;  %v1009_v45 = vld [vmem:[#allocation2 + $0x68] sm:$0xff] }
 0x20a   :  { %1086 = vmatpush.msra.mxu1 %v1009_v45  ;;  %v1266_v45 = vld [vmem:[#allocation4 + $0xd0] sm:$0xff] }
 0x20c   :  { %1087 = vmatpush.msra.mxu1 %v1008_v50  ;;  %v1264_v50 = vld [vmem:[#allocation4 + $0xc0] sm:$0xff] }
 0x20e   :  { %1088 = vmatpush.msra.mxu1 %v1007_v53  ;;  %v3680_v53 = vld [vmem:[%s4030_s29] ss:$0 sm:$0xff]  ;;  %s4676_s29 = sld [smem:[#allocation29_spill]] }
 0x210   :  { %v801_v46 = vpop.f32.mrf.mxu2  ;;  %1089 = vmatpush.msra.mxu1 %v1006_v57 }
 0x211   :  { %846 = vmatmul.f32.gmra.mxu3 %v801_v46 }
 0x218   :  { %v804_v47 = vpop.f32.mrf.mxu2 }
 0x219   :  { %849 = vmatmul.f32.gmra.mxu3 %v804_v47  ;;  %v965_v47 = vld [vmem:[%s4020_s21] sm:$0xff] }
 0x23a   :  { %v748_v58 = vpop.f32.mrf.mxu1 }
 0x242   :  { %v751_v60 = vpop.f32.mrf.mxu1 }
 0x24a   :  { %v754_v63 = vpop.f32.mrf.mxu1 }
 0x252   :  { %v937_v6 = vpop.f32.mrf.mxu1 }
 0x25a   :  { %v940_v8 = vpop.f32.mrf.mxu1 }
 0x262   :  { %v943_v2 = vpop.f32.mrf.mxu1 }
 0x264   :  { %v649_v59 = vpop.f32.mrf.mxu3 }
 0x265   :  { %v661_v19 = vadd.f32 %v649_v59, %v565_v16  ;;  %v1054_v59 = vld [vmem:[#allocation2 + $0xc8] sm:$0xff]  ;;  %v1048_v16 = vld [vmem:[#allocation2 + $0x98] sm:$0xff] }
 0x267   :  { %v757_v24 = vadd.f32 %v745_v55, %v661_v19  ;;  %v1055_v55 = vld [vmem:[#allocation2 + $0xd0] sm:$0xff] }
 0x268   :  { %1066 = vmatpush.msra.mxu0 %v1055_v55  ;;  %v998_v19 = vld [vmem:[#allocation2 + $0x10] sm:$0xff]  ;;  %v1263_v55 = vld [vmem:[#allocation4 + $0xb8] sm:$0xff] }
 0x26a   :  { %v946_v27 = vpop.f32.mrf.mxu1  ;;  %1067 = vmatpush.msra.mxu0 %v1054_v59 }
 0x26c   :  { %v652_v61 = vpop.f32.mrf.mxu3 }
 0x26d   :  { %v662_v18 = vadd.f32 %v652_v61, %v566_v13  ;;  %v3530_v61 = vld [vmem:[%s4020_s21 + $0x18] sm:$0xff]  ;;  %v1001_v13 = vld [vmem:[#allocation2 + $0x28] sm:$0xff] }
 0x26f   :  { %v758_v23 = vadd.f32 %v748_v58, %v662_v18  ;;  %v1153_v58 = vld [vmem:[#allocation2 + $0x168] sm:$0xff]  ;;  %v1047_v18 = vld [vmem:[#allocation2 + $0x90] sm:$0xff] }
 0x274   :  { %v655_v62 = vpop.f32.mrf.mxu3 }
 0x275   :  { %v663_v14 = vadd.f32 %v655_v62, %v567_v1  ;;  %v1005_v62 = vld [vmem:[#allocation2 + $0x48] sm:$0xff]  ;;  %v1002_v1 = vld [vmem:[#allocation2 + $0x30] sm:$0xff] }
 0x276   :  { %1090 = vmatpush.msra.mxu1 %v1005_v62  ;;  %v1261_v62 = vld [vmem:[#allocation4 + $0xa8] sm:$0xff] }
 0x277   :  { %v759_v20 = vadd.f32 %v751_v60, %v663_v14  ;;  %v966_v60 = vld [vmem:[%s4020_s21 + $0x8] sm:$0xff]  ;;  %v1049_v14 = vld [vmem:[#allocation2 + $0xa0] sm:$0xff] }
 0x27c   :  { %v658_v4 = vpop.f32.mrf.mxu3 }
 0x27d   :  { %v664_v22 = vadd.f32 %v658_v4, %v568_v17  ;;  %v1152_v4 = vld [vmem:[#allocation2 + $0x160] sm:$0xff]  ;;  %v999_v17 = vld [vmem:[#allocation2 + $0x18] sm:$0xff] }
 0x27f   :  { %v760_v5 = vadd.f32 %v754_v63, %v664_v22  ;;  %v1053_v63 = vld [vmem:[#allocation2 + $0xc0] sm:$0xff]  ;;  %v3534_v22 = vld [vmem:[%s4020_s21 + $0x28] sm:$0xff]  ;;  %s4675_s21 = sld [smem:[#allocation28_spill]] }
 0x280   :  { %1068 = vmatpush.msra.mxu0 %v1053_v63 }
 0x284   :  { %v841_v7 = vpop.f32.mrf.mxu3 }
 0x285   :  { %v853_v56 = vadd.f32 %v841_v7, %v757_v24  ;;  %v1052_v7 = vld [vmem:[#allocation2 + $0xb8] sm:$0xff]  ;;  %v996_v24 = vld [vmem:[#allocation2] sm:$0xff] }
 0x286   :  { %1069 = vmatpush.msra.mxu0 %v1052_v7  ;;  %v1229_v7 = vld [vmem:[#allocation4 + $0x78] sm:$0xff] }
 0x287   :  { %v949_v32 = vadd.f32 %v937_v6, %v853_v56  ;;  %v1004_v6 = vld [vmem:[#allocation2 + $0x40] sm:$0xff] }
 0x288   :  { %1091 = vmatpush.msra.mxu1 %v1004_v6  ;;  %1070 = vmatpush.msra.mxu0 %v1051_v10  ;;  %v1144_v56 = vld [vmem:[#allocation2 + $0x120] sm:$0xff]  ;;  %v1353_v10 = vld [vmem:[#allocation4 + $0x178] sm:$0xff] }
 0x289   :  { %v957_v39 = vadd.f32 %v3679_v29, %v949_v32  ;;  %v1189_v6 = vld [vmem:[%s4671_s5] sm:$0xff] }
 0x28b   :  { %v961_v46 = vmax.f32 %v957_v39, 0.0  ;;  %v1271_v39 = vld [vmem:[#allocation4 + $0xf8] sm:$0xff] }
 0x28c   :  { %v844_v9 = vpop.f32.mrf.mxu3 }
 0x28d   :  { %v854_v25 = vadd.f32 %v844_v9, %v758_v23  ;;  %v1003_v9 = vld [vmem:[#allocation2 + $0x38] sm:$0xff]  ;;  %v997_v23 = vld [vmem:[#allocation2 + $0x8] sm:$0xff] }
 0x28e   :  { %1092 = vmatpush.msra.mxu1 %v1003_v9  ;;  %v1228_v9 = vld [vmem:[#allocation4 + $0x70] sm:$0xff] }
 0x28f   :  { %v950_v30 = vadd.f32 %v940_v8, %v854_v25  ;;  %v1151_v8 = vld [vmem:[#allocation2 + $0x158] sm:$0xff] }
 0x290   :  { %1093 = vmatpush.msra.mxu1 %v1002_v1  ;;  %v1147_v25 = vld [vmem:[#allocation2 + $0x138] sm:$0xff]  ;;  %v1227_v1 = vld [vmem:[#allocation4 + $0x68] sm:$0xff] }
 0x291   :  { %v958_v35 = vadd.f32 %v3679_v29, %v950_v30  ;;  %v1140_v30 = vld [vmem:[#allocation2 + $0x100] sm:$0xff] }
 0x292   :  { %1094 = vmatpush.msra.mxu1 %v1001_v13  ;;  %v3540_v13 = vld [vmem:[%s4671_s5 + $0x10] sm:$0xff] }
 0x293   :  { %v962_v43 = vmax.f32 %v958_v35, 0.0 }
 0x294   :  { %v847_v15 = vpop.f32.mrf.mxu3 }
 0x295   :  { %v855_v11 = vadd.f32 %v847_v15, %v759_v20  ;;  %v1000_v15 = vld [vmem:[#allocation2 + $0x20] sm:$0xff]  ;;  %v1046_v20 = vld [vmem:[#allocation2 + $0x88] sm:$0xff] }
 0x296   :  { %1095 = vmatpush.msra.mxu1 %v1000_v15  ;;  %v1351_v15 = vld [vmem:[#allocation4 + $0x168] sm:$0xff] }
 0x297   :  { %v951_v28 = vadd.f32 %v943_v2, %v855_v11  ;;  %v1050_v2 = vld [vmem:[#allocation2 + $0xa8] sm:$0xff]  ;;  %v1045_v11 = vld [vmem:[#allocation2 + $0x80] sm:$0xff] }
 0x298   :  { %1071 = vmatpush.msra.mxu0 %v1050_v2  ;;  %1096 = vmatpush.msra.mxu1 %v999_v17  ;;  %v1352_v2 = vld [vmem:[#allocation4 + $0x170] sm:$0xff]  ;;  %v1350_v17 = vld [vmem:[#allocation4 + $0x160] sm:$0xff] }
 0x299   :  { %v959_v33 = vadd.f32 %v3679_v29, %v951_v28  ;;  %v1143_v28 = vld [vmem:[#allocation2 + $0x118] sm:$0xff] }
 0x29a   :  { %1072 = vmatpush.msra.mxu0 %v1049_v14  ;;  %1097 = vmatpush.msra.mxu1 %v998_v19  ;;  %v1257_v14 = vld [vmem:[#allocation4 + $0x88] sm:$0xff]  ;;  %v1349_v19 = vld [vmem:[#allocation4 + $0x158] sm:$0xff] }
 0x29b   :  { %v963_v40 = vmax.f32 %v959_v33, 0.0 }
 0x29c   :  { %v850_v26 = vpop.f32.mrf.mxu3  ;;  %1073 = vmatpush.msra.mxu0 %v1048_v16  ;;  %1098 = vmatpush.msra.mxu1 %v997_v23  ;;  %v1225_v16 = vld [vmem:[#allocation4 + $0x58] sm:$0xff]  ;;  %v1222_v23 = vld [vmem:[#allocation4 + $0x40] sm:$0xff] }
 0x29d   :  { %v856_v21 = vadd.f32 %v850_v26, %v760_v5  ;;  %v1148_v5 = vld [vmem:[#allocation2 + $0x140] sm:$0xff]  ;;  %v1146_v26 = vld [vmem:[#allocation2 + $0x130] sm:$0xff] }
 0x29e   :  { %1074 = vmatpush.msra.mxu0 %v1047_v18  ;;  %1099 = vmatpush.msra.mxu1 %v996_v24  ;;  %v1224_v18 = vld [vmem:[#allocation4 + $0x50] sm:$0xff]  ;;  %v1221_v24 = vld [vmem:[#allocation4 + $0x38] sm:$0xff] }
 0x29f   :  { %v952_v31 = vadd.f32 %v946_v27, %v856_v21  ;;  %v1145_v27 = vld [vmem:[#allocation2 + $0x128] sm:$0xff]  ;;  %v1142_v21 = vld [vmem:[#allocation2 + $0x110] sm:$0xff] }
 0x2a0   :  { %1075 = vmatpush.msra.mxu0 %v1046_v20  ;;  %v1223_v20 = vld [vmem:[#allocation4 + $0x48] sm:$0xff] }
 0x2a1   :  { %v960_v34 = vadd.f32 %v3679_v29, %v952_v31  ;;  %v1141_v29 = vld [vmem:[#allocation2 + $0x108] sm:$0xff] }
 0x2a2   :  { %1076 = vmatpush.msra.mxu0 %v1045_v11  ;;  %v1347_v11 = vld [vmem:[#allocation4 + $0x148] sm:$0xff] }
 0x2a3   :  { %v964_v36 = vmax.f32 %v960_v34, 0.0 }
 0x2a5   :  { %985 = vmatpush.msrb.mxu2 %v964_v36  ;;  %1033 = vmatpush.msrb.mxu3 %v964_v36 }
 0x2a7   :  { %986 = vmatpush.msrb.mxu2 %v963_v40  ;;  %1034 = vmatpush.msrb.mxu3 %v963_v40 }
 0x2a9   :  { %987 = vmatpush.msrb.mxu2 %v962_v43  ;;  %1035 = vmatpush.msrb.mxu3 %v962_v43 }
 0x2ab   :  { %988 = vmatpush.msrb.mxu2 %v961_v46  ;;  %1036 = vmatpush.msrb.mxu3 %v961_v46 }
 0x2ac   :  { %3527 = vmatmul.msk.f32.vlgmr.msrb.gmra.mxu2 %vm294_vm0, %v965_v47  ;;  %3531 = vmatmul.msk.f32.vlgmr.msrb.gmra.mxu3 %vm294_vm0, %v3529_v48  ;;  %v1265_v48 = vld [vmem:[#allocation4 + $0xc8] sm:$0xff] }
 0x2ad   :  { %1128 = vmatpush.msra.mxu2 %v964_v36  ;;  %1156 = vmatpush.msra.mxu3 %v1155_v51 }
 0x2af   :  { %1129 = vmatpush.msra.mxu2 %v963_v40  ;;  %1157 = vmatpush.msra.mxu3 %v1154_v54  ;;  %v1270_v40 = vld [vmem:[#allocation4 + $0xf0] sm:$0xff] }
 0x2b1   :  { %1130 = vmatpush.msra.mxu2 %v962_v43  ;;  %1158 = vmatpush.msra.mxu3 %v1153_v58  ;;  %v1262_v58 = vld [vmem:[#allocation4 + $0xb0] sm:$0xff] }
 0x2b3   :  { %1131 = vmatpush.msra.mxu2 %v961_v46  ;;  %1159 = vmatpush.msra.mxu3 %v1152_v4  ;;  %v3538_v4 = vld [vmem:[%s4671_s5 + $0x8] sm:$0xff] }
 0x2b4   :  { %3528 = vmatmul.msk.f32.gmra.mxu2 %vm294_vm0, %v966_v60  ;;  %3532 = vmatmul.msk.f32.gmra.mxu3 %vm294_vm0, %v3530_v61 }
 0x2b5   :  { %1160 = vmatpush.msra.mxu3 %v1151_v8  ;;  %1272 = vmatpush.msrb.mxu2 %v1271_v39  ;;  %v1260_v8 = vld [vmem:[#allocation4 + $0xa0] sm:$0xff] }
 0x2b7   :  { %1161 = vmatpush.msra.mxu3 %v1150_v0  ;;  %1273 = vmatpush.msrb.mxu2 %v1270_v40  ;;  %v1259_v0 = vld [vmem:[#allocation4 + $0x98] sm:$0xff] }
 0x2b9   :  { %1162 = vmatpush.msra.mxu3 %v1149_v12  ;;  %1274 = vmatpush.msrb.mxu2 %v1269_v41  ;;  %v1226_v12 = vld [vmem:[#allocation4 + $0x60] sm:$0xff] }
 0x2bb   :  { %1163 = vmatpush.msra.mxu3 %v1148_v5  ;;  %1275 = vmatpush.msrb.mxu2 %v1268_v42  ;;  %v1346_v5 = vld [vmem:[#allocation4 + $0x140] sm:$0xff]  ;;  %v1421_v42 = vld [vmem:[#allocation6 + $0x78] sm:$0xff] }
 0x2bc   :  { %3535 = vmatmul.msk.f32.vlgmr.msra.gmra.mxu2 %vm294_vm0, %v3533_v3  ;;  %v1258_v3 = vld [vmem:[#allocation4 + $0x90] sm:$0xff] }
 0x2bd   :  { %1164 = vmatpush.msra.mxu3 %v1147_v25  ;;  %1276 = vmatpush.msrb.mxu2 %v1267_v44  ;;  %v1220_v25 = vld [vmem:[#allocation4 + $0x30] sm:$0xff]  ;;  %v1545_v44 = vld [vmem:[#allocation6 + $0x178] sm:$0xff] }
 0x2bf   :  { %1165 = vmatpush.msra.mxu3 %v1146_v26  ;;  %1277 = vmatpush.msrb.mxu2 %v1266_v45  ;;  %v1345_v26 = vld [vmem:[#allocation4 + $0x138] sm:$0xff]  ;;  %v1419_v45 = vld [vmem:[#allocation6 + $0x68] sm:$0xff] }
 0x2c1   :  { %1166 = vmatpush.msra.mxu3 %v1145_v27  ;;  %1278 = vmatpush.msrb.mxu2 %v1265_v48  ;;  %v1219_v27 = vld [vmem:[#allocation4 + $0x28] sm:$0xff] }
 0x2c2   :  { %v1543_v48 = vld [vmem:[#allocation6 + $0x168] sm:$0xff] }
 0x2c3   :  { %1167 = vmatpush.msra.mxu3 %v1144_v56  ;;  %1279 = vmatpush.msrb.mxu2 %v1264_v50  ;;  %v1344_v56 = vld [vmem:[#allocation4 + $0x130] sm:$0xff]  ;;  %v1542_v50 = vld [vmem:[#allocation6 + $0x160] sm:$0xff] }
 0x2c4   :  { %3536 = vmatmul.msk.f32.gmra.mxu2 %vm294_vm0, %v3534_v22  ;;  %v1348_v22 = vld [vmem:[#allocation4 + $0x150] sm:$0xff] }
 0x2c5   :  { %1168 = vmatpush.msra.mxu3 %v1143_v28  ;;  %1280 = vmatpush.msrb.mxu2 %v1263_v55  ;;  %v1218_v28 = vld [vmem:[#allocation4 + $0x20] sm:$0xff] }
 0x2c7   :  { %1169 = vmatpush.msra.mxu3 %v1142_v21  ;;  %1281 = vmatpush.msrb.mxu2 %v1262_v58  ;;  %v1343_v21 = vld [vmem:[#allocation4 + $0x128] sm:$0xff] }
 0x2c8   :  { %v1539_v58 = vld [vmem:[#allocation6 + $0x148] sm:$0xff] }
 0x2c9   :  { %1170 = vmatpush.msra.mxu3 %v1141_v29  ;;  %1282 = vmatpush.msrb.mxu2 %v1261_v62  ;;  %v1256_v29 = vld [vmem:[#allocation4 + $0x80] sm:$0xff]  ;;  %v1413_v62 = vld [vmem:[#allocation6 + $0x38] sm:$0xff] }
 0x2cb   :  { %1171 = vmatpush.msra.mxu3 %v1140_v30  ;;  %1283 = vmatpush.msrb.mxu2 %v1260_v8  ;;  %v1217_v30 = vld [vmem:[#allocation4 + $0x18] sm:$0xff] }
 0x2cc   :  { %v1537_v8 = vld [vmem:[#allocation6 + $0x138] sm:$0xff] }
 0x2cd   :  { %1284 = vmatpush.msrb.mxu2 %v1259_v0  ;;  %v1536_v0 = vld [vmem:[#allocation6 + $0x130] sm:$0xff] }
 0x2cf   :  { %1285 = vmatpush.msrb.mxu2 %v1258_v3  ;;  %v1381_v3 = vld [vmem:[%s4673_s13] sm:$0xff] }
 0x2d1   :  { %1286 = vmatpush.msrb.mxu2 %v1257_v14  ;;  %v1535_v14 = vld [vmem:[#allocation6 + $0x128] sm:$0xff] }
 0x2d3   :  { %1287 = vmatpush.msrb.mxu2 %v1256_v29  ;;  %v1534_v29 = vld [vmem:[#allocation6 + $0x120] sm:$0xff] }
 0x32f   :  { %v990_v31 = vpop.f32.mrf.mxu2  ;;  %v1038_v32 = vpop.f32.mrf.mxu3 }
 0x330   :  { %1077 = vmatmul.f32.vlgmr.msra.gmra.mxu0 %v1038_v32  ;;  %1100 = vmatmul.f32.vlgmr.msra.gmra.mxu1 %v990_v31  ;;  %v1342_v31 = vld [vmem:[#allocation4 + $0x120] sm:$0xff]  ;;  %v1216_v32 = vld [vmem:[#allocation4 + $0x10] sm:$0xff] }
 0x337   :  { %v993_v33 = vpop.f32.mrf.mxu2  ;;  %v1041_v34 = vpop.f32.mrf.mxu3 }
 0x338   :  { %1080 = vmatmul.f32.gmra.mxu0 %v1041_v34  ;;  %1103 = vmatmul.f32.gmra.mxu1 %v993_v33  ;;  %v1341_v33 = vld [vmem:[#allocation4 + $0x118] sm:$0xff]  ;;  %v1215_v34 = vld [vmem:[#allocation4 + $0x8] sm:$0xff] }
 0x33f   :  { %v1133_v35 = vpop.f32.mrf.mxu2 }
 0x340   :  { %1172 = vmatmul.f32.vlgmr.msra.gmra.mxu3 %v1133_v35  ;;  %v1340_v35 = vld [vmem:[#allocation4 + $0x110] sm:$0xff] }
 0x347   :  { %v1136_v36 = vpop.f32.mrf.mxu2 }
 0x348   :  { %1175 = vmatmul.f32.gmra.mxu3 %v1136_v36  ;;  %v1214_v36 = vld [vmem:[#allocation4] sm:$0xff] }
 0x3ad   :  { %v1078_v37 = vpop.f32.mrf.mxu0  ;;  %v1101_v38 = vpop.f32.mrf.mxu1 }
 0x3ae   :  { %v1102_v49 = vadd.f32 %v1101_v38, %v1078_v37  ;;  %v1339_v37 = vld [vmem:[#allocation4 + $0x108] sm:$0xff]  ;;  %v1338_v38 = vld [vmem:[#allocation4 + $0x100] sm:$0xff] }
 0x3b5   :  { %v1081_v46 = vpop.f32.mrf.mxu0  ;;  %v1104_v47 = vpop.f32.mrf.mxu1 }
 0x3b6   :  { %v1105_v51 = vadd.f32 %v1104_v47, %v1081_v46  ;;  %v1544_v46 = vld [vmem:[#allocation6 + $0x170] sm:$0xff]  ;;  %v1418_v47 = vld [vmem:[#allocation6 + $0x60] sm:$0xff] }
 0x3c3   :  { %v1173_v43 = vpop.f32.mrf.mxu3 }
 0x3c4   :  { %v1179_v52 = vadd.f32 %v1173_v43, %v1102_v49  ;;  %v1420_v43 = vld [vmem:[#allocation6 + $0x70] sm:$0xff]  ;;  %v1417_v49 = vld [vmem:[#allocation6 + $0x58] sm:$0xff] }
 0x3c6   :  { %v1185_v59 = vadd.f32 %v3680_v53, %v1179_v52  ;;  %v1541_v52 = vld [vmem:[#allocation6 + $0x158] sm:$0xff] }
 0x3c8   :  { %v1187_v63 = vmax.f32 %v1185_v59, 0.0 }
 0x3cb   :  { %v1176_v54 = vpop.f32.mrf.mxu3 }
 0x3cc   :  { %v1180_v57 = vadd.f32 %v1176_v54, %v1105_v51  ;;  %v1416_v51 = vld [vmem:[#allocation6 + $0x50] sm:$0xff] }
 0x3cd   :  { %v1540_v54 = vld [vmem:[#allocation6 + $0x150] sm:$0xff] }
 0x3ce   :  { %v1186_v60 = vadd.f32 %v3680_v53, %v1180_v57  ;;  %v1415_v53 = vld [vmem:[#allocation6 + $0x48] sm:$0xff]  ;;  %v1414_v57 = vld [vmem:[#allocation6 + $0x40] sm:$0xff] }
 0x3d0   :  { %v1188_v61 = vmax.f32 %v1186_v60, 0.0 }
 0x3d2   :  { %1208 = vmatpush.msrb.mxu0 %v1188_v61  ;;  %1249 = vmatpush.msrb.mxu1 %v1188_v61 }
 0x3d4   :  { %1209 = vmatpush.msrb.mxu0 %v1187_v63  ;;  %1250 = vmatpush.msrb.mxu1 %v1187_v63 }
 0x3d5   :  { %3539 = vmatmul.msk.f32.vlgmr.msrb.gmra.mxu1 %vm1190_vm1, %v3538_v4  ;;  %3537 = vmatmul.msk.f32.vlgmr.msrb.gmra.mxu0 %vm1190_vm1, %v1189_v6 }
 0x3d6   :  { %1331 = vmatpush.msra.mxu1 %v1188_v61  ;;  %1292 = vmatpush.msra.mxu0 %v1229_v7  ;;  %v3681_v61 = vld [vmem:[%s4672_s9] ss:$0 sm:$0xff]  ;;  %v1412_v7 = vld [vmem:[#allocation6 + $0x30] sm:$0xff] }
 0x3d8   :  { %1332 = vmatpush.msra.mxu1 %v1187_v63  ;;  %1293 = vmatpush.msra.mxu0 %v1228_v9  ;;  %v1538_v63 = vld [vmem:[#allocation6 + $0x140] sm:$0xff] }
 0x3da   :  { %1354 = vmatpush.msrb.mxu1 %v1353_v10  ;;  %1294 = vmatpush.msra.mxu0 %v1227_v1  ;;  %v1411_v10 = vld [vmem:[#allocation6 + $0x28] sm:$0xff] }
 0x3dc   :  { %1355 = vmatpush.msrb.mxu1 %v1352_v2  ;;  %1295 = vmatpush.msra.mxu0 %v1226_v12  ;;  %v3543_v2 = vld [vmem:[%s4673_s13 + $0x8] sm:$0xff]  ;;  %v1463_v12 = vld [vmem:[#allocation6 + $0xf8] sm:$0xff] }
 0x3dd   :  { %3541 = vmatmul.msk.f32.vlgmr.msra.gmra.mxu1 %vm1190_vm1, %v3540_v13  ;;  %v1410_v13 = vld [vmem:[#allocation6 + $0x20] sm:$0xff] }
 0x3de   :  { %1356 = vmatpush.msrb.mxu1 %v1351_v15  ;;  %1296 = vmatpush.msra.mxu0 %v1225_v16  ;;  %v1462_v15 = vld [vmem:[#allocation6 + $0xf0] sm:$0xff]  ;;  %v1461_v16 = vld [vmem:[#allocation6 + $0xe8] sm:$0xff] }
 0x3e0   :  { %1357 = vmatpush.msrb.mxu1 %v1350_v17  ;;  %1297 = vmatpush.msra.mxu0 %v1224_v18  ;;  %v1460_v17 = vld [vmem:[#allocation6 + $0xe0] sm:$0xff]  ;;  %v3545_v18 = vld [vmem:[%s4673_s13 + $0x10] sm:$0xff] }
 0x3e2   :  { %1358 = vmatpush.msrb.mxu1 %v1349_v19  ;;  %1298 = vmatpush.msra.mxu0 %v1223_v20  ;;  %v1459_v19 = vld [vmem:[#allocation6 + $0xd8] sm:$0xff]  ;;  %v1458_v20 = vld [vmem:[#allocation6 + $0xd0] sm:$0xff] }
 0x3e4   :  { %1359 = vmatpush.msrb.mxu1 %v1348_v22  ;;  %1299 = vmatpush.msra.mxu0 %v1222_v23  ;;  %v1457_v22 = vld [vmem:[#allocation6 + $0xc8] sm:$0xff]  ;;  %v1456_v23 = vld [vmem:[#allocation6 + $0xc0] sm:$0xff] }
 0x3e6   :  { %1360 = vmatpush.msrb.mxu1 %v1347_v11  ;;  %1300 = vmatpush.msra.mxu0 %v1221_v24  ;;  %v1455_v11 = vld [vmem:[#allocation6 + $0xb8] sm:$0xff]  ;;  %v1454_v24 = vld [vmem:[#allocation6 + $0xb0] sm:$0xff] }
 0x3e8   :  { %1361 = vmatpush.msrb.mxu1 %v1346_v5  ;;  %1301 = vmatpush.msra.mxu0 %v1220_v25  ;;  %v1453_v5 = vld [vmem:[#allocation6 + $0xa8] sm:$0xff]  ;;  %v1452_v25 = vld [vmem:[#allocation6 + $0xa0] sm:$0xff] }
 0x3ea   :  { %1362 = vmatpush.msrb.mxu1 %v1345_v26  ;;  %1302 = vmatpush.msra.mxu0 %v1219_v27  ;;  %v1451_v26 = vld [vmem:[#allocation6 + $0x98] sm:$0xff]  ;;  %v1450_v27 = vld [vmem:[#allocation6 + $0x90] sm:$0xff] }
 0x3ec   :  { %1363 = vmatpush.msrb.mxu1 %v1344_v56  ;;  %1303 = vmatpush.msra.mxu0 %v1218_v28  ;;  %v1449_v56 = vld [vmem:[#allocation6 + $0x88] sm:$0xff]  ;;  %v1448_v28 = vld [vmem:[#allocation6 + $0x80] sm:$0xff] }
 0x3ee   :  { %1364 = vmatpush.msrb.mxu1 %v1343_v21  ;;  %1304 = vmatpush.msra.mxu0 %v1217_v30  ;;  %v1409_v21 = vld [vmem:[#allocation6 + $0x18] sm:$0xff]  ;;  %v1408_v30 = vld [vmem:[#allocation6 + $0x10] sm:$0xff] }
 0x3f0   :  { %1365 = vmatpush.msrb.mxu1 %v1342_v31  ;;  %1305 = vmatpush.msra.mxu0 %v1216_v32  ;;  %v1533_v31 = vld [vmem:[#allocation6 + $0x118] sm:$0xff]  ;;  %v1407_v32 = vld [vmem:[#allocation6 + $0x8] sm:$0xff] }
 0x3f2   :  { %1366 = vmatpush.msrb.mxu1 %v1341_v33  ;;  %1306 = vmatpush.msra.mxu0 %v1215_v34  ;;  %v1532_v33 = vld [vmem:[#allocation6 + $0x110] sm:$0xff]  ;;  %v1406_v34 = vld [vmem:[#allocation6] sm:$0xff] }
 0x3f4   :  { %1367 = vmatpush.msrb.mxu1 %v1340_v35  ;;  %1307 = vmatpush.msra.mxu0 %v1214_v36  ;;  %v1531_v35 = vld [vmem:[#allocation6 + $0x108] sm:$0xff]  ;;  %v1530_v36 = vld [vmem:[#allocation6 + $0x100] sm:$0xff] }
 0x3f6   :  { %1368 = vmatpush.msrb.mxu1 %v1339_v37  ;;  %1484 = vmatpush.msrb.mxu0 %v1421_v42  ;;  %v1610_v42 = vld [vmem:[#allocation7 + $0x68] sm:$0xff] }
 0x3f8   :  { %1369 = vmatpush.msrb.mxu1 %v1338_v38  ;;  %1485 = vmatpush.msrb.mxu0 %v1420_v43  ;;  %v1609_v43 = vld [vmem:[#allocation7 + $0x60] sm:$0xff] }
 0x3fa   :  { %1546 = vmatpush.msra.mxu1 %v1545_v44  ;;  %1486 = vmatpush.msrb.mxu0 %v1419_v45  ;;  %v1608_v44 = vld [vmem:[#allocation7 + $0x58] sm:$0xff]  ;;  %v1607_v45 = vld [vmem:[#allocation7 + $0x50] sm:$0xff] }
 0x3fc   :  { %1547 = vmatpush.msra.mxu1 %v1544_v46  ;;  %1487 = vmatpush.msrb.mxu0 %v1418_v47  ;;  %v1606_v46 = vld [vmem:[#allocation7 + $0x48] sm:$0xff] }
 0x3fe   :  { %1548 = vmatpush.msra.mxu1 %v1543_v48  ;;  %1488 = vmatpush.msrb.mxu0 %v1417_v49  ;;  %v1605_v48 = vld [vmem:[#allocation7 + $0x40] sm:$0xff] }
 0x400   :  { %1549 = vmatpush.msra.mxu1 %v1542_v50  ;;  %1489 = vmatpush.msrb.mxu0 %v1416_v51  ;;  %v1604_v50 = vld [vmem:[#allocation7 + $0x38] sm:$0xff] }
 0x402   :  { %1550 = vmatpush.msra.mxu1 %v1541_v52  ;;  %1490 = vmatpush.msrb.mxu0 %v1415_v53  ;;  %v3682_v52 = vld [vmem:[%s4674_s17] ss:$0 sm:$0xff] }
 0x404   :  { %1551 = vmatpush.msra.mxu1 %v1540_v54  ;;  %1491 = vmatpush.msrb.mxu0 %v1414_v57  ;;  %v1603_v54 = vld [vmem:[#allocation7 + $0x30] sm:$0xff]  ;;  %v1602_v57 = vld [vmem:[#allocation7 + $0x28] sm:$0xff] }
 0x406   :  { %1552 = vmatpush.msra.mxu1 %v1539_v58  ;;  %1492 = vmatpush.msrb.mxu0 %v1413_v62  ;;  %v1736_v62 = vld [vmem:[#allocation7 + $0x178] sm:$0xff] }
 0x408   :  { %1553 = vmatpush.msra.mxu1 %v1538_v63  ;;  %1493 = vmatpush.msrb.mxu0 %v1412_v7  ;;  %v1654_v63 = vld [vmem:[#allocation7 + $0xf8] sm:$0xff]  ;;  %v1653_v7 = vld [vmem:[#allocation7 + $0xf0] sm:$0xff] }
 0x40a   :  { %1554 = vmatpush.msra.mxu1 %v1537_v8  ;;  %1494 = vmatpush.msrb.mxu0 %v1411_v10  ;;  %v1600_v8 = vld [vmem:[#allocation7 + $0x18] sm:$0xff]  ;;  %v1652_v10 = vld [vmem:[#allocation7 + $0xe8] sm:$0xff] }
 0x40c   :  { %1555 = vmatpush.msra.mxu1 %v1536_v0  ;;  %1495 = vmatpush.msrb.mxu0 %v1410_v13  ;;  %v1599_v0 = vld [vmem:[#allocation7 + $0x10] sm:$0xff]  ;;  %v1651_v13 = vld [vmem:[#allocation7 + $0xe0] sm:$0xff] }
 0x40e   :  { %1556 = vmatpush.msra.mxu1 %v1535_v14  ;;  %1496 = vmatpush.msrb.mxu0 %v1409_v21  ;;  %v1732_v14 = vld [vmem:[#allocation7 + $0x158] sm:$0xff]  ;;  %v1640_v21 = vld [vmem:[#allocation7 + $0x88] sm:$0xff] }
 0x410   :  { %1557 = vmatpush.msra.mxu1 %v1534_v29  ;;  %1497 = vmatpush.msrb.mxu0 %v1408_v30  ;;  %v1726_v29 = vld [vmem:[#allocation7 + $0x128] sm:$0xff]  ;;  %v1639_v30 = vld [vmem:[#allocation7 + $0x80] sm:$0xff] }
 0x412   :  { %1558 = vmatpush.msra.mxu1 %v1533_v31  ;;  %1498 = vmatpush.msrb.mxu0 %v1407_v32  ;;  %v1725_v31 = vld [vmem:[#allocation7 + $0x120] sm:$0xff]  ;;  %v1724_v32 = vld [vmem:[#allocation7 + $0x118] sm:$0xff] }
 0x414   :  { %1559 = vmatpush.msra.mxu1 %v1532_v33  ;;  %1499 = vmatpush.msrb.mxu0 %v1406_v34  ;;  %v1723_v33 = vld [vmem:[#allocation7 + $0x110] sm:$0xff]  ;;  %v1722_v34 = vld [vmem:[#allocation7 + $0x108] sm:$0xff] }
 0x416   :  { %1560 = vmatpush.msra.mxu1 %v1531_v35  ;;  %v1721_v35 = vld [vmem:[#allocation7 + $0x100] sm:$0xff] }
 0x418   :  { %1561 = vmatpush.msra.mxu1 %v1530_v36 }
 0x452   :  { %v1252_v39 = vpop.f32.mrf.mxu1  ;;  %v1211_v40 = vpop.f32.mrf.mxu0 }
 0x453   :  { %1288 = vmatmul.f32.vlgmr.msrb.gmra.mxu2 %v1252_v39  ;;  %1308 = vmatmul.f32.vlgmr.msra.gmra.mxu0 %v1211_v40  ;;  %v1612_v40 = vld [vmem:[#allocation7 + $0x78] sm:$0xff] }
 0x45a   :  { %v1334_v41 = vpop.f32.mrf.mxu1 }
 0x45b   :  { %1370 = vmatmul.f32.vlgmr.msrb.gmra.mxu1 %v1334_v41  ;;  %v1611_v41 = vld [vmem:[#allocation7 + $0x70] sm:$0xff] }
 0x4d0   :  { %v1309_v55 = vpop.f32.mrf.mxu0 }
 0x4d6   :  { %v1289_v59 = vpop.f32.mrf.mxu2 }
 0x4d7   :  { %v1310_v60 = vadd.f32 %v1309_v55, %v1289_v59 }
 0x4d8   :  { %v1371_v4 = vpop.f32.mrf.mxu1 }
 0x4d9   :  { %v1374_v6 = vadd.f32 %v1371_v4, %v1310_v60  ;;  %v1573_v60 = vld [vmem:[%s4675_s21] sm:$0xff] }
 0x4da   :  { %v1601_v4 = vld [vmem:[#allocation7 + $0x20] sm:$0xff] }
 0x4db   :  { %v1379_v9 = vadd.f32 %v3681_v61, %v1374_v6  ;;  %v3550_v61 = vld [vmem:[%s4675_s21 + $0x10] sm:$0xff] }
 0x4dc   :  { %v1735_v6 = vld [vmem:[#allocation7 + $0x170] sm:$0xff] }
 0x4dd   :  { %v4490_v1 = vmax.f32 %v1379_v9, 0.0  ;;  %v1734_v9 = vld [vmem:[#allocation7 + $0x168] sm:$0xff] }
 0x4df   :  { %1401 = vmatpush.msrb.mxu3 %v4490_v1  ;;  %1442 = vmatpush.msra.mxu2 %v4490_v1 }
 0x4e0   :  { %3544 = vmatmul.msk.f32.vlgmr.msra.gmra.mxu2 %vm1382_vm2, %v3543_v2  ;;  %3542 = vmatmul.msk.f32.vlgmr.msrb.gmra.mxu3 %vm1382_vm2, %v1381_v3  ;;  %v1733_v2 = vld [vmem:[#allocation7 + $0x160] sm:$0xff]  ;;  %v3548_v3 = vld [vmem:[%s4675_s21 + $0x8] sm:$0xff] }
 0x4e1   :  { %1524 = vmatpush.msrb.mxu2 %v4490_v1  ;;  %1464 = vmatpush.msra.mxu3 %v1463_v12  ;;  %v1598_v12 = vld [vmem:[#allocation7 + $0x8] sm:$0xff] }
 0x4e3   :  { %1465 = vmatpush.msra.mxu3 %v1462_v15  ;;  %v1650_v15 = vld [vmem:[#allocation7 + $0xd8] sm:$0xff] }
 0x4e5   :  { %1466 = vmatpush.msra.mxu3 %v1461_v16  ;;  %v1731_v16 = vld [vmem:[#allocation7 + $0x150] sm:$0xff] }
 0x4e7   :  { %1467 = vmatpush.msra.mxu3 %v1460_v17  ;;  %v1649_v17 = vld [vmem:[#allocation7 + $0xd0] sm:$0xff] }
 0x4e8   :  { %3546 = vmatmul.msk.f32.vlgmr.msrb.gmra.mxu2 %vm1382_vm2, %v3545_v18  ;;  %v1730_v18 = vld [vmem:[#allocation7 + $0x148] sm:$0xff] }
 0x4e9   :  { %1468 = vmatpush.msra.mxu3 %v1459_v19  ;;  %v1648_v19 = vld [vmem:[#allocation7 + $0xc8] sm:$0xff] }
 0x4eb   :  { %1469 = vmatpush.msra.mxu3 %v1458_v20  ;;  %v1647_v20 = vld [vmem:[#allocation7 + $0xc0] sm:$0xff] }
 0x4ed   :  { %1470 = vmatpush.msra.mxu3 %v1457_v22  ;;  %v1646_v22 = vld [vmem:[#allocation7 + $0xb8] sm:$0xff] }
 0x4ef   :  { %1471 = vmatpush.msra.mxu3 %v1456_v23  ;;  %v1645_v23 = vld [vmem:[#allocation7 + $0xb0] sm:$0xff] }
 0x4f1   :  { %1472 = vmatpush.msra.mxu3 %v1455_v11  ;;  %v1644_v11 = vld [vmem:[#allocation7 + $0xa8] sm:$0xff] }
 0x4f3   :  { %1473 = vmatpush.msra.mxu3 %v1454_v24  ;;  %v1643_v24 = vld [vmem:[#allocation7 + $0xa0] sm:$0xff] }
 0x4f5   :  { %1474 = vmatpush.msra.mxu3 %v1453_v5  ;;  %v1597_v5 = vld [vmem:[#allocation7] sm:$0xff] }
 0x4f7   :  { %1475 = vmatpush.msra.mxu3 %v1452_v25  ;;  %v1729_v25 = vld [vmem:[#allocation7 + $0x140] sm:$0xff] }
 0x4f9   :  { %1476 = vmatpush.msra.mxu3 %v1451_v26  ;;  %v1642_v26 = vld [vmem:[#allocation7 + $0x98] sm:$0xff] }
 0x4fb   :  { %1477 = vmatpush.msra.mxu3 %v1450_v27  ;;  %v1728_v27 = vld [vmem:[#allocation7 + $0x138] sm:$0xff] }
 0x4fd   :  { %1478 = vmatpush.msra.mxu3 %v1449_v56  ;;  %v1641_v56 = vld [vmem:[#allocation7 + $0x90] sm:$0xff] }
 0x4ff   :  { %1479 = vmatpush.msra.mxu3 %v1448_v28  ;;  %v1727_v28 = vld [vmem:[#allocation7 + $0x130] sm:$0xff] }
 0x501   :  { %1675 = vmatpush.msrb.mxu3 %v1612_v40  ;;  %v1802_v40 = vld [vmem:[#allocation9 + $0x70] sm:$0xff] }
 0x503   :  { %1676 = vmatpush.msrb.mxu3 %v1611_v41  ;;  %v1801_v41 = vld [vmem:[#allocation9 + $0x68] sm:$0xff] }
 0x505   :  { %1677 = vmatpush.msrb.mxu3 %v1610_v42  ;;  %v1800_v42 = vld [vmem:[#allocation9 + $0x60] sm:$0xff] }
 0x507   :  { %1678 = vmatpush.msrb.mxu3 %v1609_v43  ;;  %v1799_v43 = vld [vmem:[#allocation9 + $0x58] sm:$0xff] }
 0x509   :  { %1679 = vmatpush.msrb.mxu3 %v1608_v44  ;;  %v1798_v44 = vld [vmem:[#allocation9 + $0x50] sm:$0xff] }
 0x50b   :  { %1680 = vmatpush.msrb.mxu3 %v1607_v45  ;;  %v1797_v45 = vld [vmem:[#allocation9 + $0x48] sm:$0xff] }
 0x50d   :  { %1681 = vmatpush.msrb.mxu3 %v1606_v46  ;;  %v1796_v46 = vld [vmem:[#allocation9 + $0x40] sm:$0xff] }
 0x50f   :  { %1682 = vmatpush.msrb.mxu3 %v1605_v48 }
 0x511   :  { %1683 = vmatpush.msrb.mxu3 %v1604_v50  ;;  %v1795_v50 = vld [vmem:[#allocation9 + $0x38] sm:$0xff] }
 0x513   :  { %1684 = vmatpush.msrb.mxu3 %v1603_v54 }
 0x515   :  { %1685 = vmatpush.msrb.mxu3 %v1602_v57 }
 0x517   :  { %1686 = vmatpush.msrb.mxu3 %v1601_v4  ;;  %v1926_v4 = vld [vmem:[#allocation9 + $0x170] sm:$0xff] }
 0x519   :  { %1687 = vmatpush.msrb.mxu3 %v1600_v8  ;;  %v1843_v8 = vld [vmem:[#allocation9 + $0xe8] sm:$0xff] }
 0x51b   :  { %1688 = vmatpush.msrb.mxu3 %v1599_v0  ;;  %v3553_v0 = vld [vmem:[%s4677_s30 + $0x8] sm:$0xff] }
 0x51d   :  { %1689 = vmatpush.msrb.mxu3 %v1598_v12  ;;  %v1841_v12 = vld [vmem:[#allocation9 + $0xd8] sm:$0xff] }
 0x51f   :  { %1690 = vmatpush.msrb.mxu3 %v1597_v5  ;;  %v1916_v5 = vld [vmem:[#allocation9 + $0x120] sm:$0xff] }
 0x563   :  { %v1444_v37 = vpop.f32.mrf.mxu2  ;;  %v1403_v38 = vpop.f32.mrf.mxu3 }
 0x564   :  { %1480 = vmatmul.f32.vlgmr.msra.gmra.mxu3 %v1444_v37  ;;  %1500 = vmatmul.f32.vlgmr.msrb.gmra.mxu0 %v1403_v38 }
 0x56b   :  { %v1526_v39 = vpop.f32.mrf.mxu2 }
 0x56c   :  { %1562 = vmatmul.f32.vlgmr.msra.gmra.mxu1 %v1526_v39  ;;  %v1803_v39 = vld [vmem:[#allocation9 + $0x78] sm:$0xff] }
 0x5e1   :  { %v1501_v47 = vpop.f32.mrf.mxu0 }
 0x5e7   :  { %v1481_v49 = vpop.f32.mrf.mxu3 }
 0x5e8   :  { %v1502_v51 = vadd.f32 %v1501_v47, %v1481_v49 }
 0x5e9   :  { %v1563_v53 = vpop.f32.mrf.mxu1 }
 0x5ea   :  { %v1566_v55 = vadd.f32 %v1563_v53, %v1502_v51  ;;  %v1794_v53 = vld [vmem:[#allocation9 + $0x30] sm:$0xff] }
 0x5ec   :  { %v1571_v58 = vadd.f32 %v3682_v52, %v1566_v55  ;;  %v3683_v52 = vld [vmem:[%s4676_s29] ss:$0 sm:$0xff]  ;;  %v1793_v55 = vld [vmem:[#allocation9 + $0x28] sm:$0xff] }
 0x5ee   :  { %v1572_v59 = vmax.f32 %v1571_v58, 0.0 }
 0x5f0   :  { %1592 = vmatpush.msra.mxu2 %v1572_v59  ;;  %1715 = vmatpush.msra.mxu0 %v1572_v59 }
 0x5f1   :  { %3547 = vmatmul.msk.f32.vlgmr.msra.gmra.mxu2 %vm1382_vm2, %v1573_v60  ;;  %3551 = vmatmul.msk.f32.vlgmr.msra.gmra.mxu0 %vm1382_vm2, %v3550_v61  ;;  %v3555_v60 = vld [vmem:[%s4677_s30 + $0x10] sm:$0xff]  ;;  %v1927_v61 = vld [vmem:[#allocation9 + $0x178] sm:$0xff] }
 0x5f2   :  { %1633 = vmatpush.msrb.mxu2 %v1572_v59  ;;  %1737 = vmatpush.msrb.mxu0 %v1736_v62  ;;  %v1764_v59 = vld [vmem:[%s4677_s30] sm:$0xff]  ;;  %v1845_v62 = vld [vmem:[#allocation9 + $0xf8] sm:$0xff] }
 0x5f4   :  { %1655 = vmatpush.msra.mxu2 %v1654_v63  ;;  %1738 = vmatpush.msrb.mxu0 %v1735_v6  ;;  %v1792_v63 = vld [vmem:[#allocation9 + $0x20] sm:$0xff]  ;;  %v1791_v6 = vld [vmem:[#allocation9 + $0x18] sm:$0xff] }
 0x5f6   :  { %1656 = vmatpush.msra.mxu2 %v1653_v7  ;;  %1739 = vmatpush.msrb.mxu0 %v1734_v9  ;;  %v1925_v7 = vld [vmem:[#allocation9 + $0x168] sm:$0xff]  ;;  %v1790_v9 = vld [vmem:[#allocation9 + $0x10] sm:$0xff] }
 0x5f8   :  { %1657 = vmatpush.msra.mxu2 %v1652_v10  ;;  %1740 = vmatpush.msrb.mxu0 %v1733_v2  ;;  %v1924_v10 = vld [vmem:[#allocation9 + $0x160] sm:$0xff] }
 0x5f9   :  { %3549 = vmatmul.msk.f32.vlgmr.msrb.gmra.mxu2 %vm1382_vm2, %v3548_v3  ;;  %v1842_v2 = vld [vmem:[#allocation9 + $0xe0] sm:$0xff]  ;;  %v1923_v3 = vld [vmem:[#allocation9 + $0x158] sm:$0xff] }
 0x5fa   :  { %1658 = vmatpush.msra.mxu2 %v1651_v13  ;;  %1741 = vmatpush.msrb.mxu0 %v1732_v14  ;;  %v1922_v13 = vld [vmem:[#allocation9 + $0x150] sm:$0xff] }
 0x5fb   :  { %v1840_v14 = vld [vmem:[#allocation9 + $0xd0] sm:$0xff] }
 0x5fc   :  { %1659 = vmatpush.msra.mxu2 %v1650_v15  ;;  %1742 = vmatpush.msrb.mxu0 %v1731_v16  ;;  %v1921_v15 = vld [vmem:[#allocation9 + $0x148] sm:$0xff] }
 0x5fd   :  { %v1839_v16 = vld [vmem:[#allocation9 + $0xc8] sm:$0xff] }
 0x5fe   :  { %1660 = vmatpush.msra.mxu2 %v1649_v17  ;;  %1743 = vmatpush.msrb.mxu0 %v1730_v18  ;;  %v1920_v17 = vld [vmem:[#allocation9 + $0x140] sm:$0xff] }
 0x5ff   :  { %v1838_v18 = vld [vmem:[#allocation9 + $0xc0] sm:$0xff] }
 0x600   :  { %1661 = vmatpush.msra.mxu2 %v1648_v19  ;;  %1744 = vmatpush.msrb.mxu0 %v1729_v25  ;;  %v1919_v19 = vld [vmem:[#allocation9 + $0x138] sm:$0xff]  ;;  %v1834_v25 = vld [vmem:[#allocation9 + $0xa0] sm:$0xff] }
 0x602   :  { %1662 = vmatpush.msra.mxu2 %v1647_v20  ;;  %1745 = vmatpush.msrb.mxu0 %v1728_v27  ;;  %v1837_v20 = vld [vmem:[#allocation9 + $0xb8] sm:$0xff] }
 0x603   :  { %v1915_v27 = vld [vmem:[#allocation9 + $0x118] sm:$0xff] }
 0x604   :  { %1663 = vmatpush.msra.mxu2 %v1646_v22  ;;  %1746 = vmatpush.msrb.mxu0 %v1727_v28  ;;  %v1918_v22 = vld [vmem:[#allocation9 + $0x130] sm:$0xff]  ;;  %v1788_v28 = vld [vmem:[#allocation9] sm:$0xff] }
 0x606   :  { %1664 = vmatpush.msra.mxu2 %v1645_v23  ;;  %1747 = vmatpush.msrb.mxu0 %v1726_v29  ;;  %v1836_v23 = vld [vmem:[#allocation9 + $0xb0] sm:$0xff] }
 0x607   :  { %v1832_v29 = vld [vmem:[#allocation9 + $0x90] sm:$0xff] }
 0x608   :  { %1665 = vmatpush.msra.mxu2 %v1644_v11  ;;  %1748 = vmatpush.msrb.mxu0 %v1725_v31  ;;  %v1917_v11 = vld [vmem:[#allocation9 + $0x128] sm:$0xff] }
 0x609   :  { %v1831_v31 = vld [vmem:[#allocation9 + $0x88] sm:$0xff] }
 0x60a   :  { %1666 = vmatpush.msra.mxu2 %v1643_v24  ;;  %1749 = vmatpush.msrb.mxu0 %v1724_v32  ;;  %v1835_v24 = vld [vmem:[#allocation9 + $0xa8] sm:$0xff]  ;;  %v1912_v32 = vld [vmem:[#allocation9 + $0x100] sm:$0xff] }
 0x60c   :  { %1667 = vmatpush.msra.mxu2 %v1642_v26  ;;  %1750 = vmatpush.msrb.mxu0 %v1723_v33  ;;  %v1789_v26 = vld [vmem:[#allocation9 + $0x8] sm:$0xff]  ;;  %v1830_v33 = vld [vmem:[#allocation9 + $0x80] sm:$0xff] }
 0x60e   :  { %1668 = vmatpush.msra.mxu2 %v1641_v56  ;;  %1751 = vmatpush.msrb.mxu0 %v1722_v34  ;;  %v1833_v56 = vld [vmem:[#allocation9 + $0x98] sm:$0xff] }
 0x610   :  { %1669 = vmatpush.msra.mxu2 %v1640_v21  ;;  %1752 = vmatpush.msrb.mxu0 %v1721_v35  ;;  %v1914_v21 = vld [vmem:[#allocation9 + $0x110] sm:$0xff] }
 0x612   :  { %1670 = vmatpush.msra.mxu2 %v1639_v30  ;;  %v1913_v30 = vld [vmem:[#allocation9 + $0x108] sm:$0xff] }
 0x614   :  { %1866 = vmatpush.msrb.mxu2 %v1803_v39  ;;  %v1992_v39 = vld [vmem:[#allocation10 + $0x68] sm:$0xff] }
 0x616   :  { %1867 = vmatpush.msrb.mxu2 %v1802_v40  ;;  %v1991_v40 = vld [vmem:[#allocation10 + $0x60] sm:$0xff] }
 0x618   :  { %1868 = vmatpush.msrb.mxu2 %v1801_v41  ;;  %v1990_v41 = vld [vmem:[#allocation10 + $0x58] sm:$0xff] }
 0x61a   :  { %1869 = vmatpush.msrb.mxu2 %v1800_v42  ;;  %v1989_v42 = vld [vmem:[#allocation10 + $0x50] sm:$0xff] }
 0x61c   :  { %1870 = vmatpush.msrb.mxu2 %v1799_v43  ;;  %v1988_v43 = vld [vmem:[#allocation10 + $0x48] sm:$0xff] }
 0x61e   :  { %1871 = vmatpush.msrb.mxu2 %v1798_v44 }
 0x620   :  { %1872 = vmatpush.msrb.mxu2 %v1797_v45 }
 0x622   :  { %1873 = vmatpush.msrb.mxu2 %v1796_v46  ;;  %v1987_v46 = vld [vmem:[#allocation10 + $0x40] sm:$0xff] }
 0x624   :  { %1874 = vmatpush.msrb.mxu2 %v1795_v50 }
 0x626   :  { %1875 = vmatpush.msrb.mxu2 %v1794_v53  ;;  %v1984_v53 = vld [vmem:[#allocation10 + $0x28] sm:$0xff] }
 0x628   :  { %1876 = vmatpush.msrb.mxu2 %v1793_v55 }
 0x62a   :  { %1877 = vmatpush.msrb.mxu2 %v1792_v63  ;;  %v2117_v63 = vld [vmem:[#allocation10 + $0x170] sm:$0xff] }
 0x62c   :  { %1878 = vmatpush.msrb.mxu2 %v1791_v6  ;;  %v2116_v6 = vld [vmem:[#allocation10 + $0x168] sm:$0xff] }
 0x62e   :  { %1879 = vmatpush.msrb.mxu2 %v1790_v9  ;;  %v2115_v9 = vld [vmem:[#allocation10 + $0x160] sm:$0xff] }
 0x630   :  { %1880 = vmatpush.msrb.mxu2 %v1789_v26  ;;  %v2106_v26 = vld [vmem:[#allocation10 + $0x118] sm:$0xff] }
 0x632   :  { %1881 = vmatpush.msrb.mxu2 %v1788_v28  ;;  %v2105_v28 = vld [vmem:[#allocation10 + $0x110] sm:$0xff] }
 0x66e   :  { %v1717_v36 = vpop.f32.mrf.mxu0 }
 0x66f   :  { %1753 = vmatmul.f32.vlgmr.msrb.gmra.mxu0 %v1717_v36 }
 0x674   :  { %v1594_v37 = vpop.f32.mrf.mxu2 }
 0x675   :  { %1691 = vmatmul.f32.vlgmr.msrb.gmra.mxu3 %v1594_v37  ;;  %v1994_v37 = vld [vmem:[#allocation10 + $0x78] sm:$0xff] }
 0x67c   :  { %v1635_v38 = vpop.f32.mrf.mxu2 }
 0x67d   :  { %1671 = vmatmul.f32.vlgmr.msra.gmra.mxu2 %v1635_v38  ;;  %v1993_v38 = vld [vmem:[#allocation10 + $0x70] sm:$0xff] }
 0x6ec   :  { %v1754_v47 = vpop.f32.mrf.mxu0 }
 0x6f8   :  { %v1692_v48 = vpop.f32.mrf.mxu3 }
 0x700   :  { %v1672_v49 = vpop.f32.mrf.mxu2 }
 0x701   :  { %v1693_v51 = vadd.f32 %v1692_v48, %v1672_v49  ;;  %v3684_v49 = vld [vmem:[%s4678_s7] ss:$0 sm:$0xff] }
 0x703   :  { %v1757_v54 = vadd.f32 %v1754_v47, %v1693_v51  ;;  %v1986_v47 = vld [vmem:[#allocation10 + $0x38] sm:$0xff]  ;;  %v1985_v51 = vld [vmem:[#allocation10 + $0x30] sm:$0xff] }
 0x705   :  { %v1762_v57 = vadd.f32 %v3683_v52, %v1757_v54 }
 0x707   :  { %v4510_v58 = vadd.f32 %v1762_v57, %v4490_v1  ;;  %v1844_v1 = vld [vmem:[#allocation9 + $0xf0] sm:$0xff]  ;;  %v1955_v57 = vld [vmem:[%s4679_s10] sm:$0xff] }
 0x709   :  { %1783 = vmatpush.msrb.mxu1 %v4510_v58  ;;  %1906 = vmatpush.msra.mxu3 %v4510_v58 }
 0x70a   :  { %3552 = vmatmul.msk.f32.vlgmr.msrb.gmra.mxu1 %vm1382_vm2, %v1764_v59  ;;  %3556 = vmatmul.msk.f32.vlgmr.msra.gmra.mxu3 %vm1382_vm2, %v3555_v60  ;;  %v3560_v59 = vld [vmem:[%s4679_s10 + $0x10] sm:$0xff]  ;;  %v2118_v60 = vld [vmem:[#allocation10 + $0x178] sm:$0xff] }
 0x70b   :  { %1824 = vmatpush.msra.mxu1 %v4510_v58  ;;  %1928 = vmatpush.msrb.mxu3 %v1927_v61  ;;  %v2036_v61 = vld [vmem:[#allocation10 + $0xf8] sm:$0xff] }
 0x70d   :  { %1846 = vmatpush.msrb.mxu1 %v1845_v62  ;;  %1929 = vmatpush.msrb.mxu3 %v1926_v4  ;;  %v1983_v62 = vld [vmem:[#allocation10 + $0x20] sm:$0xff]  ;;  %v2035_v4 = vld [vmem:[#allocation10 + $0xf0] sm:$0xff] }
 0x70f   :  { %1847 = vmatpush.msrb.mxu1 %v1844_v1  ;;  %1930 = vmatpush.msrb.mxu3 %v1925_v7  ;;  %v1982_v1 = vld [vmem:[#allocation10 + $0x18] sm:$0xff]  ;;  %v2034_v7 = vld [vmem:[#allocation10 + $0xe8] sm:$0xff] }
 0x711   :  { %1848 = vmatpush.msrb.mxu1 %v1843_v8  ;;  %1931 = vmatpush.msrb.mxu3 %v1924_v10  ;;  %v1981_v8 = vld [vmem:[#allocation10 + $0x10] sm:$0xff]  ;;  %v3558_v10 = vld [vmem:[%s4679_s10 + $0x8] sm:$0xff] }
 0x712   :  { %3554 = vmatmul.msk.f32.vlgmr.msra.gmra.mxu1 %vm1382_vm2, %v3553_v0  ;;  %v2033_v0 = vld [vmem:[#allocation10 + $0xe0] sm:$0xff] }
 0x713   :  { %1849 = vmatpush.msrb.mxu1 %v1842_v2  ;;  %1932 = vmatpush.msrb.mxu3 %v1923_v3  ;;  %v2114_v2 = vld [vmem:[#allocation10 + $0x158] sm:$0xff] }
 0x714   :  { %v2032_v3 = vld [vmem:[#allocation10 + $0xd8] sm:$0xff] }
 0x715   :  { %1850 = vmatpush.msrb.mxu1 %v1841_v12  ;;  %1933 = vmatpush.msrb.mxu3 %v1922_v13  ;;  %v2113_v12 = vld [vmem:[#allocation10 + $0x150] sm:$0xff] }
 0x716   :  { %v2031_v13 = vld [vmem:[#allocation10 + $0xd0] sm:$0xff] }
 0x717   :  { %1851 = vmatpush.msrb.mxu1 %v1840_v14  ;;  %1934 = vmatpush.msrb.mxu3 %v1921_v15  ;;  %v2112_v14 = vld [vmem:[#allocation10 + $0x148] sm:$0xff] }
 0x718   :  { %v2030_v15 = vld [vmem:[#allocation10 + $0xc8] sm:$0xff] }
 0x719   :  { %1852 = vmatpush.msrb.mxu1 %v1839_v16  ;;  %1935 = vmatpush.msrb.mxu3 %v1920_v17  ;;  %v2111_v16 = vld [vmem:[#allocation10 + $0x140] sm:$0xff] }
 0x71a   :  { %v2029_v17 = vld [vmem:[#allocation10 + $0xc0] sm:$0xff] }
 0x71b   :  { %1853 = vmatpush.msrb.mxu1 %v1838_v18  ;;  %1936 = vmatpush.msrb.mxu3 %v1919_v19  ;;  %v2110_v18 = vld [vmem:[#allocation10 + $0x138] sm:$0xff] }
 0x71c   :  { %v2028_v19 = vld [vmem:[#allocation10 + $0xb8] sm:$0xff] }
 0x71d   :  { %1854 = vmatpush.msrb.mxu1 %v1837_v20  ;;  %1937 = vmatpush.msrb.mxu3 %v1918_v22  ;;  %v2109_v20 = vld [vmem:[#allocation10 + $0x130] sm:$0xff] }
 0x71e   :  { %v2027_v22 = vld [vmem:[#allocation10 + $0xb0] sm:$0xff] }
 0x71f   :  { %1855 = vmatpush.msrb.mxu1 %v1836_v23  ;;  %1938 = vmatpush.msrb.mxu3 %v1917_v11  ;;  %v2108_v23 = vld [vmem:[#allocation10 + $0x128] sm:$0xff] }
 0x720   :  { %v2026_v11 = vld [vmem:[#allocation10 + $0xa8] sm:$0xff] }
 0x721   :  { %1856 = vmatpush.msrb.mxu1 %v1835_v24  ;;  %1939 = vmatpush.msrb.mxu3 %v1916_v5  ;;  %v2107_v24 = vld [vmem:[#allocation10 + $0x120] sm:$0xff] }
 0x722   :  { %v2025_v5 = vld [vmem:[#allocation10 + $0xa0] sm:$0xff] }
 0x723   :  { %1857 = vmatpush.msrb.mxu1 %v1834_v25  ;;  %1940 = vmatpush.msrb.mxu3 %v1915_v27  ;;  %v1980_v25 = vld [vmem:[#allocation10 + $0x8] sm:$0xff]  ;;  %v2024_v27 = vld [vmem:[#allocation10 + $0x98] sm:$0xff] }
 0x725   :  { %1858 = vmatpush.msrb.mxu1 %v1833_v56  ;;  %1941 = vmatpush.msrb.mxu3 %v1914_v21  ;;  %v1979_v56 = vld [vmem:[#allocation10] sm:$0xff]  ;;  %v2023_v21 = vld [vmem:[#allocation10 + $0x90] sm:$0xff] }
 0x727   :  { %1859 = vmatpush.msrb.mxu1 %v1832_v29  ;;  %1942 = vmatpush.msrb.mxu3 %v1913_v30  ;;  %v2104_v29 = vld [vmem:[#allocation10 + $0x108] sm:$0xff] }
 0x728   :  { %v2022_v30 = vld [vmem:[#allocation10 + $0x88] sm:$0xff] }
 0x729   :  { %1860 = vmatpush.msrb.mxu1 %v1831_v31  ;;  %1943 = vmatpush.msrb.mxu3 %v1912_v32  ;;  %v2103_v31 = vld [vmem:[#allocation10 + $0x100] sm:$0xff] }
 0x72a   :  { %v2021_v32 = vld [vmem:[#allocation10 + $0x80] sm:$0xff] }
 0x72b   :  { %1861 = vmatpush.msrb.mxu1 %v1830_v33 }
 0x72d   :  { %2057 = vmatpush.msra.mxu1 %v1994_v37 }
 0x72f   :  { %2058 = vmatpush.msra.mxu1 %v1993_v38 }
 0x731   :  { %2059 = vmatpush.msra.mxu1 %v1992_v39  ;;  %v3685_v39 = vld [vmem:[%s4680_s24] ss:$0 sm:$0xff] }
 0x733   :  { %2060 = vmatpush.msra.mxu1 %v1991_v40 }
 0x735   :  { %2061 = vmatpush.msra.mxu1 %v1990_v41  ;;  %v2192_v41 = vld [vmem:[#allocation12 + $0x78] sm:$0xff] }
 0x737   :  { %2062 = vmatpush.msra.mxu1 %v1989_v42  ;;  %v2191_v42 = vld [vmem:[#allocation12 + $0x70] sm:$0xff] }
 0x739   :  { %2063 = vmatpush.msra.mxu1 %v1988_v43 }
 0x73b   :  { %2064 = vmatpush.msra.mxu1 %v1987_v46  ;;  %v2241_v46 = vld [vmem:[#allocation12 + $0xf8] sm:$0xff] }
 0x73d   :  { %2065 = vmatpush.msra.mxu1 %v1986_v47  ;;  %v2240_v47 = vld [vmem:[#allocation12 + $0xf0] sm:$0xff] }
 0x73f   :  { %2066 = vmatpush.msra.mxu1 %v1985_v51  ;;  %v2189_v51 = vld [vmem:[#allocation12 + $0x60] sm:$0xff] }
 0x741   :  { %2067 = vmatpush.msra.mxu1 %v1984_v53  ;;  %v2239_v53 = vld [vmem:[#allocation12 + $0xe8] sm:$0xff] }
 0x743   :  { %2068 = vmatpush.msra.mxu1 %v1983_v62  ;;  %v2147_v62 = vld [vmem:[%s4681_s18 + $0x8] sm:$0xff] }
 0x745   :  { %2069 = vmatpush.msra.mxu1 %v1982_v1  ;;  %v2333_v1 = vld [vmem:[#allocation12 + $0x160] sm:$0xff] }
 0x747   :  { %2070 = vmatpush.msra.mxu1 %v1981_v8  ;;  %v2332_v8 = vld [vmem:[#allocation12 + $0x158] sm:$0xff] }
 0x749   :  { %2071 = vmatpush.msra.mxu1 %v1980_v25  ;;  %v2325_v25 = vld [vmem:[#allocation12 + $0x120] sm:$0xff] }
 0x74b   :  { %2072 = vmatpush.msra.mxu1 %v1979_v56  ;;  %v2230_v56 = vld [vmem:[#allocation12 + $0xa0] sm:$0xff] }
 0x787   :  { %v1785_v34 = vpop.f32.mrf.mxu1 }
 0x788   :  { %1882 = vmatmul.f32.vlgmr.msrb.gmra.mxu2 %v1785_v34 }
 0x78d   :  { %v1908_v35 = vpop.f32.mrf.mxu3 }
 0x78e   :  { %1944 = vmatmul.f32.vlgmr.msrb.gmra.mxu3 %v1908_v35 }
 0x78f   :  { %v1826_v36 = vpop.f32.mrf.mxu1 }
 0x790   :  { %1862 = vmatmul.f32.vlgmr.msrb.gmra.mxu1 %v1826_v36 }
 0x791   :  { %2265 = vmatpush.msrb.mxu1 %v2192_v41 }
 0x793   :  { %2266 = vmatpush.msrb.mxu1 %v2191_v42 }
 0x80b   :  { %v1883_v45 = vpop.f32.mrf.mxu2 }
 0x80d   :  { %v1863_v44 = vpop.f32.mrf.mxu1 }
 0x80e   :  { %v1884_v48 = vadd.f32 %v1883_v45, %v1863_v44  ;;  %v2190_v44 = vld [vmem:[#allocation12 + $0x68] sm:$0xff] }
 0x80f   :  { %2267 = vmatpush.msrb.mxu1 %v2190_v44 }
 0x811   :  { %v1945_v50 = vpop.f32.mrf.mxu3  ;;  %2268 = vmatpush.msrb.mxu1 %v2189_v51 }
 0x812   :  { %v1948_v52 = vadd.f32 %v1945_v50, %v1884_v48  ;;  %v3568_v50 = vld [vmem:[%s4681_s18 + $0x20] sm:$0xff] }
 0x814   :  { %v1953_v54 = vadd.f32 %v3684_v49, %v1948_v52  ;;  %v2146_v49 = vld [vmem:[%s4681_s18] sm:$0xff]  ;;  %v2336_v52 = vld [vmem:[#allocation12 + $0x178] sm:$0xff] }
 0x816   :  { %v1954_v55 = vmax.f32 %v1953_v54, 0.0  ;;  %v2188_v54 = vld [vmem:[#allocation12 + $0x58] sm:$0xff] }
 0x817   :  { %2269 = vmatpush.msrb.mxu1 %v2188_v54 }
 0x818   :  { %1974 = vmatpush.msra.mxu0 %v1954_v55  ;;  %2097 = vmatpush.msra.mxu2 %v1954_v55 }
 0x819   :  { %3557 = vmatmul.msk.f32.vlgmr.msra.gmra.mxu0 %vm1382_vm2, %v1955_v57  ;;  %3561 = vmatmul.msk.f32.vlgmr.msra.gmra.mxu2 %vm1382_vm2, %v3560_v59  ;;  %v2187_v57 = vld [vmem:[#allocation12 + $0x50] sm:$0xff]  ;;  %v2334_v59 = vld [vmem:[#allocation12 + $0x168] sm:$0xff] }
 0x81a   :  { %2015 = vmatpush.msrb.mxu0 %v1954_v55  ;;  %2119 = vmatpush.msrb.mxu2 %v2118_v60  ;;  %v2335_v55 = vld [vmem:[#allocation12 + $0x170] sm:$0xff]  ;;  %v2237_v60 = vld [vmem:[#allocation12 + $0xd8] sm:$0xff] }
 0x81b   :  { %2270 = vmatpush.msrb.mxu1 %v2187_v57  ;;  %v2370_v57 = vld [vmem:[%s4683_s16] sm:$0xff] }
 0x81c   :  { %2037 = vmatpush.msra.mxu0 %v2036_v61  ;;  %2120 = vmatpush.msrb.mxu2 %v2117_v63  ;;  %v2186_v61 = vld [vmem:[#allocation12 + $0x48] sm:$0xff] }
 0x81d   :  { %v3569_v63 = vld [vmem:[%s4681_s18 + $0x28] sm:$0xff]  ;;  %2271 = vmatpush.msrb.mxu1 %v2186_v61  ;;  %v2430_v61 = vld [vmem:[#allocation13 + $0x78] sm:$0xff] }
 0x81e   :  { %2038 = vmatpush.msra.mxu0 %v2035_v4  ;;  %2121 = vmatpush.msrb.mxu2 %v2116_v6  ;;  %v2185_v4 = vld [vmem:[#allocation12 + $0x40] sm:$0xff]  ;;  %v2236_v6 = vld [vmem:[#allocation12 + $0xd0] sm:$0xff] }
 0x81f   :  { %2272 = vmatpush.msrb.mxu1 %v2185_v4  ;;  %v2429_v4 = vld [vmem:[#allocation13 + $0x70] sm:$0xff] }
 0x820   :  { %2039 = vmatpush.msra.mxu0 %v2034_v7  ;;  %2122 = vmatpush.msrb.mxu2 %v2115_v9  ;;  %v2184_v7 = vld [vmem:[#allocation12 + $0x38] sm:$0xff]  ;;  %v2235_v9 = vld [vmem:[#allocation12 + $0xc8] sm:$0xff] }
 0x821   :  { %3559 = vmatmul.msk.f32.vlgmr.msrb.gmra.mxu0 %vm1382_vm2, %v3558_v10  ;;  %v2183_v10 = vld [vmem:[#allocation12 + $0x30] sm:$0xff]  ;;  %2273 = vmatpush.msrb.mxu1 %v2184_v7  ;;  %v2428_v7 = vld [vmem:[#allocation13 + $0x68] sm:$0xff] }
 0x822   :  { %2040 = vmatpush.msra.mxu0 %v2033_v0  ;;  %2123 = vmatpush.msrb.mxu2 %v2114_v2  ;;  %v2331_v0 = vld [vmem:[#allocation12 + $0x150] sm:$0xff]  ;;  %v2182_v2 = vld [vmem:[#allocation12 + $0x28] sm:$0xff] }
 0x823   :  { %2274 = vmatpush.msrb.mxu1 %v2183_v10  ;;  %v2371_v10 = vld [vmem:[%s4683_s16 + $0x8] sm:$0xff] }
 0x824   :  { %2041 = vmatpush.msra.mxu0 %v2032_v3  ;;  %2124 = vmatpush.msrb.mxu2 %v2113_v12  ;;  %v2330_v3 = vld [vmem:[#allocation12 + $0x148] sm:$0xff]  ;;  %v3564_v12 = vld [vmem:[%s4681_s18 + $0x10] sm:$0xff] }
 0x825   :  { %2275 = vmatpush.msrb.mxu1 %v2182_v2  ;;  %v3585_v2 = vld [vmem:[%s4683_s16 + $0x48] sm:$0xff] }
 0x826   :  { %2042 = vmatpush.msra.mxu0 %v2031_v13  ;;  %2125 = vmatpush.msrb.mxu2 %v2112_v14  ;;  %v2181_v13 = vld [vmem:[#allocation12 + $0x20] sm:$0xff] }
 0x827   :  { %v2329_v14 = vld [vmem:[#allocation12 + $0x140] sm:$0xff]  ;;  %2276 = vmatpush.msrb.mxu1 %v2181_v13  ;;  %v2488_v13 = vld [vmem:[#allocation13 + $0xd0] sm:$0xff] }
 0x828   :  { %2043 = vmatpush.msra.mxu0 %v2030_v15  ;;  %2126 = vmatpush.msrb.mxu2 %v2111_v16  ;;  %v2180_v15 = vld [vmem:[#allocation12 + $0x18] sm:$0xff] }
 0x829   :  { %v2328_v16 = vld [vmem:[#allocation12 + $0x138] sm:$0xff]  ;;  %2277 = vmatpush.msrb.mxu1 %v2180_v15 }
 0x82a   :  { %2044 = vmatpush.msra.mxu0 %v2029_v17  ;;  %2127 = vmatpush.msrb.mxu2 %v2110_v18  ;;  %v2179_v17 = vld [vmem:[#allocation12 + $0x10] sm:$0xff]  ;;  %v2178_v18 = vld [vmem:[#allocation12 + $0x8] sm:$0xff]  ;;  %v2426_v15 = vld [vmem:[#allocation13 + $0x58] sm:$0xff] }
 0x82b   :  { %2278 = vmatpush.msrb.mxu1 %v2179_v17  ;;  %v2609_v17 = vld [vmem:[#allocation13 + $0x150] sm:$0xff] }
 0x82c   :  { %2045 = vmatpush.msra.mxu0 %v2028_v19  ;;  %2128 = vmatpush.msrb.mxu2 %v2109_v20  ;;  %v3565_v19 = vld [vmem:[%s4681_s18 + $0x18] sm:$0xff]  ;;  %v2234_v20 = vld [vmem:[#allocation12 + $0xc0] sm:$0xff] }
 0x82d   :  { %2279 = vmatpush.msrb.mxu1 %v2178_v18  ;;  %v2425_v18 = vld [vmem:[#allocation13 + $0x50] sm:$0xff] }
 0x82e   :  { %2046 = vmatpush.msra.mxu0 %v2027_v22  ;;  %2129 = vmatpush.msrb.mxu2 %v2108_v23  ;;  %v2177_v22 = vld [vmem:[#allocation12] sm:$0xff]  ;;  %v2327_v23 = vld [vmem:[#allocation12 + $0x130] sm:$0xff] }
 0x82f   :  { %2280 = vmatpush.msrb.mxu1 %v2177_v22  ;;  %v2372_v22 = vld [vmem:[%s4683_s16 + $0x10] sm:$0xff] }
 0x830   :  { %2047 = vmatpush.msra.mxu0 %v2026_v11  ;;  %2130 = vmatpush.msrb.mxu2 %v2107_v24  ;;  %v2233_v11 = vld [vmem:[#allocation12 + $0xb8] sm:$0xff]  ;;  %v2326_v24 = vld [vmem:[#allocation12 + $0x128] sm:$0xff] }
 0x832   :  { %2048 = vmatpush.msra.mxu0 %v2025_v5  ;;  %2131 = vmatpush.msrb.mxu2 %v2106_v26  ;;  %v2232_v5 = vld [vmem:[#allocation12 + $0xb0] sm:$0xff]  ;;  %v2231_v26 = vld [vmem:[#allocation12 + $0xa8] sm:$0xff] }
 0x834   :  { %2049 = vmatpush.msra.mxu0 %v2024_v27  ;;  %2132 = vmatpush.msrb.mxu2 %v2105_v28  ;;  %v2324_v27 = vld [vmem:[#allocation12 + $0x118] sm:$0xff]  ;;  %v2323_v28 = vld [vmem:[#allocation12 + $0x110] sm:$0xff] }
 0x836   :  { %2050 = vmatpush.msra.mxu0 %v2023_v21  ;;  %2133 = vmatpush.msrb.mxu2 %v2104_v29  ;;  %v2229_v21 = vld [vmem:[#allocation12 + $0x98] sm:$0xff]  ;;  %v2322_v29 = vld [vmem:[#allocation12 + $0x108] sm:$0xff] }
 0x838   :  { %2051 = vmatpush.msra.mxu0 %v2022_v30  ;;  %2134 = vmatpush.msrb.mxu2 %v2103_v31  ;;  %v2228_v30 = vld [vmem:[#allocation12 + $0x90] sm:$0xff]  ;;  %v2321_v31 = vld [vmem:[#allocation12 + $0x100] sm:$0xff] }
 0x83a   :  { %2052 = vmatpush.msra.mxu0 %v2021_v32  ;;  %v2227_v32 = vld [vmem:[#allocation12 + $0x88] sm:$0xff] }
 0x83c   :  { %2242 = vmatpush.msrb.mxu0 %v2241_v46 }
 0x83e   :  { %2243 = vmatpush.msrb.mxu0 %v2240_v47 }
 0x840   :  { %2244 = vmatpush.msrb.mxu0 %v2239_v53  ;;  %v2493_v53 = vld [vmem:[#allocation13 + $0xf8] sm:$0xff] }
 0x896   :  { %v1976_v33 = vpop.f32.mrf.mxu0 }
 0x897   :  { %2073 = vmatmul.f32.vlgmr.msra.gmra.mxu1 %v1976_v33  ;;  %v2226_v33 = vld [vmem:[#allocation12 + $0x80] sm:$0xff] }
 0x898   :  { %2494 = vmatpush.msra.mxu1 %v2493_v53 }
 0x89c   :  { %v2099_v34 = vpop.f32.mrf.mxu2 }
 0x89d   :  { %2135 = vmatmul.f32.vlgmr.msrb.gmra.mxu2 %v2099_v34 }
 0x89e   :  { %v2017_v35 = vpop.f32.mrf.mxu0 }
 0x89f   :  { %2053 = vmatmul.f32.vlgmr.msra.gmra.mxu0 %v2017_v35 }
 0x914   :  { %v2074_v37 = vpop.f32.mrf.mxu1 }
 0x91c   :  { %v2054_v36 = vpop.f32.mrf.mxu0 }
 0x91d   :  { %v2075_v38 = vadd.f32 %v2074_v37, %v2054_v36 }
 0x920   :  { %v2136_v40 = vpop.f32.mrf.mxu2 }
 0x921   :  { %v2139_v43 = vadd.f32 %v2136_v40, %v2075_v38 }
 0x923   :  { %v2144_v45 = vadd.f32 %v3685_v39, %v2139_v43 }
 0x925   :  { %v2145_v48 = vadd.f32 %v2144_v45, %v4510_v58  ;;  %v2238_v58 = vld [vmem:[#allocation12 + $0xe0] sm:$0xff] }
 0x926   :  { %2245 = vmatpush.msrb.mxu0 %v2238_v58 }
 0x927   :  { %2169 = vmatpush.msra.mxu3 %v2145_v48  ;;  %2312 = vmatpush.msra.mxu2 %v2145_v48 }
 0x928   :  { %3562 = vmatmul.msk.f32.vlgmr.msra.gmra.mxu3 %vm1382_vm2, %v2146_v49  ;;  %3570 = vmatmul.msk.f32.vlgmr.msra.gmra.mxu2 %vm1382_vm2, %v3568_v50 }
 0x929   :  { %2217 = vmatpush.msrb.mxu3 %v2145_v48  ;;  %2246 = vmatpush.msrb.mxu0 %v2237_v60  ;;  %v3686_v48 = vld [vmem:[%s4682_s23] ss:$0 sm:$0xff] }
 0x92a   :  { %v3576_v60 = vld [vmem:[%s4683_s16 + $0x20] sm:$0xff] }
 0x92b   :  { %2337 = vmatpush.msra.mxu3 %v2336_v52  ;;  %2247 = vmatpush.msrb.mxu0 %v2236_v6  ;;  %v2490_v6 = vld [vmem:[#allocation13 + $0xe0] sm:$0xff] }
 0x92d   :  { %2338 = vmatpush.msra.mxu3 %v2335_v55  ;;  %2248 = vmatpush.msrb.mxu0 %v2235_v9  ;;  %v2492_v55 = vld [vmem:[#allocation13 + $0xf0] sm:$0xff]  ;;  %v2489_v9 = vld [vmem:[#allocation13 + $0xd8] sm:$0xff] }
 0x92e   :  { %2495 = vmatpush.msra.mxu1 %v2492_v55 }
 0x92f   :  { %2339 = vmatpush.msra.mxu3 %v2334_v59  ;;  %2249 = vmatpush.msrb.mxu0 %v2234_v20  ;;  %v3584_v59 = vld [vmem:[%s4683_s16 + $0x40] sm:$0xff]  ;;  %v2608_v20 = vld [vmem:[#allocation13 + $0x148] sm:$0xff] }
 0x930   :  { %3563 = vmatmul.msk.f32.gmra.mxu3 %vm1382_vm2, %v2147_v62  ;;  %3571 = vmatmul.msk.f32.gmra.mxu2 %vm1382_vm2, %v3569_v63  ;;  %v2614_v62 = vld [vmem:[#allocation13 + $0x178] sm:$0xff]  ;;  %v2491_v63 = vld [vmem:[#allocation13 + $0xe8] sm:$0xff] }
 0x931   :  { %2340 = vmatpush.msra.mxu3 %v2333_v1  ;;  %2250 = vmatpush.msrb.mxu0 %v2233_v11  ;;  %v2613_v1 = vld [vmem:[#allocation13 + $0x170] sm:$0xff] }
 0x932   :  { %2496 = vmatpush.msra.mxu1 %v2491_v63  ;;  %v3586_v11 = vld [vmem:[%s4683_s16 + $0x50] sm:$0xff] }
 0x933   :  { %2341 = vmatpush.msra.mxu3 %v2332_v8  ;;  %2251 = vmatpush.msrb.mxu0 %v2232_v5  ;;  %v2612_v8 = vld [vmem:[#allocation13 + $0x168] sm:$0xff] }
 0x934   :  { %2497 = vmatpush.msra.mxu1 %v2490_v6  ;;  %v2424_v5 = vld [vmem:[#allocation13 + $0x48] sm:$0xff] }
 0x935   :  { %2342 = vmatpush.msra.mxu3 %v2331_v0  ;;  %2252 = vmatpush.msrb.mxu0 %v2231_v26  ;;  %v2611_v0 = vld [vmem:[#allocation13 + $0x160] sm:$0xff]  ;;  %v2484_v26 = vld [vmem:[#allocation13 + $0xb0] sm:$0xff]  ;;  %v2781_v6 = vld [vmem:[#allocation16 + $0xe8] sm:$0xff] }
 0x936   :  { %2498 = vmatpush.msra.mxu1 %v2489_v9  ;;  %v2778_v9 = vld [vmem:[#allocation16 + $0xd0] sm:$0xff] }
 0x937   :  { %2343 = vmatpush.msra.mxu3 %v2330_v3  ;;  %2253 = vmatpush.msrb.mxu0 %v2230_v56  ;;  %v3577_v3 = vld [vmem:[%s4683_s16 + $0x28] sm:$0xff]  ;;  %v2606_v56 = vld [vmem:[#allocation13 + $0x138] sm:$0xff] }
 0x938   :  { %3566 = vmatmul.msk.f32.vlgmr.msrb.gmra.mxu3 %vm1382_vm2, %v3564_v12  ;;  %v2427_v12 = vld [vmem:[#allocation13 + $0x60] sm:$0xff]  ;;  %2499 = vmatpush.msra.mxu1 %v2488_v13 }
 0x939   :  { %2344 = vmatpush.msra.mxu3 %v2329_v14  ;;  %2254 = vmatpush.msrb.mxu0 %v2229_v21  ;;  %v2610_v14 = vld [vmem:[#allocation13 + $0x158] sm:$0xff] }
 0x93a   :  { %v2422_v21 = vld [vmem:[#allocation13 + $0x38] sm:$0xff] }
 0x93b   :  { %2345 = vmatpush.msra.mxu3 %v2328_v16  ;;  %2255 = vmatpush.msrb.mxu0 %v2228_v30  ;;  %v2487_v16 = vld [vmem:[#allocation13 + $0xc8] sm:$0xff]  ;;  %v2482_v30 = vld [vmem:[#allocation13 + $0xa0] sm:$0xff] }
 0x93c   :  { %2500 = vmatpush.msra.mxu1 %v2487_v16 }
 0x93d   :  { %2346 = vmatpush.msra.mxu3 %v2327_v23  ;;  %2256 = vmatpush.msrb.mxu0 %v2227_v32  ;;  %v2485_v23 = vld [vmem:[#allocation13 + $0xb8] sm:$0xff]  ;;  %v2604_v32 = vld [vmem:[#allocation13 + $0x128] sm:$0xff] }
 0x93f   :  { %2347 = vmatpush.msra.mxu3 %v2326_v24  ;;  %2257 = vmatpush.msrb.mxu0 %v2226_v33  ;;  %v3578_v24 = vld [vmem:[%s4683_s16 + $0x30] sm:$0xff]  ;;  %v3587_v33 = vld [vmem:[%s4683_s16 + $0x58] sm:$0xff] }
 0x940   :  { %3567 = vmatmul.msk.f32.gmra.mxu3 %vm1382_vm2, %v3565_v19  ;;  %v2486_v19 = vld [vmem:[#allocation13 + $0xc0] sm:$0xff] }
 0x941   :  { %2348 = vmatpush.msra.mxu3 %v2325_v25  ;;  %2501 = vmatpush.msra.mxu1 %v2486_v19  ;;  %v2607_v25 = vld [vmem:[#allocation13 + $0x140] sm:$0xff] }
 0x942   :  { %v2768_v19 = vld [vmem:[#allocation16 + $0x80] sm:$0xff] }
 0x943   :  { %2349 = vmatpush.msra.mxu3 %v2324_v27  ;;  %2502 = vmatpush.msra.mxu1 %v2485_v23  ;;  %v2423_v27 = vld [vmem:[#allocation13 + $0x40] sm:$0xff] }
 0x945   :  { %2350 = vmatpush.msra.mxu3 %v2323_v28  ;;  %v2483_v28 = vld [vmem:[#allocation13 + $0xa8] sm:$0xff]  ;;  %2503 = vmatpush.msra.mxu1 %v2484_v26 }
 0x947   :  { %2351 = vmatpush.msra.mxu3 %v2322_v29  ;;  %v2605_v29 = vld [vmem:[#allocation13 + $0x130] sm:$0xff]  ;;  %2504 = vmatpush.msra.mxu1 %v2483_v28 }
 0x949   :  { %2352 = vmatpush.msra.mxu3 %v2321_v31  ;;  %v2373_v31 = vld [vmem:[%s4683_s16 + $0x18] sm:$0xff]  ;;  %2505 = vmatpush.msra.mxu1 %v2482_v30 }
 0x9ab   :  { %v2171_v34 = vpop.f32.mrf.mxu3  ;;  %v2314_v35 = vpop.f32.mrf.mxu2 }
 0x9ac   :  { %2281 = vmatmul.f32.vlgmr.msrb.gmra.mxu1 %v2171_v34  ;;  %2353 = vmatmul.f32.vlgmr.msra.gmra.mxu3 %v2314_v35  ;;  %v3579_v34 = vld [vmem:[%s4683_s16 + $0x38] sm:$0xff]  ;;  %v2421_v35 = vld [vmem:[#allocation13 + $0x30] sm:$0xff] }
 0x9b3   :  { %v2174_v36 = vpop.f32.mrf.mxu3  ;;  %v2317_v37 = vpop.f32.mrf.mxu2 }
 0x9b4   :  { %2284 = vmatmul.f32.gmra.mxu1 %v2174_v36  ;;  %2356 = vmatmul.f32.gmra.mxu3 %v2317_v37  ;;  %v2420_v36 = vld [vmem:[#allocation13 + $0x28] sm:$0xff]  ;;  %v2419_v37 = vld [vmem:[#allocation13 + $0x20] sm:$0xff] }
 0x9bb   :  { %v2219_v38 = vpop.f32.mrf.mxu3 }
 0x9bc   :  { %2258 = vmatmul.f32.vlgmr.msrb.gmra.mxu0 %v2219_v38  ;;  %v2418_v38 = vld [vmem:[#allocation13 + $0x18] sm:$0xff] }
 0x9c3   :  { %v2222_v39 = vpop.f32.mrf.mxu3 }
 0x9c4   :  { %2261 = vmatmul.f32.gmra.mxu0 %v2222_v39  ;;  %v2417_v39 = vld [vmem:[#allocation13 + $0x10] sm:$0xff] }
 0xa29   :  { %v2282_v40 = vpop.f32.mrf.mxu1 }
 0xa2f   :  { %v2354_v41 = vpop.f32.mrf.mxu3 }
 0xa31   :  { %v2285_v44 = vpop.f32.mrf.mxu1 }
 0xa37   :  { %v2357_v46 = vpop.f32.mrf.mxu3 }
 0xa39   :  { %v2259_v42 = vpop.f32.mrf.mxu0 }
 0xa3a   :  { %v2283_v43 = vadd.f32 %v2282_v40, %v2259_v42  ;;  %v2416_v40 = vld [vmem:[#allocation13 + $0x8] sm:$0xff]  ;;  %v2415_v42 = vld [vmem:[#allocation13] sm:$0xff] }
 0xa3c   :  { %v2360_v47 = vadd.f32 %v2354_v41, %v2283_v43  ;;  %v2481_v41 = vld [vmem:[#allocation13 + $0x98] sm:$0xff]  ;;  %v2603_v43 = vld [vmem:[#allocation13 + $0x120] sm:$0xff] }
 0xa3d   :  { %2506 = vmatpush.msra.mxu1 %v2481_v41 }
 0xa3e   :  { %v2366_v51 = vadd.f32 %v3686_v48, %v2360_v47  ;;  %v2601_v47 = vld [vmem:[#allocation13 + $0x110] sm:$0xff] }
 0xa40   :  { %v2368_v58 = vmax.f32 %v2366_v51, 0.0 }
 0xa41   :  { %v2262_v45 = vpop.f32.mrf.mxu0 }
 0xa42   :  { %v2286_v49 = vadd.f32 %v2285_v44, %v2262_v45  ;;  %v2480_v44 = vld [vmem:[#allocation13 + $0x90] sm:$0xff]  ;;  %v2602_v45 = vld [vmem:[#allocation13 + $0x118] sm:$0xff] }
 0xa43   :  { %2507 = vmatpush.msra.mxu1 %v2480_v44  ;;  %v2660_v44 = vld [vmem:[#allocation15] sm:$0xff] }
 0xa44   :  { %v2361_v50 = vadd.f32 %v2357_v46, %v2286_v49  ;;  %v2479_v46 = vld [vmem:[#allocation13 + $0x88] sm:$0xff] }
 0xa45   :  { %2508 = vmatpush.msra.mxu1 %v2479_v46  ;;  %v2600_v49 = vld [vmem:[#allocation13 + $0x108] sm:$0xff] }
 0xa46   :  { %v2367_v52 = vadd.f32 %v3686_v48, %v2361_v50  ;;  %v2478_v48 = vld [vmem:[#allocation13 + $0x80] sm:$0xff]  ;;  %v2661_v46 = vld [vmem:[#allocation15 + $0x8] sm:$0xff] }
 0xa47   :  { %2509 = vmatpush.msra.mxu1 %v2478_v48  ;;  %v2599_v50 = vld [vmem:[#allocation13 + $0x100] sm:$0xff]  ;;  %v2662_v48 = vld [vmem:[#allocation15 + $0x10] sm:$0xff] }
 0xa48   :  { %v2369_v54 = vmax.f32 %v2367_v52, 0.0 }
 0xa4a   :  { %2400 = vmatpush.msrb.mxu2 %v2369_v54  ;;  %2462 = vmatpush.msra.mxu0 %v2369_v54 }
 0xa4b   :  { %2583 = vmatpush.msrb.mxu3 %v2369_v54 }
 0xa4c   :  { %2401 = vmatpush.msrb.mxu2 %v2368_v58  ;;  %2463 = vmatpush.msra.mxu0 %v2368_v58 }
 0xa4d   :  { %2584 = vmatpush.msrb.mxu3 %v2368_v58  ;;  %3572 = vmatmul.msk.f32.vlgmr.msrb.gmra.mxu2 %vm1190_vm1, %v2370_v57 }
 0xa4e   :  { %3588 = vmatmul.msk.f32.vlgmr.msrb.gmra.mxu3 %vm1190_vm1, %v3584_v59  ;;  %3580 = vmatmul.msk.f32.vlgmr.msra.gmra.mxu0 %vm1190_vm1, %v3576_v60 }
 0xa4f   :  { %2523 = vmatpush.msra.mxu2 %v2430_v61  ;;  %2615 = vmatpush.msrb.mxu0 %v2614_v62 }
 0xa51   :  { %2524 = vmatpush.msra.mxu2 %v2429_v4  ;;  %2616 = vmatpush.msrb.mxu0 %v2613_v1  ;;  %v2783_v4 = vld [vmem:[#allocation16 + $0xf8] sm:$0xff]  ;;  %v2782_v1 = vld [vmem:[#allocation16 + $0xf0] sm:$0xff] }
 0xa53   :  { %2525 = vmatpush.msra.mxu2 %v2428_v7  ;;  %2617 = vmatpush.msrb.mxu0 %v2612_v8  ;;  %v2780_v7 = vld [vmem:[#allocation16 + $0xe0] sm:$0xff]  ;;  %v2779_v8 = vld [vmem:[#allocation16 + $0xd8] sm:$0xff] }
 0xa55   :  { %3573 = vmatmul.msk.f32.gmra.mxu2 %vm1190_vm1, %v2371_v10  ;;  %2618 = vmatpush.msrb.mxu0 %v2611_v0  ;;  %v2777_v10 = vld [vmem:[#allocation16 + $0xc8] sm:$0xff]  ;;  %v2776_v0 = vld [vmem:[#allocation16 + $0xc0] sm:$0xff] }
 0xa56   :  { %3589 = vmatmul.msk.f32.gmra.mxu3 %vm1190_vm1, %v3585_v2  ;;  %3581 = vmatmul.msk.f32.gmra.mxu0 %vm1190_vm1, %v3577_v3  ;;  %v2775_v2 = vld [vmem:[#allocation16 + $0xb8] sm:$0xff]  ;;  %v2774_v3 = vld [vmem:[#allocation16 + $0xb0] sm:$0xff] }
 0xa57   :  { %2526 = vmatpush.msra.mxu2 %v2427_v12  ;;  %2619 = vmatpush.msrb.mxu0 %v2610_v14  ;;  %v2773_v12 = vld [vmem:[#allocation16 + $0xa8] sm:$0xff]  ;;  %v2772_v14 = vld [vmem:[#allocation16 + $0xa0] sm:$0xff] }
 0xa59   :  { %2527 = vmatpush.msra.mxu2 %v2426_v15  ;;  %2620 = vmatpush.msrb.mxu0 %v2609_v17  ;;  %v2771_v15 = vld [vmem:[#allocation16 + $0x98] sm:$0xff]  ;;  %v2770_v17 = vld [vmem:[#allocation16 + $0x90] sm:$0xff] }
 0xa5b   :  { %2528 = vmatpush.msra.mxu2 %v2425_v18  ;;  %2621 = vmatpush.msrb.mxu0 %v2608_v20  ;;  %v2769_v18 = vld [vmem:[#allocation16 + $0x88] sm:$0xff] }
 0xa5d   :  { %3574 = vmatmul.msk.f32.gmra.mxu2 %vm1190_vm1, %v2372_v22  ;;  %2622 = vmatpush.msrb.mxu0 %v2607_v25 }
 0xa5e   :  { %3590 = vmatmul.msk.f32.gmra.mxu3 %vm1190_vm1, %v3586_v11  ;;  %3582 = vmatmul.msk.f32.gmra.mxu0 %vm1190_vm1, %v3578_v24 }
 0xa5f   :  { %2529 = vmatpush.msra.mxu2 %v2424_v5  ;;  %2623 = vmatpush.msrb.mxu0 %v2606_v56 }
 0xa61   :  { %2530 = vmatpush.msra.mxu2 %v2423_v27  ;;  %2624 = vmatpush.msrb.mxu0 %v2605_v29 }
 0xa63   :  { %2531 = vmatpush.msra.mxu2 %v2422_v21  ;;  %2625 = vmatpush.msrb.mxu0 %v2604_v32  ;;  %v3687_v32 = vld [vmem:[%s4684_s26] ss:$0 sm:$0xff] }
 0xa65   :  { %3575 = vmatmul.msk.f32.gmra.mxu2 %vm1190_vm1, %v2373_v31  ;;  %2626 = vmatpush.msrb.mxu0 %v2603_v43 }
 0xa66   :  { %3591 = vmatmul.msk.f32.gmra.mxu3 %vm1190_vm1, %v3587_v33  ;;  %3583 = vmatmul.msk.f32.gmra.mxu0 %vm1190_vm1, %v3579_v34 }
 0xa67   :  { %2532 = vmatpush.msra.mxu2 %v2421_v35  ;;  %2627 = vmatpush.msrb.mxu0 %v2602_v45  ;;  %v2722_v45 = vld [vmem:[#allocation15 + $0x20] sm:$0xff] }
 0xa69   :  { %2533 = vmatpush.msra.mxu2 %v2420_v36  ;;  %2628 = vmatpush.msrb.mxu0 %v2601_v47  ;;  %v2723_v47 = vld [vmem:[#allocation15 + $0x28] sm:$0xff] }
 0xa6b   :  { %2534 = vmatpush.msra.mxu2 %v2419_v37  ;;  %2629 = vmatpush.msrb.mxu0 %v2600_v49  ;;  %v2724_v49 = vld [vmem:[#allocation15 + $0x30] sm:$0xff] }
 0xa6d   :  { %2535 = vmatpush.msra.mxu2 %v2418_v38  ;;  %2630 = vmatpush.msrb.mxu0 %v2599_v50  ;;  %v2663_v50 = vld [vmem:[#allocation15 + $0x18] sm:$0xff] }
 0xa6f   :  { %2536 = vmatpush.msra.mxu2 %v2417_v39 }
 0xa71   :  { %2537 = vmatpush.msra.mxu2 %v2416_v40 }
 0xa73   :  { %2538 = vmatpush.msra.mxu2 %v2415_v42 }
 0xa75   :  { %2784 = vmatpush.msrb.mxu2 %v2783_v4  ;;  %v2713_v4 = vld [vmem:[#allocation16 + $0x40] sm:$0xff] }
 0xa77   :  { %2785 = vmatpush.msrb.mxu2 %v2782_v1  ;;  %v2712_v1 = vld [vmem:[#allocation16 + $0x38] sm:$0xff] }
 0xa79   :  { %2786 = vmatpush.msrb.mxu2 %v2781_v6  ;;  %v2711_v6 = vld [vmem:[#allocation16 + $0x30] sm:$0xff] }
 0xa7b   :  { %2787 = vmatpush.msrb.mxu2 %v2780_v7  ;;  %v2710_v7 = vld [vmem:[#allocation16 + $0x28] sm:$0xff] }
 0xa7d   :  { %2788 = vmatpush.msrb.mxu2 %v2779_v8  ;;  %v2709_v8 = vld [vmem:[#allocation16 + $0x20] sm:$0xff] }
 0xa7f   :  { %2789 = vmatpush.msrb.mxu2 %v2778_v9  ;;  %v2708_v9 = vld [vmem:[#allocation16 + $0x18] sm:$0xff] }
 0xa81   :  { %2790 = vmatpush.msrb.mxu2 %v2777_v10  ;;  %v2707_v10 = vld [vmem:[#allocation16 + $0x10] sm:$0xff] }
 0xa83   :  { %2791 = vmatpush.msrb.mxu2 %v2776_v0  ;;  %v2706_v0 = vld [vmem:[#allocation16 + $0x8] sm:$0xff] }
 0xa85   :  { %2792 = vmatpush.msrb.mxu2 %v2775_v2  ;;  %v2705_v2 = vld [vmem:[#allocation16] sm:$0xff] }
 0xa87   :  { %2793 = vmatpush.msrb.mxu2 %v2774_v3  ;;  %v2904_v3 = vld [vmem:[#allocation16 + $0x178] sm:$0xff] }
 0xa89   :  { %2794 = vmatpush.msrb.mxu2 %v2773_v12  ;;  %v2903_v12 = vld [vmem:[#allocation16 + $0x170] sm:$0xff] }
 0xa8b   :  { %2795 = vmatpush.msrb.mxu2 %v2772_v14  ;;  %v2901_v14 = vld [vmem:[#allocation16 + $0x160] sm:$0xff] }
 0xa8d   :  { %2796 = vmatpush.msrb.mxu2 %v2771_v15  ;;  %v2900_v15 = vld [vmem:[#allocation16 + $0x158] sm:$0xff] }
 0xa8f   :  { %2797 = vmatpush.msrb.mxu2 %v2770_v17  ;;  %v2898_v17 = vld [vmem:[#allocation16 + $0x148] sm:$0xff] }
 0xa91   :  { %2798 = vmatpush.msrb.mxu2 %v2769_v18  ;;  %v2897_v18 = vld [vmem:[#allocation16 + $0x140] sm:$0xff] }
 0xa93   :  { %2799 = vmatpush.msrb.mxu2 %v2768_v19  ;;  %v2896_v19 = vld [vmem:[#allocation16 + $0x138] sm:$0xff] }
 0xacb   :  { %v2465_v51 = vpop.f32.mrf.mxu0 }
 0xacc   :  { %2510 = vmatmul.f32.vlgmr.msra.gmra.mxu1 %v2465_v51  ;;  %v2725_v51 = vld [vmem:[#allocation15 + $0x38] sm:$0xff] }
 0xad0   :  { %v2403_v52 = vpop.f32.mrf.mxu2 }
 0xad1   :  { %2539 = vmatmul.f32.vlgmr.msra.gmra.mxu2 %v2403_v52  ;;  %v2586_v53 = vpop.f32.mrf.mxu3  ;;  %v2843_v52 = vld [vmem:[#allocation15 + $0x40] sm:$0xff] }
 0xad2   :  { %2631 = vmatmul.f32.vlgmr.msrb.gmra.mxu0 %v2586_v53  ;;  %v2844_v53 = vld [vmem:[#allocation15 + $0x48] sm:$0xff] }
 0xad3   :  { %v2468_v54 = vpop.f32.mrf.mxu0 }
 0xad4   :  { %2513 = vmatmul.f32.gmra.mxu1 %v2468_v54  ;;  %v2845_v54 = vld [vmem:[#allocation15 + $0x50] sm:$0xff] }
 0xad8   :  { %v2406_v55 = vpop.f32.mrf.mxu2 }
 0xad9   :  { %2542 = vmatmul.f32.gmra.mxu2 %v2406_v55  ;;  %v2589_v58 = vpop.f32.mrf.mxu3  ;;  %v2846_v55 = vld [vmem:[#allocation15 + $0x58] sm:$0xff] }
 0xada   :  { %2634 = vmatmul.f32.gmra.mxu0 %v2589_v58  ;;  %v2720_v58 = vld [vmem:[#allocation16 + $0x78] sm:$0xff] }
 0xadb   :  { %v2471_v57 = vpop.f32.mrf.mxu0  ;;  %2813 = vmatpush.msra.mxu0 %v2720_v58  ;;  %v2998_v58 = vld [vmem:[#allocation16 + $0x1e8] sm:$0xff] }
 0xadc   :  { %2516 = vmatmul.f32.gmra.mxu1 %v2471_v57  ;;  %v2719_v57 = vld [vmem:[#allocation16 + $0x70] sm:$0xff] }
 0xadd   :  { %2814 = vmatpush.msra.mxu0 %v2719_v57  ;;  %v3094_v57 = vld [vmem:[#allocation16 + $0x268] sm:$0xff] }
 0xae0   :  { %v2409_v59 = vpop.f32.mrf.mxu2 }
 0xae1   :  { %2545 = vmatmul.f32.gmra.mxu2 %v2409_v59  ;;  %v2592_v60 = vpop.f32.mrf.mxu3  ;;  %v2718_v59 = vld [vmem:[#allocation16 + $0x68] sm:$0xff] }
 0xae2   :  { %2637 = vmatmul.f32.gmra.mxu0 %v2592_v60  ;;  %v2717_v60 = vld [vmem:[#allocation16 + $0x60] sm:$0xff] }
 0xae3   :  { %v2474_v61 = vpop.f32.mrf.mxu0  ;;  %2815 = vmatpush.msra.mxu0 %v2718_v59  ;;  %v3093_v59 = vld [vmem:[#allocation16 + $0x260] sm:$0xff] }
 0xae4   :  { %2519 = vmatmul.f32.gmra.mxu1 %v2474_v61  ;;  %v2716_v61 = vld [vmem:[#allocation16 + $0x58] sm:$0xff] }
 0xae5   :  { %2816 = vmatpush.msra.mxu0 %v2717_v60  ;;  %v3092_v60 = vld [vmem:[#allocation16 + $0x258] sm:$0xff] }
 0xae7   :  { %2817 = vmatpush.msra.mxu0 %v2716_v61  ;;  %v2997_v61 = vld [vmem:[#allocation16 + $0x1e0] sm:$0xff] }
 0xae8   :  { %v2412_v62 = vpop.f32.mrf.mxu2 }
 0xae9   :  { %2548 = vmatmul.f32.gmra.mxu2 %v2412_v62  ;;  %v2595_v63 = vpop.f32.mrf.mxu3  ;;  %v2715_v62 = vld [vmem:[#allocation16 + $0x50] sm:$0xff] }
 0xaea   :  { %2640 = vmatmul.f32.gmra.mxu0 %v2595_v63  ;;  %v2714_v63 = vld [vmem:[#allocation16 + $0x48] sm:$0xff] }
 0xaeb   :  { %2818 = vmatpush.msra.mxu0 %v2715_v62  ;;  %v2996_v62 = vld [vmem:[#allocation16 + $0x1d8] sm:$0xff] }
 0xaed   :  { %2819 = vmatpush.msra.mxu0 %v2714_v63  ;;  %v3091_v63 = vld [vmem:[#allocation16 + $0x250] sm:$0xff] }
 0xaef   :  { %2820 = vmatpush.msra.mxu0 %v2713_v4  ;;  %v2995_v4 = vld [vmem:[#allocation16 + $0x1d0] sm:$0xff] }
 0xaf1   :  { %2821 = vmatpush.msra.mxu0 %v2712_v1  ;;  %v3090_v1 = vld [vmem:[#allocation16 + $0x248] sm:$0xff] }
 0xaf3   :  { %2822 = vmatpush.msra.mxu0 %v2711_v6  ;;  %v2994_v6 = vld [vmem:[#allocation16 + $0x1c8] sm:$0xff] }
 0xaf5   :  { %2823 = vmatpush.msra.mxu0 %v2710_v7  ;;  %v3089_v7 = vld [vmem:[#allocation16 + $0x240] sm:$0xff] }
 0xaf7   :  { %2824 = vmatpush.msra.mxu0 %v2709_v8  ;;  %v3088_v8 = vld [vmem:[#allocation16 + $0x238] sm:$0xff] }
 0xaf9   :  { %2825 = vmatpush.msra.mxu0 %v2708_v9  ;;  %v2993_v9 = vld [vmem:[#allocation16 + $0x1c0] sm:$0xff] }
 0xafb   :  { %2826 = vmatpush.msra.mxu0 %v2707_v10  ;;  %v2992_v10 = vld [vmem:[#allocation16 + $0x1b8] sm:$0xff] }
 0xafd   :  { %2827 = vmatpush.msra.mxu0 %v2706_v0  ;;  %v3087_v0 = vld [vmem:[#allocation16 + $0x230] sm:$0xff] }
 0xaff   :  { %2828 = vmatpush.msra.mxu0 %v2705_v2  ;;  %v2991_v2 = vld [vmem:[#allocation16 + $0x1b0] sm:$0xff] }
 0xb49   :  { %v2511_v13 = vpop.f32.mrf.mxu1 }
 0xb4f   :  { %v2632_v16 = vpop.f32.mrf.mxu0 }
 0xb51   :  { %v2514_v22 = vpop.f32.mrf.mxu1 }
 0xb54   :  { %v2540_v20 = vpop.f32.mrf.mxu2 }
 0xb55   :  { %v2541_v29 = vadd.f32 %v2540_v20, %v2511_v13  ;;  %v2902_v13 = vld [vmem:[#allocation16 + $0x168] sm:$0xff]  ;;  %v2895_v20 = vld [vmem:[#allocation16 + $0x130] sm:$0xff] }
 0xb57   :  { %v2635_v23 = vpop.f32.mrf.mxu0  ;;  %v2644_v35 = vadd.f32 %v2632_v16, %v2541_v29  ;;  %v2899_v16 = vld [vmem:[#allocation16 + $0x150] sm:$0xff] }
 0xb58   :  { %v3037_v29 = vld [vmem:[#allocation15 + $0x90] sm:$0xff] }
 0xb59   :  { %v2517_v24 = vpop.f32.mrf.mxu1  ;;  %v2652_v40 = vadd.f32 %v3687_v32, %v2644_v35  ;;  %v3227_v35 = vld [vmem:[#allocation15 + $0xc0] sm:$0xff] }
 0xb5b   :  { %v4580_v43 = vmax.f32 %v2652_v40, 0.0  ;;  %v2940_v40 = vld [vmem:[#allocation15 + $0x68] sm:$0xff] }
 0xb5c   :  { %v2543_v11 = vpop.f32.mrf.mxu2 }
 0xb5d   :  { %v2544_v56 = vadd.f32 %v2543_v11, %v2514_v22  ;;  %v3035_v22 = vld [vmem:[#allocation15 + $0x80] sm:$0xff] }
 0xb5e   :  { %v2893_v11 = vld [vmem:[#allocation16 + $0x120] sm:$0xff] }
 0xb5f   :  { %v2638_v5 = vpop.f32.mrf.mxu0  ;;  %v2645_v33 = vadd.f32 %v2635_v23, %v2544_v56  ;;  %v2894_v23 = vld [vmem:[#allocation16 + $0x128] sm:$0xff] }
 0xb61   :  { %v2520_v27 = vpop.f32.mrf.mxu1  ;;  %v2653_v38 = vadd.f32 %v3687_v32, %v2645_v33 }
 0xb63   :  { %v4575_v42 = vmax.f32 %v2653_v38, 0.0  ;;  %v3228_v38 = vld [vmem:[#allocation15 + $0xc8] sm:$0xff] }
 0xb64   :  { %v2546_v25 = vpop.f32.mrf.mxu2 }
 0xb65   :  { %v2547_v26 = vadd.f32 %v2546_v25, %v2517_v24  ;;  %v2892_v24 = vld [vmem:[#allocation16 + $0x118] sm:$0xff]  ;;  %v2891_v25 = vld [vmem:[#allocation16 + $0x110] sm:$0xff] }
 0xb67   :  { %v2641_v21 = vpop.f32.mrf.mxu0  ;;  %v2646_v30 = vadd.f32 %v2638_v5, %v2547_v26  ;;  %v3036_v26 = vld [vmem:[#allocation15 + $0x88] sm:$0xff] }
 0xb69   :  { %v2654_v36 = vadd.f32 %v3687_v32, %v2646_v30 }
 0xb6b   :  { %v4570_v41 = vmax.f32 %v2654_v36, 0.0 }
 0xb6c   :  { %v2549_v28 = vpop.f32.mrf.mxu2 }
 0xb6d   :  { %v2550_v31 = vadd.f32 %v2549_v28, %v2520_v27  ;;  %v2890_v27 = vld [vmem:[#allocation16 + $0x108] sm:$0xff]  ;;  %v2889_v28 = vld [vmem:[#allocation16 + $0x100] sm:$0xff] }
 0xb6f   :  { %v2647_v34 = vadd.f32 %v2641_v21, %v2550_v31 }
 0xb71   :  { %v2655_v37 = vadd.f32 %v3687_v32, %v2647_v34  ;;  %v3038_v32 = vld [vmem:[#allocation15 + $0x98] sm:$0xff] }
 0xb73   :  { %v4568_v39 = vmax.f32 %v2655_v37, 0.0  ;;  %v2939_v37 = vld [vmem:[#allocation15 + $0x60] sm:$0xff] }
 0xb75   :  { %2688 = vmatpush.msra.mxu3 %v4568_v39  ;;  %2750 = vmatpush.msrb.mxu1 %v4568_v39 }
 0xb76   :  { %2967 = vmatpush.msra.mxu2 %v4568_v39 }
 0xb77   :  { %2689 = vmatpush.msra.mxu3 %v4570_v41  ;;  %2751 = vmatpush.msrb.mxu1 %v4570_v41 }
 0xb78   :  { %2968 = vmatpush.msra.mxu2 %v4570_v41 }
 0xb79   :  { %2690 = vmatpush.msra.mxu3 %v4575_v42  ;;  %2752 = vmatpush.msrb.mxu1 %v4575_v42 }
 0xb7a   :  { %2969 = vmatpush.msra.mxu2 %v4575_v42 }
 0xb7b   :  { %2691 = vmatpush.msra.mxu3 %v4580_v43  ;;  %2753 = vmatpush.msrb.mxu1 %v4580_v43 }
 0xb7c   :  { %2970 = vmatpush.msra.mxu2 %v4580_v43  ;;  %3592 = vmatmul.msk.f32.vlgmr.msra.gmra.mxu3 %vm294_vm0, %v2660_v44  ;;  %v3230_v44 = vld [vmem:[#allocation15 + $0xd8] sm:$0xff] }
 0xb7d   :  { %3596 = vmatmul.msk.f32.vlgmr.msrb.gmra.mxu1 %vm294_vm0, %v2722_v45  ;;  %2871 = vmatpush.msrb.mxu3 %v4568_v39 }
 0xb7e   :  { %2905 = vmatpush.msra.mxu1 %v2904_v3  ;;  %v3086_v3 = vld [vmem:[#allocation16 + $0x228] sm:$0xff] }
 0xb7f   :  { %2872 = vmatpush.msrb.mxu3 %v4570_v41 }
 0xb80   :  { %2906 = vmatpush.msra.mxu1 %v2903_v12  ;;  %v2990_v12 = vld [vmem:[#allocation16 + $0x1a8] sm:$0xff] }
 0xb81   :  { %2873 = vmatpush.msrb.mxu3 %v4575_v42 }
 0xb82   :  { %2907 = vmatpush.msra.mxu1 %v2902_v13  ;;  %v3085_v13 = vld [vmem:[#allocation16 + $0x220] sm:$0xff] }
 0xb83   :  { %2874 = vmatpush.msrb.mxu3 %v4580_v43 }
 0xb84   :  { %3593 = vmatmul.msk.f32.gmra.mxu3 %vm294_vm0, %v2661_v46  ;;  %2908 = vmatpush.msra.mxu1 %v2901_v14  ;;  %v2942_v46 = vld [vmem:[#allocation15 + $0x78] sm:$0xff] }
 0xb85   :  { %3063 = vmatpush.msra.mxu3 %v4568_v39  ;;  %3597 = vmatmul.msk.f32.gmra.mxu1 %vm294_vm0, %v2723_v47  ;;  %v3084_v14 = vld [vmem:[#allocation16 + $0x218] sm:$0xff] }
 0xb86   :  { %2909 = vmatpush.msra.mxu1 %v2900_v15  ;;  %v2989_v15 = vld [vmem:[#allocation16 + $0x1a0] sm:$0xff] }
 0xb87   :  { %3064 = vmatpush.msra.mxu3 %v4570_v41 }
 0xb88   :  { %2910 = vmatpush.msra.mxu1 %v2899_v16  ;;  %v2988_v16 = vld [vmem:[#allocation16 + $0x198] sm:$0xff] }
 0xb89   :  { %3065 = vmatpush.msra.mxu3 %v4575_v42 }
 0xb8a   :  { %2911 = vmatpush.msra.mxu1 %v2898_v17 }
 0xb8b   :  { %3066 = vmatpush.msra.mxu3 %v4580_v43 }
 0xb8c   :  { %3594 = vmatmul.msk.f32.gmra.mxu3 %vm294_vm0, %v2662_v48  ;;  %2912 = vmatpush.msra.mxu1 %v2897_v18  ;;  %v3131_v48 = vld [vmem:[#allocation15 + $0xa0] sm:$0xff]  ;;  %v3083_v18 = vld [vmem:[#allocation16 + $0x210] sm:$0xff] }
 0xb8d   :  { %3598 = vmatmul.msk.f32.gmra.mxu1 %vm294_vm0, %v2724_v49  ;;  %v3132_v49 = vld [vmem:[#allocation15 + $0xa8] sm:$0xff] }
 0xb8e   :  { %2913 = vmatpush.msra.mxu1 %v2896_v19  ;;  %v2987_v19 = vld [vmem:[#allocation16 + $0x190] sm:$0xff] }
 0xb90   :  { %2914 = vmatpush.msra.mxu1 %v2895_v20  ;;  %v3082_v20 = vld [vmem:[#allocation16 + $0x208] sm:$0xff] }
 0xb92   :  { %2915 = vmatpush.msra.mxu1 %v2894_v23  ;;  %v3081_v23 = vld [vmem:[#allocation16 + $0x200] sm:$0xff] }
 0xb94   :  { %3595 = vmatmul.msk.f32.gmra.mxu3 %vm294_vm0, %v2663_v50  ;;  %2916 = vmatpush.msra.mxu1 %v2893_v11  ;;  %v3133_v50 = vld [vmem:[#allocation15 + $0xb0] sm:$0xff]  ;;  %v3288_v11 = vld [vmem:[#allocation16 + $0x378] sm:$0xff] }
 0xb95   :  { %3599 = vmatmul.msk.f32.gmra.mxu1 %vm294_vm0, %v2725_v51  ;;  %v3134_v51 = vld [vmem:[#allocation15 + $0xb8] sm:$0xff] }
 0xb96   :  { %2917 = vmatpush.msra.mxu1 %v2892_v24 }
 0xb98   :  { %2918 = vmatpush.msra.mxu1 %v2891_v25  ;;  %v3287_v25 = vld [vmem:[#allocation16 + $0x370] sm:$0xff] }
 0xb9a   :  { %2919 = vmatpush.msra.mxu1 %v2890_v27 }
 0xb9c   :  { %3600 = vmatmul.msk.f32.vlgmr.msrb.gmra.mxu3 %vm294_vm0, %v2843_v52  ;;  %2920 = vmatpush.msra.mxu1 %v2889_v28  ;;  %v3096_v52 = vld [vmem:[#allocation16 + $0x278] sm:$0xff]  ;;  %v3286_v28 = vld [vmem:[#allocation16 + $0x368] sm:$0xff] }
 0xb9d   :  { %3255 = vmatpush.msrb.mxu3 %v4568_v39 }
 0xb9e   :  { %3097 = vmatpush.msrb.mxu1 %v3096_v52  ;;  %v3181_v52 = vld [vmem:[#allocation16 + $0x2a0] sm:$0xff] }
 0xb9f   :  { %3256 = vmatpush.msrb.mxu3 %v4570_v41 }
 0xba1   :  { %3257 = vmatpush.msrb.mxu3 %v4575_v42 }
 0xba3   :  { %3258 = vmatpush.msrb.mxu3 %v4580_v43 }
 0xba4   :  { %3601 = vmatmul.msk.f32.gmra.mxu3 %vm294_vm0, %v2844_v53  ;;  %v3000_v53 = vld [vmem:[#allocation16 + $0x1f8] sm:$0xff] }
 0xba5   :  { %3001 = vmatpush.msrb.mxu0 %v3000_v53  ;;  %v3275_v53 = vld [vmem:[#allocation16 + $0x310] sm:$0xff] }
 0xbac   :  { %3602 = vmatmul.msk.f32.gmra.mxu3 %vm294_vm0, %v2845_v54  ;;  %v2999_v54 = vld [vmem:[#allocation16 + $0x1f0] sm:$0xff] }
 0xbad   :  { %3002 = vmatpush.msrb.mxu0 %v2999_v54  ;;  %v3180_v54 = vld [vmem:[#allocation16 + $0x298] sm:$0xff] }
 0xbaf   :  { %3003 = vmatpush.msrb.mxu0 %v2998_v58  ;;  %v3179_v58 = vld [vmem:[#allocation16 + $0x290] sm:$0xff] }
 0xbb1   :  { %3004 = vmatpush.msrb.mxu0 %v2997_v61 }
 0xbb3   :  { %3005 = vmatpush.msrb.mxu0 %v2996_v62  ;;  %v3177_v62 = vld [vmem:[#allocation16 + $0x280] sm:$0xff] }
 0xbb4   :  { %3603 = vmatmul.msk.f32.gmra.mxu3 %vm294_vm0, %v2846_v55  ;;  %v3095_v55 = vld [vmem:[#allocation16 + $0x270] sm:$0xff] }
 0xbb5   :  { %3098 = vmatpush.msrb.mxu1 %v3095_v55  ;;  %3006 = vmatpush.msrb.mxu0 %v2995_v4 }
 0xbb7   :  { %3099 = vmatpush.msrb.mxu1 %v3094_v57  ;;  %3007 = vmatpush.msrb.mxu0 %v2994_v6  ;;  %v3274_v57 = vld [vmem:[#allocation16 + $0x308] sm:$0xff] }
 0xbb9   :  { %3100 = vmatpush.msrb.mxu1 %v3093_v59  ;;  %3008 = vmatpush.msrb.mxu0 %v2993_v9  ;;  %v3178_v59 = vld [vmem:[#allocation16 + $0x288] sm:$0xff] }
 0xbbb   :  { %3101 = vmatpush.msrb.mxu1 %v3092_v60  ;;  %3009 = vmatpush.msrb.mxu0 %v2992_v10  ;;  %v3273_v60 = vld [vmem:[#allocation16 + $0x300] sm:$0xff] }
 0xbbc   :  { %3608 = vmatmul.msk.f32.vlgmr.msra.gmra.mxu3 %vm294_vm0, %v3035_v22  ;;  %v2986_v22 = vld [vmem:[#allocation16 + $0x188] sm:$0xff] }
 0xbbd   :  { %3102 = vmatpush.msrb.mxu1 %v3091_v63  ;;  %3010 = vmatpush.msrb.mxu0 %v2991_v2 }
 0xbbf   :  { %3103 = vmatpush.msrb.mxu1 %v3090_v1  ;;  %3011 = vmatpush.msrb.mxu0 %v2990_v12 }
 0xbc1   :  { %3104 = vmatpush.msrb.mxu1 %v3089_v7  ;;  %3012 = vmatpush.msrb.mxu0 %v2989_v15 }
 0xbc3   :  { %3105 = vmatpush.msrb.mxu1 %v3088_v8  ;;  %3013 = vmatpush.msrb.mxu0 %v2988_v16 }
 0xbc4   :  { %3609 = vmatmul.msk.f32.gmra.mxu3 %vm294_vm0, %v3036_v26  ;;  %v3192_v26 = vld [vmem:[#allocation16 + $0x2f8] sm:$0xff] }
 0xbc5   :  { %3106 = vmatpush.msrb.mxu1 %v3087_v0  ;;  %3014 = vmatpush.msrb.mxu0 %v2987_v19 }
 0xbc7   :  { %3107 = vmatpush.msrb.mxu1 %v3086_v3  ;;  %3015 = vmatpush.msrb.mxu0 %v2986_v22 }
 0xbc9   :  { %3108 = vmatpush.msrb.mxu1 %v3085_v13 }
 0xbcb   :  { %3109 = vmatpush.msrb.mxu1 %v3084_v14 }
 0xbcc   :  { %3610 = vmatmul.msk.f32.gmra.mxu3 %vm294_vm0, %v3037_v29  ;;  %v3285_v29 = vld [vmem:[#allocation16 + $0x360] sm:$0xff] }
 0xbcd   :  { %3110 = vmatpush.msrb.mxu1 %v3083_v18 }
 0xbcf   :  { %3111 = vmatpush.msrb.mxu1 %v3082_v20 }
 0xbd1   :  { %3112 = vmatpush.msrb.mxu1 %v3081_v23 }
 0xbd4   :  { %3611 = vmatmul.msk.f32.gmra.mxu3 %vm294_vm0, %v3038_v32  ;;  %v3189_v32 = vld [vmem:[#allocation16 + $0x2e0] sm:$0xff] }
 0xbdc   :  { %3616 = vmatmul.msk.f32.vlgmr.msrb.gmra.mxu3 %vm294_vm0, %v3227_v35 }
 0xbe4   :  { %3617 = vmatmul.msk.f32.gmra.mxu3 %vm294_vm0, %v3228_v38  ;;  %v3186_v38 = vld [vmem:[#allocation16 + $0x2c8] sm:$0xff] }
 0xbfa   :  { %v2755_v5 = vpop.f32.mrf.mxu1 }
 0xbfb   :  { %2800 = vmatmul.f32.vlgmr.msrb.gmra.mxu2 %v2755_v5  ;;  %v2985_v5 = vld [vmem:[#allocation16 + $0x180] sm:$0xff] }
 0xbfc   :  { %3159 = vmatpush.msrb.mxu2 %v4568_v39  ;;  %3016 = vmatpush.msrb.mxu0 %v2985_v5 }
 0xbfe   :  { %3160 = vmatpush.msrb.mxu2 %v4570_v41  ;;  %v3229_v41 = vld [vmem:[#allocation15 + $0xd0] sm:$0xff] }
 0xbff   :  { %v2693_v56 = vpop.f32.mrf.mxu3  ;;  %3618 = vmatmul.msk.f32.gmra.mxu3 %vm294_vm0, %v3229_v41 }
 0xc00   :  { %3161 = vmatpush.msrb.mxu2 %v4575_v42  ;;  %2829 = vmatmul.f32.vlgmr.msra.gmra.mxu0 %v2693_v56  ;;  %v3191_v56 = vld [vmem:[#allocation16 + $0x2f0] sm:$0xff] }
 0xc01   :  { %3193 = vmatpush.msra.mxu0 %v3192_v26 }
 0xc02   :  { %3162 = vmatpush.msrb.mxu2 %v4580_v43  ;;  %v2758_v21 = vpop.f32.mrf.mxu1  ;;  %v2941_v43 = vld [vmem:[#allocation15 + $0x70] sm:$0xff] }
 0xc03   :  { %2803 = vmatmul.f32.gmra.mxu2 %v2758_v21  ;;  %v3190_v21 = vld [vmem:[#allocation16 + $0x2e8] sm:$0xff]  ;;  %3194 = vmatpush.msra.mxu0 %v3191_v56 }
 0xc05   :  { %3195 = vmatpush.msra.mxu0 %v3190_v21 }
 0xc07   :  { %v2696_v30 = vpop.f32.mrf.mxu3  ;;  %3619 = vmatmul.msk.f32.gmra.mxu3 %vm294_vm0, %v3230_v44  ;;  %3196 = vmatpush.msra.mxu0 %v3189_v32  ;;  %v3184_v44 = vld [vmem:[#allocation16 + $0x2b8] sm:$0xff] }
 0xc08   :  { %2832 = vmatmul.f32.gmra.mxu0 %v2696_v30  ;;  %v3284_v30 = vld [vmem:[#allocation16 + $0x358] sm:$0xff] }
 0xc0a   :  { %v2761_v31 = vpop.f32.mrf.mxu1 }
 0xc0b   :  { %2806 = vmatmul.f32.gmra.mxu2 %v2761_v31 }
 0xc0f   :  { %v2699_v33 = vpop.f32.mrf.mxu3 }
 0xc10   :  { %2835 = vmatmul.f32.gmra.mxu0 %v2699_v33  ;;  %v3283_v33 = vld [vmem:[#allocation16 + $0x350] sm:$0xff] }
 0xc12   :  { %v2764_v34 = vpop.f32.mrf.mxu1 }
 0xc13   :  { %2809 = vmatmul.f32.gmra.mxu2 %v2764_v34  ;;  %v3188_v34 = vld [vmem:[#allocation16 + $0x2d8] sm:$0xff] }
 0xc14   :  { %3197 = vmatpush.msra.mxu0 %v3188_v34 }
 0xc17   :  { %v2702_v36 = vpop.f32.mrf.mxu3 }
 0xc18   :  { %2838 = vmatmul.f32.gmra.mxu0 %v2702_v36  ;;  %v3187_v36 = vld [vmem:[#allocation16 + $0x2d0] sm:$0xff] }
 0xc19   :  { %3198 = vmatpush.msra.mxu0 %v3187_v36 }
 0xc1b   :  { %3604 = vmatmul.msk.f32.vlgmr.msra.gmra.mxu2 %vm294_vm0, %v2939_v37  ;;  %v3282_v37 = vld [vmem:[#allocation16 + $0x348] sm:$0xff]  ;;  %3199 = vmatpush.msra.mxu0 %v3186_v38 }
 0xc1c   :  { %3620 = vmatpush.msra.mxu2 %v3288_v11 }
 0xc1e   :  { %3621 = vmatpush.msra.mxu2 %v3287_v25 }
 0xc1f   :  { %v2876_v39 = vpop.f32.mrf.mxu3 }
 0xc20   :  { %2921 = vmatmul.f32.vlgmr.msra.gmra.mxu1 %v2876_v39  ;;  %3622 = vmatpush.msra.mxu2 %v3286_v28  ;;  %v3281_v39 = vld [vmem:[#allocation16 + $0x340] sm:$0xff] }
 0xc21   :  { %3289 = vmatpush.msra.mxu1 %v3288_v11 }
 0xc22   :  { %3623 = vmatpush.msra.mxu2 %v3285_v29 }
 0xc23   :  { %3605 = vmatmul.msk.f32.gmra.mxu2 %vm294_vm0, %v2940_v40  ;;  %3290 = vmatpush.msra.mxu1 %v3287_v25  ;;  %v3280_v40 = vld [vmem:[#allocation16 + $0x338] sm:$0xff] }
 0xc24   :  { %3624 = vmatpush.msra.mxu2 %v3284_v30 }
 0xc25   :  { %3291 = vmatpush.msra.mxu1 %v3286_v28 }
 0xc26   :  { %3625 = vmatpush.msra.mxu2 %v3283_v33 }
 0xc27   :  { %v2879_v42 = vpop.f32.mrf.mxu3  ;;  %3292 = vmatpush.msra.mxu1 %v3285_v29 }
 0xc28   :  { %2924 = vmatmul.f32.gmra.mxu1 %v2879_v42  ;;  %3626 = vmatpush.msra.mxu2 %v3282_v37  ;;  %v3185_v42 = vld [vmem:[#allocation16 + $0x2c0] sm:$0xff] }
 0xc29   :  { %3293 = vmatpush.msra.mxu1 %v3284_v30  ;;  %3200 = vmatpush.msra.mxu0 %v3185_v42 }
 0xc2a   :  { %3627 = vmatpush.msra.mxu2 %v3281_v39 }
 0xc2b   :  { %3606 = vmatmul.msk.f32.gmra.mxu2 %vm294_vm0, %v2941_v43  ;;  %3294 = vmatpush.msra.mxu1 %v3283_v33  ;;  %v3279_v43 = vld [vmem:[#allocation16 + $0x330] sm:$0xff] }
 0xc2c   :  { %3628 = vmatpush.msra.mxu2 %v3280_v40  ;;  %3201 = vmatpush.msra.mxu0 %v3184_v44 }
 0xc2d   :  { %3295 = vmatpush.msra.mxu1 %v3282_v37 }
 0xc2e   :  { %3629 = vmatpush.msra.mxu2 %v3279_v43 }
 0xc2f   :  { %v2882_v45 = vpop.f32.mrf.mxu3  ;;  %3296 = vmatpush.msra.mxu1 %v3281_v39 }
 0xc30   :  { %2927 = vmatmul.f32.gmra.mxu1 %v2882_v45 }
 0xc31   :  { %3297 = vmatpush.msra.mxu1 %v3280_v40 }
 0xc33   :  { %3607 = vmatmul.msk.f32.gmra.mxu2 %vm294_vm0, %v2942_v46  ;;  %v3183_v46 = vld [vmem:[#allocation16 + $0x2b0] sm:$0xff]  ;;  %3298 = vmatpush.msra.mxu1 %v3279_v43 }
 0xc34   :  { %3202 = vmatpush.msra.mxu0 %v3183_v46 }
 0xc37   :  { %v2885_v47 = vpop.f32.mrf.mxu3 }
 0xc38   :  { %2930 = vmatmul.f32.gmra.mxu1 %v2885_v47  ;;  %v3278_v47 = vld [vmem:[#allocation16 + $0x328] sm:$0xff] }
 0xc39   :  { %3299 = vmatpush.msra.mxu1 %v3278_v47  ;;  %3630 = vmatpush.msra.mxu2 %v3278_v47 }
 0xc3b   :  { %3612 = vmatmul.msk.f32.vlgmr.msrb.gmra.mxu2 %vm294_vm0, %v3131_v48  ;;  %v3182_v48 = vld [vmem:[#allocation16 + $0x2a8] sm:$0xff] }
 0xc3c   :  { %3203 = vmatpush.msra.mxu0 %v3182_v48 }
 0xc3e   :  { %3204 = vmatpush.msra.mxu0 %v3181_v52 }
 0xc3f   :  { %v3068_v17 = vpop.f32.mrf.mxu3 }
 0xc40   :  { %3113 = vmatmul.f32.vlgmr.msrb.gmra.mxu1 %v3068_v17  ;;  %3205 = vmatpush.msra.mxu0 %v3180_v54 }
 0xc42   :  { %3206 = vmatpush.msra.mxu0 %v3179_v58 }
 0xc43   :  { %3613 = vmatmul.msk.f32.gmra.mxu2 %vm294_vm0, %v3132_v49  ;;  %v3277_v49 = vld [vmem:[#allocation16 + $0x320] sm:$0xff] }
 0xc44   :  { %3300 = vmatpush.msra.mxu1 %v3277_v49  ;;  %3631 = vmatpush.msra.mxu2 %v3277_v49 }
 0xc45   :  { %3207 = vmatpush.msra.mxu0 %v3178_v59 }
 0xc47   :  { %v3071_v27 = vpop.f32.mrf.mxu3  ;;  %3208 = vmatpush.msra.mxu0 %v3177_v62 }
 0xc48   :  { %3116 = vmatmul.f32.gmra.mxu1 %v3071_v27 }
 0xc4b   :  { %3614 = vmatmul.msk.f32.gmra.mxu2 %vm294_vm0, %v3133_v50  ;;  %v3276_v50 = vld [vmem:[#allocation16 + $0x318] sm:$0xff] }
 0xc4c   :  { %3301 = vmatpush.msra.mxu1 %v3276_v50  ;;  %3632 = vmatpush.msra.mxu2 %v3276_v50 }
 0xc4e   :  { %3302 = vmatpush.msra.mxu1 %v3275_v53  ;;  %3633 = vmatpush.msra.mxu2 %v3275_v53 }
 0xc4f   :  { %v3074_v35 = vpop.f32.mrf.mxu3 }
 0xc50   :  { %3119 = vmatmul.f32.gmra.mxu1 %v3074_v35  ;;  %3634 = vmatpush.msra.mxu2 %v3274_v57  ;;  %v3688_v35 = vld [vmem:[%s4150_s3] ss:$0 sm:$0xff] }
 0xc51   :  { %3303 = vmatpush.msra.mxu1 %v3274_v57 }
 0xc52   :  { %3635 = vmatpush.msra.mxu2 %v3273_v60 }
 0xc53   :  { %3615 = vmatmul.msk.f32.gmra.mxu2 %vm294_vm0, %v3134_v51  ;;  %3304 = vmatpush.msra.mxu1 %v3273_v60 }
 0xc57   :  { %v3077_v45 = vpop.f32.mrf.mxu3 }
 0xc58   :  { %3122 = vmatmul.f32.gmra.mxu1 %v3077_v45 }
 0xc5f   :  { %v3260_v55 = vpop.f32.mrf.mxu3 }
 0xc60   :  { %3305 = vmatmul.f32.vlgmr.msra.gmra.mxu1 %v3260_v55 }
 0xc67   :  { %v3263_v63 = vpop.f32.mrf.mxu3 }
 0xc68   :  { %3308 = vmatmul.f32.gmra.mxu1 %v3263_v63 }
 0xc7d   :  { %v2830_v12 = vpop.f32.mrf.mxu0 }
 0xc7e   :  { %v4632_v24 = vpop.f32.mrf.mxu2 }
 0xc7f   :  { %v2831_v26 = vadd.f32 %v2830_v12, %v4632_v24 }
 0xc82   :  { %v3266_v1 = vpop.f32.mrf.mxu3 }
 0xc83   :  { %3311 = vmatmul.f32.vlgmr.msra.gmra.mxu2 %v3266_v1 }
 0xc85   :  { %v2833_v14 = vpop.f32.mrf.mxu0 }
 0xc86   :  { %v4634_v31 = vpop.f32.mrf.mxu2 }
 0xc87   :  { %v2834_v21 = vadd.f32 %v2833_v14, %v4634_v31 }
 0xc8a   :  { %v3269_v7 = vpop.f32.mrf.mxu3 }
 0xc8b   :  { %3314 = vmatmul.f32.gmra.mxu2 %v3269_v7 }
 0xc8d   :  { %v2836_v16 = vpop.f32.mrf.mxu0 }
 0xc8e   :  { %v4636_v41 = vpop.f32.mrf.mxu2 }
 0xc8f   :  { %v2837_v39 = vadd.f32 %v2836_v16, %v4636_v41 }
 0xc95   :  { %v2839_v18 = vpop.f32.mrf.mxu0 }
 0xc96   :  { %v4638_v51 = vpop.f32.mrf.mxu2 }
 0xc97   :  { %v2840_v49 = vadd.f32 %v2839_v18, %v4638_v51 }
 0xc9d   :  { %v2922_v3 = vpop.f32.mrf.mxu1 }
 0xc9e   :  { %v2972_v61 = vpop.f32.mrf.mxu2  ;;  %v2934_v56 = vadd.f32 %v2922_v3, %v2831_v26 }
 0xc9f   :  { %3017 = vmatmul.f32.vlgmr.msrb.gmra.mxu0 %v2972_v61 }
 0xca5   :  { %v2925_v13 = vpop.f32.mrf.mxu1 }
 0xca6   :  { %v2975_v4 = vpop.f32.mrf.mxu2  ;;  %v2935_v33 = vadd.f32 %v2925_v13, %v2834_v21 }
 0xca7   :  { %3020 = vmatmul.f32.gmra.mxu0 %v2975_v4 }
 0xcad   :  { %v2928_v15 = vpop.f32.mrf.mxu1 }
 0xcae   :  { %v2978_v6 = vpop.f32.mrf.mxu2  ;;  %v2936_v42 = vadd.f32 %v2928_v15, %v2837_v39 }
 0xcaf   :  { %3023 = vmatmul.f32.gmra.mxu0 %v2978_v6 }
 0xcb5   :  { %v2931_v17 = vpop.f32.mrf.mxu1 }
 0xcb6   :  { %v2981_v8 = vpop.f32.mrf.mxu2  ;;  %v2937_v41 = vadd.f32 %v2931_v17, %v2840_v49 }
 0xcb7   :  { %3026 = vmatmul.f32.gmra.mxu0 %v2981_v8 }
 0xcbd   :  { %v3114_v19 = vpop.f32.mrf.mxu1 }
 0xcbe   :  { %v3164_v9 = vpop.f32.mrf.mxu2 }
 0xcbf   :  { %3209 = vmatmul.f32.vlgmr.msra.gmra.mxu0 %v3164_v9 }
 0xcc5   :  { %v3117_v22 = vpop.f32.mrf.mxu1 }
 0xcc6   :  { %v3167_v10 = vpop.f32.mrf.mxu2 }
 0xcc7   :  { %3212 = vmatmul.f32.gmra.mxu0 %v3167_v10 }
 0xccd   :  { %v3120_v11 = vpop.f32.mrf.mxu1 }
 0xcce   :  { %v3170_v0 = vpop.f32.mrf.mxu2 }
 0xccf   :  { %3215 = vmatmul.f32.gmra.mxu0 %v3170_v0 }
 0xcd5   :  { %v3123_v25 = vpop.f32.mrf.mxu1 }
 0xcd6   :  { %v3173_v2 = vpop.f32.mrf.mxu2 }
 0xcd7   :  { %3218 = vmatmul.f32.gmra.mxu0 %v3173_v2 }
 0xcdd   :  { %v3306_v32 = vpop.f32.mrf.mxu1 }
 0xce5   :  { %v3309_v44 = vpop.f32.mrf.mxu1 }
 0xd06   :  { %v3312_v48 = vpop.f32.mrf.mxu2 }
 0xd0e   :  { %v3315_v61 = vpop.f32.mrf.mxu2 }
 0xd1c   :  { %v3018_v20 = vpop.f32.mrf.mxu0 }
 0xd1d   :  { %v3030_v28 = vadd.f32 %v3018_v20, %v2934_v56 }
 0xd1f   :  { %v3126_v29 = vadd.f32 %v3114_v19, %v3030_v28 }
 0xd24   :  { %v3021_v23 = vpop.f32.mrf.mxu0 }
 0xd25   :  { %v3031_v36 = vadd.f32 %v3021_v23, %v2935_v33 }
 0xd27   :  { %v3127_v40 = vadd.f32 %v3117_v22, %v3031_v36 }
 0xd2c   :  { %v3024_v5 = vpop.f32.mrf.mxu0 }
 0xd2d   :  { %v3032_v45 = vadd.f32 %v3024_v5, %v2936_v42 }
 0xd2f   :  { %v3128_v50 = vadd.f32 %v3120_v11, %v3032_v45 }
 0xd34   :  { %v3027_v27 = vpop.f32.mrf.mxu0 }
 0xd35   :  { %v3033_v54 = vadd.f32 %v3027_v27, %v2937_v41 }
 0xd37   :  { %v3129_v59 = vadd.f32 %v3123_v25, %v3033_v54 }
 0xd3c   :  { %v3210_v30 = vpop.f32.mrf.mxu0 }
 0xd3d   :  { %v3222_v34 = vadd.f32 %v3210_v30, %v3126_v29 }
 0xd3f   :  { %v3318_v37 = vadd.f32 %v3306_v32, %v3222_v34 }
 0xd41   :  { %v3326_v38 = vadd.f32 %v3688_v35, %v3318_v37 }
 0xd43   :  { %3689 = vtanh.f32 %v3326_v38 }
 0xd44   :  { %v3213_v24 = vpop.f32.mrf.mxu0 }
 0xd45   :  { %v3223_v43 = vadd.f32 %v3213_v24, %v3127_v40 }
 0xd47   :  { %v3319_v31 = vadd.f32 %v3309_v44, %v3223_v43 }
 0xd49   :  { %v3690_v46 = vpop.eup %3689  ;;  %v3327_v47 = vadd.f32 %v3688_v35, %v3319_v31 }
 0xd4a   :  { %3334 = vst [vmem:[%s4155_s14] sm:$0xff] %v3690_v46 }
 0xd4b   :  { %3691 = vtanh.f32 %v3327_v47 }
 0xd4c   :  { %v3216_v52 = vpop.f32.mrf.mxu0 }
 0xd4d   :  { %v3224_v53 = vadd.f32 %v3216_v52, %v3128_v50 }
 0xd4f   :  { %v3320_v55 = vadd.f32 %v3312_v48, %v3224_v53 }
 0xd51   :  { %v3692_v58 = vpop.eup %3691  ;;  %v3328_v57 = vadd.f32 %v3688_v35, %v3320_v55 }
 0xd52   :  { %3335 = vst [vmem:[%s4155_s14 + $0x8] sm:$0xff] %v3692_v58 }
 0xd53   :  { %3693 = vtanh.f32 %v3328_v57 }
 0xd54   :  { %v3219_v60 = vpop.f32.mrf.mxu0 }
 0xd55   :  { %v3225_v62 = vadd.f32 %v3219_v60, %v3129_v59 }
 0xd57   :  { %v3321_v63 = vadd.f32 %v3315_v61, %v3225_v62 }
 0xd59   :  { %v3694_v4 = vpop.eup %3693  ;;  %v3329_v51 = vadd.f32 %v3688_v35, %v3321_v63 }
 0xd5a   :  { %3336 = vst [vmem:[%s4155_s14 + $0x10] sm:$0xff] %v3694_v4 }
 0xd5b   :  { %3695 = vtanh.f32 %v3329_v51 }
 0xd61   :  { %v3696_v1 = vpop.eup %3695 }
 0xd62   :  { %3337 = vst [vmem:[%s4155_s14 + $0x18] sm:$0xff] %v3696_v1 }
 0xd63   :  { %3342 = vsyncpa [#allocation3], 1 }
 0xd64   :  { %3343 = vsyncpa [#allocation5], 1 }
 0xd65   :  { %3344 = vsyncpa [#allocation8], 1 }
 0xd66   :  { %3345 = vsyncpa [#allocation11], 1 }
 0xd67   :  { %3346 = vsyncpa [#allocation14], 1 }
 0xd68   :  { %3347 = vsyncpa [#allocation17], 1 }

</bundles_post_ra>
